<compile_context>
chip_gen: v7x
topology: tpu7x:2x2x1
jax: 0.10.0
libtpu: 0.0.40
codegen_flags: <defaults>
</compile_context>

<pallas_src>
import functools

import jax
import jax.numpy as jnp
from jax import lax
from jax.experimental import pallas as pl
from jax.experimental.pallas import tpu as pltpu

# ------------------------- scaled-down config ------------------------------
HIDDEN = 32            # emb_dim == bert hidden_size (768 in the original)
N_HEADS = 2
HEAD_DIM = HIDDEN // N_HEADS
INTERMEDIATE = 4 * HIDDEN     # 128 (lane-dense FFN activation)
N_LAYERS = 2
VOCAB = 50
MAX_BERT_POS = 16
TYPE_VOCAB = 2
MAX_QPP_POS = 16       # position_enc table (1000 in the original)
UTIL_H = 100
N_CLASSES = 5
LN_EPS = 1e-12

_VMEM = pl.BlockSpec(memory_space=pltpu.MemorySpace.VMEM)


# ----------------------------- in-kernel helpers -----------------------------
def _ln(x, g, b, eps=LN_EPS):
    mean = jnp.mean(x, axis=-1, keepdims=True)
    xc = x - mean
    var = jnp.mean(xc * xc, axis=-1, keepdims=True)
    return xc * jax.lax.rsqrt(var + eps) * g + b


def _gelu(y):  # exact (erf) GELU, as in HF BERT
    return 0.5 * y * (1.0 + jax.lax.erf(y * jnp.float32(0.7071067811865476)))


# ------------------- single fused BERT + LSTM + head kernel -------------------
def _qpp_kernel(ids_ref, tids_ref, mask_ref, pos_ids_ref,
                wemb_ref, bpe_ref, temb_ref, eg_ref, eb_ref,
                wqkv_ref, bqkv_ref, wo_ref, bo_ref, g1_ref, b1_ref,
                wi_ref, bi_ref, wf_ref, bf_ref, g2_ref, b2_ref,
                qpe_ref,
                wih_ref, whh_ref, lb_ref,
                uw1_ref, ub1_ref, uw2_ref, ub2_ref,
                o_ref, *, nq, seq):
    ns = nq * seq
    H = HIDDEN

    # ---- BERT embeddings as one-hot matmuls (no XLA gathers in the wrapper) ----
    ids = ids_ref[...]                       # (ns, 1) int32
    tids = tids_ref[...]                     # (ns, 1) int32
    word_oh = (ids == lax.broadcasted_iota(jnp.int32, (ns, VOCAB), 1)
               ).astype(jnp.float32)         # (ns, VOCAB)
    type_oh = (tids == lax.broadcasted_iota(jnp.int32, (ns, TYPE_VOCAB), 1)
               ).astype(jnp.float32)         # (ns, TYPE_VOCAB)
    emb = (jnp.dot(word_oh, wemb_ref[...], preferred_element_type=jnp.float32)
           + jnp.dot(type_oh, temb_ref[...], preferred_element_type=jnp.float32))
    pos_seq = bpe_ref[...][:seq, :]          # (seq, H) static slice, replicated below
    emb = emb + jnp.concatenate([pos_seq] * nq, axis=0)
    x = _ln(emb, eg_ref[...], eb_ref[...])   # embedding LayerNorm; x stays in vregs

    # additive attention mask: (1 - mask) * -10000, shared across heads/queries
    bias = (1.0 - mask_ref[...].astype(jnp.float32)) * jnp.float32(-10000.0)  # (nq, seq)

    scale = jnp.float32(1.0 / (HEAD_DIM ** 0.5))
    contract_last = (((1,), (1,)), ((), ()))     # s = q @ k^T without explicit transpose

    # ---- encoder layers: static unrolled loop, resident stacked weights ----
    for l in range(N_LAYERS):
        # fused QKV projection: one (H, 3H) matmul
        qkv = jnp.dot(x, wqkv_ref[l], preferred_element_type=jnp.float32) + bqkv_ref[l]
        q = qkv[:, 0 * H:1 * H]
        k = qkv[:, 1 * H:2 * H]
        v = qkv[:, 2 * H:3 * H]

        # per (sequence, head) attention; head contexts kept in vregs and
        # concatenated (lane concat per sequence, sublane concat across sequences)
        ctx_rows = []
        for b in range(nq):
            rows = slice(b * seq, (b + 1) * seq)
            bias_b = bias[b:b + 1, :]            # (1, S), same for every head/query
            heads = []
            for h in range(N_HEADS):
                cols = slice(h * HEAD_DIM, (h + 1) * HEAD_DIM)
                qh = q[rows, cols]               # (S, dh)
                kh = k[rows, cols]
                vh = v[rows, cols]
                s = lax.dot_general(qh, kh, contract_last,
                                    preferred_element_type=jnp.float32)
                s = s * scale + bias_b           # (S, S)
                m = jnp.max(s, axis=-1, keepdims=True)
                p = jnp.exp(s - m)
                p = p * pl.reciprocal(jnp.sum(p, axis=-1, keepdims=True), approx=True)
                heads.append(jnp.dot(p, vh, preferred_element_type=jnp.float32))
            ctx_rows.append(jnp.concatenate(heads, axis=-1))    # (S, H)
        ctx = jnp.concatenate(ctx_rows, axis=0)                 # (ns, H) in vregs

        # output projection + residual + LN
        attn = jnp.dot(ctx, wo_ref[l], preferred_element_type=jnp.float32) + bo_ref[l]
        x = _ln(attn + x, g1_ref[l], b1_ref[l])

        # FFN (exact-erf GELU) + residual + LN
        inter = _gelu(jnp.dot(x, wi_ref[l], preferred_element_type=jnp.float32) + bi_ref[l])
        ffn = jnp.dot(inter, wf_ref[l], preferred_element_type=jnp.float32) + bf_ref[l]
        x = _ln(ffn + x, g2_ref[l], b2_ref[l])

    # ---- CLS rows + position_enc(pos_list) -> LSTM input res (nq, H) ----
    cls = jnp.concatenate([x[b * seq:b * seq + 1, :] for b in range(nq)], axis=0)
    pos_oh = (pos_ids_ref[...] == lax.broadcasted_iota(jnp.int32, (nq, MAX_QPP_POS), 1)
              ).astype(jnp.float32)                               # (nq, MAX_QPP_POS)
    res = cls + jnp.dot(pos_oh, qpe_ref[...], preferred_element_type=jnp.float32)

    # ---- LSTM (seq_len=nq, batch=1): hoisted input projection + unrolled recurrence
    gates_x = jnp.dot(res, wih_ref[...], preferred_element_type=jnp.float32) + lb_ref[...]
    whh = whh_ref[...]
    hprev = jnp.zeros((1, H), jnp.float32)
    c = jnp.zeros((1, H), jnp.float32)
    for t in range(nq):   # gate order i, f, g, o (PyTorch)
        g = gates_x[t:t + 1, :] + jnp.dot(hprev, whh, preferred_element_type=jnp.float32)
        i = jax.nn.sigmoid(g[:, 0 * H:1 * H])
        f = jax.nn.sigmoid(g[:, 1 * H:2 * H])
        gg = jnp.tanh(g[:, 2 * H:3 * H])
        o = jax.nn.sigmoid(g[:, 3 * H:4 * H])
        c = f * c + i * gg
        hprev = o * jnp.tanh(c)

    # ---- utility head: Linear(H,100) -> Linear(100,5) -> LogSoftmax(dim=1) ----
    hid = jnp.dot(hprev, uw1_ref[...], preferred_element_type=jnp.float32) + ub1_ref[...]
    logits = jnp.dot(hid, uw2_ref[...], preferred_element_type=jnp.float32) + ub2_ref[...]
    m = jnp.max(logits, axis=-1, keepdims=True)
    z = logits - m
    o_ref[...] = z - jnp.log(jnp.sum(jnp.exp(z), axis=-1, keepdims=True))


# ------------------------------ parameters ----------------------------------
def init_params(key):
    ks = iter(jax.random.split(key, 32))

    def nrm(shape, scale=0.02):
        return scale * jax.random.normal(next(ks), shape, dtype=jnp.float32)

    return dict(
        word_emb=nrm((VOCAB, HIDDEN)),
        bert_pos_emb=nrm((MAX_BERT_POS, HIDDEN)),
        type_emb=nrm((TYPE_VOCAB, HIDDEN)),
        emb_ln_g=jnp.ones((1, HIDDEN), jnp.float32),
        emb_ln_b=jnp.zeros((1, HIDDEN), jnp.float32),
        # encoder weights stacked along a leading layer axis; Q|K|V fused to (H, 3H)
        wqkv=nrm((N_LAYERS, HIDDEN, 3 * HIDDEN)),
        bqkv=jnp.zeros((N_LAYERS, 1, 3 * HIDDEN), jnp.float32),
        wo=nrm((N_LAYERS, HIDDEN, HIDDEN)),
        bo=jnp.zeros((N_LAYERS, 1, HIDDEN), jnp.float32),
        ln1_g=jnp.ones((N_LAYERS, 1, HIDDEN), jnp.float32),
        ln1_b=jnp.zeros((N_LAYERS, 1, HIDDEN), jnp.float32),
        wi=nrm((N_LAYERS, HIDDEN, INTERMEDIATE)),
        bi=jnp.zeros((N_LAYERS, 1, INTERMEDIATE), jnp.float32),
        wf=nrm((N_LAYERS, INTERMEDIATE, HIDDEN)),
        bf=jnp.zeros((N_LAYERS, 1, HIDDEN), jnp.float32),
        ln2_g=jnp.ones((N_LAYERS, 1, HIDDEN), jnp.float32),
        ln2_b=jnp.zeros((N_LAYERS, 1, HIDDEN), jnp.float32),
        # torch.nn.Embedding(max_pos, emb_dim, padding_idx=0): row 0 zeroed
        position_enc=nrm((MAX_QPP_POS, HIDDEN)).at[0].set(0.0),
        # LSTM: weights pre-transposed to (in, 4H); b = b_ih + b_hh; gate order i,f,g,o
        lstm_wih=nrm((HIDDEN, 4 * HIDDEN), 0.05),
        lstm_whh=nrm((HIDDEN, 4 * HIDDEN), 0.05),
        lstm_b=nrm((1, 4 * HIDDEN), 0.05),
        util_w1=nrm((HIDDEN, UTIL_H), 0.05),
        util_b1=jnp.zeros((1, UTIL_H), jnp.float32),
        util_w2=nrm((UTIL_H, N_CLASSES), 0.05),
        util_b2=jnp.zeros((1, N_CLASSES), jnp.float32),
    )


# ------------------------------ forward (glue) -------------------------------
def forward(params, pos_list, input_ids, attention_mask, token_type_ids):
    nq, seq = input_ids.shape
    # Only free layout ops in the wrapper: flatten ids to (nq*seq, 1) int32 columns.
    ids = input_ids.reshape(-1, 1).astype(jnp.int32)
    tids = token_type_ids.reshape(-1, 1).astype(jnp.int32)
    pos_ids = pos_list.reshape(-1, 1).astype(jnp.int32)
    mask = attention_mask.astype(jnp.int32)

    kernel = functools.partial(_qpp_kernel, nq=nq, seq=seq)
    return pl.pallas_call(
        kernel,
        out_shape=jax.ShapeDtypeStruct((1, N_CLASSES), jnp.float32),
        in_specs=[_VMEM] * 29,
        out_specs=_VMEM,
    )(ids, tids, mask, pos_ids,
      params["word_emb"], params["bert_pos_emb"], params["type_emb"],
      params["emb_ln_g"], params["emb_ln_b"],
      params["wqkv"], params["bqkv"], params["wo"], params["bo"],
      params["ln1_g"], params["ln1_b"], params["wi"], params["bi"],
      params["wf"], params["bf"], params["ln2_g"], params["ln2_b"],
      params["position_enc"],
      params["lstm_wih"], params["lstm_whh"], params["lstm_b"],
      params["util_w1"], params["util_b1"], params["util_w2"], params["util_b2"])


# --------------------------------- main --------------------------------------
if __name__ == "__main__":
    key = jax.random.PRNGKey(0)
    pkey, dkey = jax.random.split(key)
    params = init_params(pkey)

    NQ, SEQ = 4, 8
    k1, k2 = jax.random.split(dkey)
    input_ids = jax.random.randint(k1, (NQ, SEQ), 0, VOCAB, dtype=jnp.int32)
    token_type_ids = jnp.zeros((NQ, SEQ), jnp.int32)
    # ones with a couple of padded (masked) trailing tokens to exercise the mask path
    attention_mask = jnp.ones((NQ, SEQ), jnp.int32).at[:, SEQ - 2:].set(
        jax.random.randint(k2, (NQ, 2), 0, 2, dtype=jnp.int32))
    pos_list = jnp.arange(1, NQ + 1, dtype=jnp.int32)   # positions 1..NQ (< MAX_QPP_POS)

    out = jax.jit(forward)(params, pos_list, input_ids, attention_mask, token_type_ids)
    out = jax.block_until_ready(out)
    assert out.shape == (1, N_CLASSES) and out.dtype == jnp.float32
    # TODO(synk): pretrained bert-base-uncased weights are replaced by deterministic
    # synthetic parameters (scaled dims); dropout layers are eval-mode identities.
    # TODO(synk): at real BERT-base dims (H=768, I=3072) the resident-weight scheme
    # must switch to bf16 weights + FFN K-tiling (and a parallel query-block grid
    # axis for v7x's second TensorCore); see perf-review notes.
    print("KERNEL_OK")
</pallas_src>

<mosaic_0001>
module attributes {stable_mosaic.version = 11 : i64} {
  func.func @_qpp_kernel(%arg0: memref<32x1xi32, #tpu.memory_space<vmem>>, %arg1: memref<32x1xi32, #tpu.memory_space<vmem>>, %arg2: memref<4x8xi32, #tpu.memory_space<vmem>>, %arg3: memref<4x1xi32, #tpu.memory_space<vmem>>, %arg4: memref<50x32xf32, #tpu.memory_space<vmem>>, %arg5: memref<16x32xf32, #tpu.memory_space<vmem>>, %arg6: memref<2x32xf32, #tpu.memory_space<vmem>>, %arg7: memref<1x32xf32, #tpu.memory_space<vmem>>, %arg8: memref<1x32xf32, #tpu.memory_space<vmem>>, %arg9: memref<2x32x96xf32, #tpu.memory_space<vmem>>, %arg10: memref<2x1x96xf32, #tpu.memory_space<vmem>>, %arg11: memref<2x32x32xf32, #tpu.memory_space<vmem>>, %arg12: memref<2x1x32xf32, #tpu.memory_space<vmem>>, %arg13: memref<2x1x32xf32, #tpu.memory_space<vmem>>, %arg14: memref<2x1x32xf32, #tpu.memory_space<vmem>>, %arg15: memref<2x32x128xf32, #tpu.memory_space<vmem>>, %arg16: memref<2x1x128xf32, #tpu.memory_space<vmem>>, %arg17: memref<2x128x32xf32, #tpu.memory_space<vmem>>, %arg18: memref<2x1x32xf32, #tpu.memory_space<vmem>>, %arg19: memref<2x1x32xf32, #tpu.memory_space<vmem>>, %arg20: memref<2x1x32xf32, #tpu.memory_space<vmem>>, %arg21: memref<16x32xf32, #tpu.memory_space<vmem>>, %arg22: memref<32x128xf32, #tpu.memory_space<vmem>>, %arg23: memref<32x128xf32, #tpu.memory_space<vmem>>, %arg24: memref<1x128xf32, #tpu.memory_space<vmem>>, %arg25: memref<32x100xf32, #tpu.memory_space<vmem>>, %arg26: memref<1x100xf32, #tpu.memory_space<vmem>>, %arg27: memref<100x5xf32, #tpu.memory_space<vmem>>, %arg28: memref<1x5xf32, #tpu.memory_space<vmem>>, %arg29: memref<1x5xf32, #tpu.memory_space<vmem>>) attributes {dimension_semantics = [], scalar_prefetch = 0 : i64, scratch_operands = 0 : i64, tpu.core_type = #tpu.core_type<tc>} {
    %c0 = arith.constant 0 : index
    %c0_0 = arith.constant 0 : index
    %0 = vector.load %arg0[%c0, %c0_0] : memref<32x1xi32, #tpu.memory_space<vmem>>, vector<32x1xi32>
    %c0_1 = arith.constant 0 : index
    %c0_2 = arith.constant 0 : index
    %1 = vector.load %arg1[%c0_1, %c0_2] : memref<32x1xi32, #tpu.memory_space<vmem>>, vector<32x1xi32>
    %2 = tpu.iota {dimensions = array<i32: 1>} : vector<32x50xi32>
    %3 = vector.broadcast %0 : vector<32x1xi32> to vector<32x50xi32>
    %4 = arith.cmpi eq, %3, %2 : vector<32x50xi32>
    %5 = arith.extui %4 : vector<32x50xi1> to vector<32x50xi32>
    %6 = arith.sitofp %5 : vector<32x50xi32> to vector<32x50xf32>
    %7 = tpu.iota {dimensions = array<i32: 1>} : vector<32x2xi32>
    %8 = vector.broadcast %1 : vector<32x1xi32> to vector<32x2xi32>
    %9 = arith.cmpi eq, %8, %7 : vector<32x2xi32>
    %10 = arith.extui %9 : vector<32x2xi1> to vector<32x2xi32>
    %11 = arith.sitofp %10 : vector<32x2xi32> to vector<32x2xf32>
    %c0_3 = arith.constant 0 : index
    %c0_4 = arith.constant 0 : index
    %12 = vector.load %arg4[%c0_3, %c0_4] : memref<50x32xf32, #tpu.memory_space<vmem>>, vector<50x32xf32>
    %cst = arith.constant dense<0.000000e+00> : vector<32x32xf32>
    %13 = tpu.matmul %6, %12, %cst {dimension_numbers = #tpu.dot_dimension_numbers<[1], [0], [0], [1], [0, 0, 1, 1], [], []>} : vector<32x50xf32>, vector<50x32xf32>, vector<32x32xf32> -> vector<32x32xf32>
    %c0_5 = arith.constant 0 : index
    %c0_6 = arith.constant 0 : index
    %14 = vector.load %arg6[%c0_5, %c0_6] : memref<2x32xf32, #tpu.memory_space<vmem>>, vector<2x32xf32>
    %cst_7 = arith.constant dense<0.000000e+00> : vector<32x32xf32>
    %15 = tpu.matmul %11, %14, %cst_7 {dimension_numbers = #tpu.dot_dimension_numbers<[1], [0], [0], [1], [0, 0, 1, 1], [], []>} : vector<32x2xf32>, vector<2x32xf32>, vector<32x32xf32> -> vector<32x32xf32>
    %16 = arith.addf %13, %15 : vector<32x32xf32>
    %c0_8 = arith.constant 0 : index
    %c0_9 = arith.constant 0 : index
    %17 = vector.load %arg5[%c0_8, %c0_9] : memref<16x32xf32, #tpu.memory_space<vmem>>, vector<16x32xf32>
    %18 = vector.extract_strided_slice %17 {offsets = [0, 0], sizes = [8, 32], strides = [1, 1]} : vector<16x32xf32> to vector<8x32xf32>
    %19 = tpu.concatenate %18, %18, %18, %18 in 0 : vector<8x32xf32>, vector<8x32xf32>, vector<8x32xf32>, vector<8x32xf32> -> vector<32x32xf32>
    %20 = arith.addf %16, %19 : vector<32x32xf32>
    %c0_10 = arith.constant 0 : index
    %c0_11 = arith.constant 0 : index
    %21 = vector.load %arg7[%c0_10, %c0_11] : memref<1x32xf32, #tpu.memory_space<vmem>>, vector<1x32xf32>
    %c0_12 = arith.constant 0 : index
    %c0_13 = arith.constant 0 : index
    %22 = vector.load %arg8[%c0_12, %c0_13] : memref<1x32xf32, #tpu.memory_space<vmem>>, vector<1x32xf32>
    %cst_14 = arith.constant dense<0.000000e+00> : vector<32xf32>
    %23 = vector.multi_reduction <add>, %20, %cst_14 [1] : vector<32x32xf32> to vector<32xf32>
    %24 = vector.shape_cast %23 : vector<32xf32> to vector<32x1xf32>
    %cst_15 = arith.constant 3.200000e+01 : f32
    %25 = vector.broadcast %cst_15 : f32 to vector<32x1xf32>
    %26 = arith.divf %24, %25 : vector<32x1xf32>
    %27 = vector.broadcast %26 : vector<32x1xf32> to vector<32x32xf32>
    %28 = arith.subf %20, %27 : vector<32x32xf32>
    %29 = arith.mulf %28, %28 : vector<32x32xf32>
    %cst_16 = arith.constant dense<0.000000e+00> : vector<32xf32>
    %30 = vector.multi_reduction <add>, %29, %cst_16 [1] : vector<32x32xf32> to vector<32xf32>
    %31 = vector.shape_cast %30 : vector<32xf32> to vector<32x1xf32>
    %cst_17 = arith.constant 3.200000e+01 : f32
    %32 = vector.broadcast %cst_17 : f32 to vector<32x1xf32>
    %33 = arith.divf %31, %32 : vector<32x1xf32>
    %cst_18 = arith.constant 9.99999996E-13 : f32
    %34 = vector.broadcast %cst_18 : f32 to vector<32x1xf32>
    %35 = arith.addf %33, %34 : vector<32x1xf32>
    %36 = math.rsqrt %35 : vector<32x1xf32>
    %37 = vector.broadcast %36 : vector<32x1xf32> to vector<32x32xf32>
    %38 = arith.mulf %28, %37 : vector<32x32xf32>
    %39 = vector.broadcast %21 : vector<1x32xf32> to vector<32x32xf32>
    %40 = arith.mulf %38, %39 : vector<32x32xf32>
    %41 = vector.broadcast %22 : vector<1x32xf32> to vector<32x32xf32>
    %42 = arith.addf %40, %41 : vector<32x32xf32>
    %c0_19 = arith.constant 0 : index
    %c0_20 = arith.constant 0 : index
    %43 = vector.load %arg2[%c0_19, %c0_20] : memref<4x8xi32, #tpu.memory_space<vmem>>, vector<4x8xi32>
    %44 = arith.sitofp %43 : vector<4x8xi32> to vector<4x8xf32>
    %cst_21 = arith.constant 1.000000e+00 : f32
    %45 = vector.broadcast %cst_21 : f32 to vector<4x8xf32>
    %46 = arith.subf %45, %44 : vector<4x8xf32>
    %cst_22 = arith.constant -1.000000e+04 : f32
    %47 = vector.broadcast %cst_22 : f32 to vector<4x8xf32>
    %48 = arith.mulf %46, %47 : vector<4x8xf32>
    %c0_23 = arith.constant 0 : index
    %c0_24 = arith.constant 0 : index
    %c0_25 = arith.constant 0 : index
    %49 = vector.load %arg9[%c0_23, %c0_24, %c0_25] : memref<2x32x96xf32, #tpu.memory_space<vmem>>, vector<1x32x96xf32>
    %50 = vector.shape_cast %49 : vector<1x32x96xf32> to vector<32x96xf32>
    %cst_26 = arith.constant dense<0.000000e+00> : vector<32x96xf32>
    %51 = tpu.matmul %42, %50, %cst_26 {dimension_numbers = #tpu.dot_dimension_numbers<[1], [0], [0], [1], [0, 0, 1, 1], [], []>} : vector<32x32xf32>, vector<32x96xf32>, vector<32x96xf32> -> vector<32x96xf32>
    %c0_27 = arith.constant 0 : index
    %c0_28 = arith.constant 0 : index
    %c0_29 = arith.constant 0 : index
    %52 = vector.load %arg10[%c0_27, %c0_28, %c0_29] : memref<2x1x96xf32, #tpu.memory_space<vmem>>, vector<1x1x96xf32>
    %53 = vector.shape_cast %52 : vector<1x1x96xf32> to vector<1x96xf32>
    %54 = vector.broadcast %53 : vector<1x96xf32> to vector<32x96xf32>
    %55 = arith.addf %51, %54 : vector<32x96xf32>
    %56 = vector.extract_strided_slice %55 {offsets = [0, 0], sizes = [32, 32], strides = [1, 1]} : vector<32x96xf32> to vector<32x32xf32>
    %57 = vector.extract_strided_slice %55 {offsets = [0, 32], sizes = [32, 32], strides = [1, 1]} : vector<32x96xf32> to vector<32x32xf32>
    %58 = vector.extract_strided_slice %55 {offsets = [0, 64], sizes = [32, 32], strides = [1, 1]} : vector<32x96xf32> to vector<32x32xf32>
    %59 = vector.extract_strided_slice %48 {offsets = [0, 0], sizes = [1, 8], strides = [1, 1]} : vector<4x8xf32> to vector<1x8xf32>
    %60 = vector.extract_strided_slice %56 {offsets = [0, 0], sizes = [8, 16], strides = [1, 1]} : vector<32x32xf32> to vector<8x16xf32>
    %61 = vector.extract_strided_slice %57 {offsets = [0, 0], sizes = [8, 16], strides = [1, 1]} : vector<32x32xf32> to vector<8x16xf32>
    %62 = vector.extract_strided_slice %58 {offsets = [0, 0], sizes = [8, 16], strides = [1, 1]} : vector<32x32xf32> to vector<8x16xf32>
    %cst_30 = arith.constant dense<0.000000e+00> : vector<8x8xf32>
    %63 = tpu.matmul %60, %61, %cst_30 {dimension_numbers = #tpu.dot_dimension_numbers<[1], [1], [0], [0], [0, 0, 1, 0], [], []>} : vector<8x16xf32>, vector<8x16xf32>, vector<8x8xf32> -> vector<8x8xf32>
    %cst_31 = arith.constant 2.500000e-01 : f32
    %64 = vector.broadcast %cst_31 : f32 to vector<8x8xf32>
    %65 = arith.mulf %63, %64 : vector<8x8xf32>
    %66 = vector.broadcast %59 : vector<1x8xf32> to vector<8x8xf32>
    %67 = arith.addf %65, %66 : vector<8x8xf32>
    %cst_32 = arith.constant dense<0xFF800000> : vector<8xf32>
    %68 = vector.multi_reduction <maximumf>, %67, %cst_32 [1] : vector<8x8xf32> to vector<8xf32>
    %69 = vector.shape_cast %68 : vector<8xf32> to vector<8x1xf32>
    %70 = vector.broadcast %69 : vector<8x1xf32> to vector<8x8xf32>
    %71 = arith.subf %67, %70 : vector<8x8xf32>
    %72 = math.exp %71 : vector<8x8xf32>
    %cst_33 = arith.constant dense<0.000000e+00> : vector<8xf32>
    %73 = vector.multi_reduction <add>, %72, %cst_33 [1] : vector<8x8xf32> to vector<8xf32>
    %74 = vector.shape_cast %73 : vector<8xf32> to vector<8x1xf32>
    %75 = tpu.reciprocal %74 {approx = true} : vector<8x1xf32> -> vector<8x1xf32>
    %76 = vector.broadcast %75 : vector<8x1xf32> to vector<8x8xf32>
    %77 = arith.mulf %72, %76 : vector<8x8xf32>
    %cst_34 = arith.constant dense<0.000000e+00> : vector<8x16xf32>
    %78 = tpu.matmul %77, %62, %cst_34 {dimension_numbers = #tpu.dot_dimension_numbers<[1], [0], [0], [1], [0, 0, 1, 1], [], []>} : vector<8x8xf32>, vector<8x16xf32>, vector<8x16xf32> -> vector<8x16xf32>
    %79 = vector.extract_strided_slice %56 {offsets = [0, 16], sizes = [8, 16], strides = [1, 1]} : vector<32x32xf32> to vector<8x16xf32>
    %80 = vector.extract_strided_slice %57 {offsets = [0, 16], sizes = [8, 16], strides = [1, 1]} : vector<32x32xf32> to vector<8x16xf32>
    %81 = vector.extract_strided_slice %58 {offsets = [0, 16], sizes = [8, 16], strides = [1, 1]} : vector<32x32xf32> to vector<8x16xf32>
    %cst_35 = arith.constant dense<0.000000e+00> : vector<8x8xf32>
    %82 = tpu.matmul %79, %80, %cst_35 {dimension_numbers = #tpu.dot_dimension_numbers<[1], [1], [0], [0], [0, 0, 1, 0], [], []>} : vector<8x16xf32>, vector<8x16xf32>, vector<8x8xf32> -> vector<8x8xf32>
    %cst_36 = arith.constant 2.500000e-01 : f32
    %83 = vector.broadcast %cst_36 : f32 to vector<8x8xf32>
    %84 = arith.mulf %82, %83 : vector<8x8xf32>
    %85 = vector.broadcast %59 : vector<1x8xf32> to vector<8x8xf32>
    %86 = arith.addf %84, %85 : vector<8x8xf32>
    %cst_37 = arith.constant dense<0xFF800000> : vector<8xf32>
    %87 = vector.multi_reduction <maximumf>, %86, %cst_37 [1] : vector<8x8xf32> to vector<8xf32>
    %88 = vector.shape_cast %87 : vector<8xf32> to vector<8x1xf32>
    %89 = vector.broadcast %88 : vector<8x1xf32> to vector<8x8xf32>
    %90 = arith.subf %86, %89 : vector<8x8xf32>
    %91 = math.exp %90 : vector<8x8xf32>
    %cst_38 = arith.constant dense<0.000000e+00> : vector<8xf32>
    %92 = vector.multi_reduction <add>, %91, %cst_38 [1] : vector<8x8xf32> to vector<8xf32>
    %93 = vector.shape_cast %92 : vector<8xf32> to vector<8x1xf32>
    %94 = tpu.reciprocal %93 {approx = true} : vector<8x1xf32> -> vector<8x1xf32>
    %95 = vector.broadcast %94 : vector<8x1xf32> to vector<8x8xf32>
    %96 = arith.mulf %91, %95 : vector<8x8xf32>
    %cst_39 = arith.constant dense<0.000000e+00> : vector<8x16xf32>
    %97 = tpu.matmul %96, %81, %cst_39 {dimension_numbers = #tpu.dot_dimension_numbers<[1], [0], [0], [1], [0, 0, 1, 1], [], []>} : vector<8x8xf32>, vector<8x16xf32>, vector<8x16xf32> -> vector<8x16xf32>
    %98 = tpu.concatenate %78, %97 in 1 : vector<8x16xf32>, vector<8x16xf32> -> vector<8x32xf32>
    %99 = vector.extract_strided_slice %48 {offsets = [1, 0], sizes = [1, 8], strides = [1, 1]} : vector<4x8xf32> to vector<1x8xf32>
    %100 = vector.extract_strided_slice %56 {offsets = [8, 0], sizes = [8, 16], strides = [1, 1]} : vector<32x32xf32> to vector<8x16xf32>
    %101 = vector.extract_strided_slice %57 {offsets = [8, 0], sizes = [8, 16], strides = [1, 1]} : vector<32x32xf32> to vector<8x16xf32>
    %102 = vector.extract_strided_slice %58 {offsets = [8, 0], sizes = [8, 16], strides = [1, 1]} : vector<32x32xf32> to vector<8x16xf32>
    %cst_40 = arith.constant dense<0.000000e+00> : vector<8x8xf32>
    %103 = tpu.matmul %100, %101, %cst_40 {dimension_numbers = #tpu.dot_dimension_numbers<[1], [1], [0], [0], [0, 0, 1, 0], [], []>} : vector<8x16xf32>, vector<8x16xf32>, vector<8x8xf32> -> vector<8x8xf32>
    %cst_41 = arith.constant 2.500000e-01 : f32
    %104 = vector.broadcast %cst_41 : f32 to vector<8x8xf32>
    %105 = arith.mulf %103, %104 : vector<8x8xf32>
    %106 = vector.broadcast %99 : vector<1x8xf32> to vector<8x8xf32>
    %107 = arith.addf %105, %106 : vector<8x8xf32>
    %cst_42 = arith.constant dense<0xFF800000> : vector<8xf32>
    %108 = vector.multi_reduction <maximumf>, %107, %cst_42 [1] : vector<8x8xf32> to vector<8xf32>
    %109 = vector.shape_cast %108 : vector<8xf32> to vector<8x1xf32>
    %110 = vector.broadcast %109 : vector<8x1xf32> to vector<8x8xf32>
    %111 = arith.subf %107, %110 : vector<8x8xf32>
    %112 = math.exp %111 : vector<8x8xf32>
    %cst_43 = arith.constant dense<0.000000e+00> : vector<8xf32>
    %113 = vector.multi_reduction <add>, %112, %cst_43 [1] : vector<8x8xf32> to vector<8xf32>
    %114 = vector.shape_cast %113 : vector<8xf32> to vector<8x1xf32>
    %115 = tpu.reciprocal %114 {approx = true} : vector<8x1xf32> -> vector<8x1xf32>
    %116 = vector.broadcast %115 : vector<8x1xf32> to vector<8x8xf32>
    %117 = arith.mulf %112, %116 : vector<8x8xf32>
    %cst_44 = arith.constant dense<0.000000e+00> : vector<8x16xf32>
    %118 = tpu.matmul %117, %102, %cst_44 {dimension_numbers = #tpu.dot_dimension_numbers<[1], [0], [0], [1], [0, 0, 1, 1], [], []>} : vector<8x8xf32>, vector<8x16xf32>, vector<8x16xf32> -> vector<8x16xf32>
    %119 = vector.extract_strided_slice %56 {offsets = [8, 16], sizes = [8, 16], strides = [1, 1]} : vector<32x32xf32> to vector<8x16xf32>
    %120 = vector.extract_strided_slice %57 {offsets = [8, 16], sizes = [8, 16], strides = [1, 1]} : vector<32x32xf32> to vector<8x16xf32>
    %121 = vector.extract_strided_slice %58 {offsets = [8, 16], sizes = [8, 16], strides = [1, 1]} : vector<32x32xf32> to vector<8x16xf32>
    %cst_45 = arith.constant dense<0.000000e+00> : vector<8x8xf32>
    %122 = tpu.matmul %119, %120, %cst_45 {dimension_numbers = #tpu.dot_dimension_numbers<[1], [1], [0], [0], [0, 0, 1, 0], [], []>} : vector<8x16xf32>, vector<8x16xf32>, vector<8x8xf32> -> vector<8x8xf32>
    %cst_46 = arith.constant 2.500000e-01 : f32
    %123 = vector.broadcast %cst_46 : f32 to vector<8x8xf32>
    %124 = arith.mulf %122, %123 : vector<8x8xf32>
    %125 = vector.broadcast %99 : vector<1x8xf32> to vector<8x8xf32>
    %126 = arith.addf %124, %125 : vector<8x8xf32>
    %cst_47 = arith.constant dense<0xFF800000> : vector<8xf32>
    %127 = vector.multi_reduction <maximumf>, %126, %cst_47 [1] : vector<8x8xf32> to vector<8xf32>
    %128 = vector.shape_cast %127 : vector<8xf32> to vector<8x1xf32>
    %129 = vector.broadcast %128 : vector<8x1xf32> to vector<8x8xf32>
    %130 = arith.subf %126, %129 : vector<8x8xf32>
    %131 = math.exp %130 : vector<8x8xf32>
    %cst_48 = arith.constant dense<0.000000e+00> : vector<8xf32>
    %132 = vector.multi_reduction <add>, %131, %cst_48 [1] : vector<8x8xf32> to vector<8xf32>
    %133 = vector.shape_cast %132 : vector<8xf32> to vector<8x1xf32>
    %134 = tpu.reciprocal %133 {approx = true} : vector<8x1xf32> -> vector<8x1xf32>
    %135 = vector.broadcast %134 : vector<8x1xf32> to vector<8x8xf32>
    %136 = arith.mulf %131, %135 : vector<8x8xf32>
    %cst_49 = arith.constant dense<0.000000e+00> : vector<8x16xf32>
    %137 = tpu.matmul %136, %121, %cst_49 {dimension_numbers = #tpu.dot_dimension_numbers<[1], [0], [0], [1], [0, 0, 1, 1], [], []>} : vector<8x8xf32>, vector<8x16xf32>, vector<8x16xf32> -> vector<8x16xf32>
    %138 = tpu.concatenate %118, %137 in 1 : vector<8x16xf32>, vector<8x16xf32> -> vector<8x32xf32>
    %139 = vector.extract_strided_slice %48 {offsets = [2, 0], sizes = [1, 8], strides = [1, 1]} : vector<4x8xf32> to vector<1x8xf32>
    %140 = vector.extract_strided_slice %56 {offsets = [16, 0], sizes = [8, 16], strides = [1, 1]} : vector<32x32xf32> to vector<8x16xf32>
    %141 = vector.extract_strided_slice %57 {offsets = [16, 0], sizes = [8, 16], strides = [1, 1]} : vector<32x32xf32> to vector<8x16xf32>
    %142 = vector.extract_strided_slice %58 {offsets = [16, 0], sizes = [8, 16], strides = [1, 1]} : vector<32x32xf32> to vector<8x16xf32>
    %cst_50 = arith.constant dense<0.000000e+00> : vector<8x8xf32>
    %143 = tpu.matmul %140, %141, %cst_50 {dimension_numbers = #tpu.dot_dimension_numbers<[1], [1], [0], [0], [0, 0, 1, 0], [], []>} : vector<8x16xf32>, vector<8x16xf32>, vector<8x8xf32> -> vector<8x8xf32>
    %cst_51 = arith.constant 2.500000e-01 : f32
    %144 = vector.broadcast %cst_51 : f32 to vector<8x8xf32>
    %145 = arith.mulf %143, %144 : vector<8x8xf32>
    %146 = vector.broadcast %139 : vector<1x8xf32> to vector<8x8xf32>
    %147 = arith.addf %145, %146 : vector<8x8xf32>
    %cst_52 = arith.constant dense<0xFF800000> : vector<8xf32>
    %148 = vector.multi_reduction <maximumf>, %147, %cst_52 [1] : vector<8x8xf32> to vector<8xf32>
    %149 = vector.shape_cast %148 : vector<8xf32> to vector<8x1xf32>
    %150 = vector.broadcast %149 : vector<8x1xf32> to vector<8x8xf32>
    %151 = arith.subf %147, %150 : vector<8x8xf32>
    %152 = math.exp %151 : vector<8x8xf32>
    %cst_53 = arith.constant dense<0.000000e+00> : vector<8xf32>
    %153 = vector.multi_reduction <add>, %152, %cst_53 [1] : vector<8x8xf32> to vector<8xf32>
    %154 = vector.shape_cast %153 : vector<8xf32> to vector<8x1xf32>
    %155 = tpu.reciprocal %154 {approx = true} : vector<8x1xf32> -> vector<8x1xf32>
    %156 = vector.broadcast %155 : vector<8x1xf32> to vector<8x8xf32>
    %157 = arith.mulf %152, %156 : vector<8x8xf32>
    %cst_54 = arith.constant dense<0.000000e+00> : vector<8x16xf32>
    %158 = tpu.matmul %157, %142, %cst_54 {dimension_numbers = #tpu.dot_dimension_numbers<[1], [0], [0], [1], [0, 0, 1, 1], [], []>} : vector<8x8xf32>, vector<8x16xf32>, vector<8x16xf32> -> vector<8x16xf32>
    %159 = vector.extract_strided_slice %56 {offsets = [16, 16], sizes = [8, 16], strides = [1, 1]} : vector<32x32xf32> to vector<8x16xf32>
    %160 = vector.extract_strided_slice %57 {offsets = [16, 16], sizes = [8, 16], strides = [1, 1]} : vector<32x32xf32> to vector<8x16xf32>
    %161 = vector.extract_strided_slice %58 {offsets = [16, 16], sizes = [8, 16], strides = [1, 1]} : vector<32x32xf32> to vector<8x16xf32>
    %cst_55 = arith.constant dense<0.000000e+00> : vector<8x8xf32>
    %162 = tpu.matmul %159, %160, %cst_55 {dimension_numbers = #tpu.dot_dimension_numbers<[1], [1], [0], [0], [0, 0, 1, 0], [], []>} : vector<8x16xf32>, vector<8x16xf32>, vector<8x8xf32> -> vector<8x8xf32>
    %cst_56 = arith.constant 2.500000e-01 : f32
    %163 = vector.broadcast %cst_56 : f32 to vector<8x8xf32>
    %164 = arith.mulf %162, %163 : vector<8x8xf32>
    %165 = vector.broadcast %139 : vector<1x8xf32> to vector<8x8xf32>
    %166 = arith.addf %164, %165 : vector<8x8xf32>
    %cst_57 = arith.constant dense<0xFF800000> : vector<8xf32>
    %167 = vector.multi_reduction <maximumf>, %166, %cst_57 [1] : vector<8x8xf32> to vector<8xf32>
    %168 = vector.shape_cast %167 : vector<8xf32> to vector<8x1xf32>
    %169 = vector.broadcast %168 : vector<8x1xf32> to vector<8x8xf32>
    %170 = arith.subf %166, %169 : vector<8x8xf32>
    %171 = math.exp %170 : vector<8x8xf32>
    %cst_58 = arith.constant dense<0.000000e+00> : vector<8xf32>
    %172 = vector.multi_reduction <add>, %171, %cst_58 [1] : vector<8x8xf32> to vector<8xf32>
    %173 = vector.shape_cast %172 : vector<8xf32> to vector<8x1xf32>
    %174 = tpu.reciprocal %173 {approx = true} : vector<8x1xf32> -> vector<8x1xf32>
    %175 = vector.broadcast %174 : vector<8x1xf32> to vector<8x8xf32>
    %176 = arith.mulf %171, %175 : vector<8x8xf32>
    %cst_59 = arith.constant dense<0.000000e+00> : vector<8x16xf32>
    %177 = tpu.matmul %176, %161, %cst_59 {dimension_numbers = #tpu.dot_dimension_numbers<[1], [0], [0], [1], [0, 0, 1, 1], [], []>} : vector<8x8xf32>, vector<8x16xf32>, vector<8x16xf32> -> vector<8x16xf32>
    %178 = tpu.concatenate %158, %177 in 1 : vector<8x16xf32>, vector<8x16xf32> -> vector<8x32xf32>
    %179 = vector.extract_strided_slice %48 {offsets = [3, 0], sizes = [1, 8], strides = [1, 1]} : vector<4x8xf32> to vector<1x8xf32>
    %180 = vector.extract_strided_slice %56 {offsets = [24, 0], sizes = [8, 16], strides = [1, 1]} : vector<32x32xf32> to vector<8x16xf32>
    %181 = vector.extract_strided_slice %57 {offsets = [24, 0], sizes = [8, 16], strides = [1, 1]} : vector<32x32xf32> to vector<8x16xf32>
    %182 = vector.extract_strided_slice %58 {offsets = [24, 0], sizes = [8, 16], strides = [1, 1]} : vector<32x32xf32> to vector<8x16xf32>
    %cst_60 = arith.constant dense<0.000000e+00> : vector<8x8xf32>
    %183 = tpu.matmul %180, %181, %cst_60 {dimension_numbers = #tpu.dot_dimension_numbers<[1], [1], [0], [0], [0, 0, 1, 0], [], []>} : vector<8x16xf32>, vector<8x16xf32>, vector<8x8xf32> -> vector<8x8xf32>
    %cst_61 = arith.constant 2.500000e-01 : f32
    %184 = vector.broadcast %cst_61 : f32 to vector<8x8xf32>
    %185 = arith.mulf %183, %184 : vector<8x8xf32>
    %186 = vector.broadcast %179 : vector<1x8xf32> to vector<8x8xf32>
    %187 = arith.addf %185, %186 : vector<8x8xf32>
    %cst_62 = arith.constant dense<0xFF800000> : vector<8xf32>
    %188 = vector.multi_reduction <maximumf>, %187, %cst_62 [1] : vector<8x8xf32> to vector<8xf32>
    %189 = vector.shape_cast %188 : vector<8xf32> to vector<8x1xf32>
    %190 = vector.broadcast %189 : vector<8x1xf32> to vector<8x8xf32>
    %191 = arith.subf %187, %190 : vector<8x8xf32>
    %192 = math.exp %191 : vector<8x8xf32>
    %cst_63 = arith.constant dense<0.000000e+00> : vector<8xf32>
    %193 = vector.multi_reduction <add>, %192, %cst_63 [1] : vector<8x8xf32> to vector<8xf32>
    %194 = vector.shape_cast %193 : vector<8xf32> to vector<8x1xf32>
    %195 = tpu.reciprocal %194 {approx = true} : vector<8x1xf32> -> vector<8x1xf32>
    %196 = vector.broadcast %195 : vector<8x1xf32> to vector<8x8xf32>
    %197 = arith.mulf %192, %196 : vector<8x8xf32>
    %cst_64 = arith.constant dense<0.000000e+00> : vector<8x16xf32>
    %198 = tpu.matmul %197, %182, %cst_64 {dimension_numbers = #tpu.dot_dimension_numbers<[1], [0], [0], [1], [0, 0, 1, 1], [], []>} : vector<8x8xf32>, vector<8x16xf32>, vector<8x16xf32> -> vector<8x16xf32>
    %199 = vector.extract_strided_slice %56 {offsets = [24, 16], sizes = [8, 16], strides = [1, 1]} : vector<32x32xf32> to vector<8x16xf32>
    %200 = vector.extract_strided_slice %57 {offsets = [24, 16], sizes = [8, 16], strides = [1, 1]} : vector<32x32xf32> to vector<8x16xf32>
    %201 = vector.extract_strided_slice %58 {offsets = [24, 16], sizes = [8, 16], strides = [1, 1]} : vector<32x32xf32> to vector<8x16xf32>
    %cst_65 = arith.constant dense<0.000000e+00> : vector<8x8xf32>
    %202 = tpu.matmul %199, %200, %cst_65 {dimension_numbers = #tpu.dot_dimension_numbers<[1], [1], [0], [0], [0, 0, 1, 0], [], []>} : vector<8x16xf32>, vector<8x16xf32>, vector<8x8xf32> -> vector<8x8xf32>
    %cst_66 = arith.constant 2.500000e-01 : f32
    %203 = vector.broadcast %cst_66 : f32 to vector<8x8xf32>
    %204 = arith.mulf %202, %203 : vector<8x8xf32>
    %205 = vector.broadcast %179 : vector<1x8xf32> to vector<8x8xf32>
    %206 = arith.addf %204, %205 : vector<8x8xf32>
    %cst_67 = arith.constant dense<0xFF800000> : vector<8xf32>
    %207 = vector.multi_reduction <maximumf>, %206, %cst_67 [1] : vector<8x8xf32> to vector<8xf32>
    %208 = vector.shape_cast %207 : vector<8xf32> to vector<8x1xf32>
    %209 = vector.broadcast %208 : vector<8x1xf32> to vector<8x8xf32>
    %210 = arith.subf %206, %209 : vector<8x8xf32>
    %211 = math.exp %210 : vector<8x8xf32>
    %cst_68 = arith.constant dense<0.000000e+00> : vector<8xf32>
    %212 = vector.multi_reduction <add>, %211, %cst_68 [1] : vector<8x8xf32> to vector<8xf32>
    %213 = vector.shape_cast %212 : vector<8xf32> to vector<8x1xf32>
    %214 = tpu.reciprocal %213 {approx = true} : vector<8x1xf32> -> vector<8x1xf32>
    %215 = vector.broadcast %214 : vector<8x1xf32> to vector<8x8xf32>
    %216 = arith.mulf %211, %215 : vector<8x8xf32>
    %cst_69 = arith.constant dense<0.000000e+00> : vector<8x16xf32>
    %217 = tpu.matmul %216, %201, %cst_69 {dimension_numbers = #tpu.dot_dimension_numbers<[1], [0], [0], [1], [0, 0, 1, 1], [], []>} : vector<8x8xf32>, vector<8x16xf32>, vector<8x16xf32> -> vector<8x16xf32>
    %218 = tpu.concatenate %198, %217 in 1 : vector<8x16xf32>, vector<8x16xf32> -> vector<8x32xf32>
    %219 = tpu.concatenate %98, %138, %178, %218 in 0 : vector<8x32xf32>, vector<8x32xf32>, vector<8x32xf32>, vector<8x32xf32> -> vector<32x32xf32>
    %c0_70 = arith.constant 0 : index
    %c0_71 = arith.constant 0 : index
    %c0_72 = arith.constant 0 : index
    %220 = vector.load %arg11[%c0_70, %c0_71, %c0_72] : memref<2x32x32xf32, #tpu.memory_space<vmem>>, vector<1x32x32xf32>
    %221 = vector.shape_cast %220 : vector<1x32x32xf32> to vector<32x32xf32>
    %cst_73 = arith.constant dense<0.000000e+00> : vector<32x32xf32>
    %222 = tpu.matmul %219, %221, %cst_73 {dimension_numbers = #tpu.dot_dimension_numbers<[1], [0], [0], [1], [0, 0, 1, 1], [], []>} : vector<32x32xf32>, vector<32x32xf32>, vector<32x32xf32> -> vector<32x32xf32>
    %c0_74 = arith.constant 0 : index
    %c0_75 = arith.constant 0 : index
    %c0_76 = arith.constant 0 : index
    %223 = vector.load %arg12[%c0_74, %c0_75, %c0_76] : memref<2x1x32xf32, #tpu.memory_space<vmem>>, vector<1x1x32xf32>
    %224 = vector.shape_cast %223 : vector<1x1x32xf32> to vector<1x32xf32>
    %225 = vector.broadcast %224 : vector<1x32xf32> to vector<32x32xf32>
    %226 = arith.addf %222, %225 : vector<32x32xf32>
    %227 = arith.addf %226, %42 : vector<32x32xf32>
    %c0_77 = arith.constant 0 : index
    %c0_78 = arith.constant 0 : index
    %c0_79 = arith.constant 0 : index
    %228 = vector.load %arg13[%c0_77, %c0_78, %c0_79] : memref<2x1x32xf32, #tpu.memory_space<vmem>>, vector<1x1x32xf32>
    %229 = vector.shape_cast %228 : vector<1x1x32xf32> to vector<1x32xf32>
    %c0_80 = arith.constant 0 : index
    %c0_81 = arith.constant 0 : index
    %c0_82 = arith.constant 0 : index
    %230 = vector.load %arg14[%c0_80, %c0_81, %c0_82] : memref<2x1x32xf32, #tpu.memory_space<vmem>>, vector<1x1x32xf32>
    %231 = vector.shape_cast %230 : vector<1x1x32xf32> to vector<1x32xf32>
    %cst_83 = arith.constant dense<0.000000e+00> : vector<32xf32>
    %232 = vector.multi_reduction <add>, %227, %cst_83 [1] : vector<32x32xf32> to vector<32xf32>
    %233 = vector.shape_cast %232 : vector<32xf32> to vector<32x1xf32>
    %cst_84 = arith.constant 3.200000e+01 : f32
    %234 = vector.broadcast %cst_84 : f32 to vector<32x1xf32>
    %235 = arith.divf %233, %234 : vector<32x1xf32>
    %236 = vector.broadcast %235 : vector<32x1xf32> to vector<32x32xf32>
    %237 = arith.subf %227, %236 : vector<32x32xf32>
    %238 = arith.mulf %237, %237 : vector<32x32xf32>
    %cst_85 = arith.constant dense<0.000000e+00> : vector<32xf32>
    %239 = vector.multi_reduction <add>, %238, %cst_85 [1] : vector<32x32xf32> to vector<32xf32>
    %240 = vector.shape_cast %239 : vector<32xf32> to vector<32x1xf32>
    %cst_86 = arith.constant 3.200000e+01 : f32
    %241 = vector.broadcast %cst_86 : f32 to vector<32x1xf32>
    %242 = arith.divf %240, %241 : vector<32x1xf32>
    %cst_87 = arith.constant 9.99999996E-13 : f32
    %243 = vector.broadcast %cst_87 : f32 to vector<32x1xf32>
    %244 = arith.addf %242, %243 : vector<32x1xf32>
    %245 = math.rsqrt %244 : vector<32x1xf32>
    %246 = vector.broadcast %245 : vector<32x1xf32> to vector<32x32xf32>
    %247 = arith.mulf %237, %246 : vector<32x32xf32>
    %248 = vector.broadcast %229 : vector<1x32xf32> to vector<32x32xf32>
    %249 = arith.mulf %247, %248 : vector<32x32xf32>
    %250 = vector.broadcast %231 : vector<1x32xf32> to vector<32x32xf32>
    %251 = arith.addf %249, %250 : vector<32x32xf32>
    %c0_88 = arith.constant 0 : index
    %c0_89 = arith.constant 0 : index
    %c0_90 = arith.constant 0 : index
    %252 = vector.load %arg15[%c0_88, %c0_89, %c0_90] : memref<2x32x128xf32, #tpu.memory_space<vmem>>, vector<1x32x128xf32>
    %253 = vector.shape_cast %252 : vector<1x32x128xf32> to vector<32x128xf32>
    %cst_91 = arith.constant dense<0.000000e+00> : vector<32x128xf32>
    %254 = tpu.matmul %251, %253, %cst_91 {dimension_numbers = #tpu.dot_dimension_numbers<[1], [0], [0], [1], [0, 0, 1, 1], [], []>} : vector<32x32xf32>, vector<32x128xf32>, vector<32x128xf32> -> vector<32x128xf32>
    %c0_92 = arith.constant 0 : index
    %c0_93 = arith.constant 0 : index
    %c0_94 = arith.constant 0 : index
    %255 = vector.load %arg16[%c0_92, %c0_93, %c0_94] : memref<2x1x128xf32, #tpu.memory_space<vmem>>, vector<1x1x128xf32>
    %256 = vector.shape_cast %255 : vector<1x1x128xf32> to vector<1x128xf32>
    %257 = vector.broadcast %256 : vector<1x128xf32> to vector<32x128xf32>
    %258 = arith.addf %254, %257 : vector<32x128xf32>
    %cst_95 = arith.constant 5.000000e-01 : f32
    %259 = vector.broadcast %cst_95 : f32 to vector<32x128xf32>
    %260 = arith.mulf %259, %258 : vector<32x128xf32>
    %cst_96 = arith.constant 0.707106769 : f32
    %261 = vector.broadcast %cst_96 : f32 to vector<32x128xf32>
    %262 = arith.mulf %258, %261 : vector<32x128xf32>
    %263 = math.erf %262 : vector<32x128xf32>
    %cst_97 = arith.constant 1.000000e+00 : f32
    %264 = vector.broadcast %cst_97 : f32 to vector<32x128xf32>
    %265 = arith.addf %264, %263 : vector<32x128xf32>
    %266 = arith.mulf %260, %265 : vector<32x128xf32>
    %c0_98 = arith.constant 0 : index
    %c0_99 = arith.constant 0 : index
    %c0_100 = arith.constant 0 : index
    %267 = vector.load %arg17[%c0_98, %c0_99, %c0_100] : memref<2x128x32xf32, #tpu.memory_space<vmem>>, vector<1x128x32xf32>
    %268 = vector.shape_cast %267 : vector<1x128x32xf32> to vector<128x32xf32>
    %cst_101 = arith.constant dense<0.000000e+00> : vector<32x32xf32>
    %269 = tpu.matmul %266, %268, %cst_101 {dimension_numbers = #tpu.dot_dimension_numbers<[1], [0], [0], [1], [0, 0, 1, 1], [], []>} : vector<32x128xf32>, vector<128x32xf32>, vector<32x32xf32> -> vector<32x32xf32>
    %c0_102 = arith.constant 0 : index
    %c0_103 = arith.constant 0 : index
    %c0_104 = arith.constant 0 : index
    %270 = vector.load %arg18[%c0_102, %c0_103, %c0_104] : memref<2x1x32xf32, #tpu.memory_space<vmem>>, vector<1x1x32xf32>
    %271 = vector.shape_cast %270 : vector<1x1x32xf32> to vector<1x32xf32>
    %272 = vector.broadcast %271 : vector<1x32xf32> to vector<32x32xf32>
    %273 = arith.addf %269, %272 : vector<32x32xf32>
    %274 = arith.addf %273, %251 : vector<32x32xf32>
    %c0_105 = arith.constant 0 : index
    %c0_106 = arith.constant 0 : index
    %c0_107 = arith.constant 0 : index
    %275 = vector.load %arg19[%c0_105, %c0_106, %c0_107] : memref<2x1x32xf32, #tpu.memory_space<vmem>>, vector<1x1x32xf32>
    %276 = vector.shape_cast %275 : vector<1x1x32xf32> to vector<1x32xf32>
    %c0_108 = arith.constant 0 : index
    %c0_109 = arith.constant 0 : index
    %c0_110 = arith.constant 0 : index
    %277 = vector.load %arg20[%c0_108, %c0_109, %c0_110] : memref<2x1x32xf32, #tpu.memory_space<vmem>>, vector<1x1x32xf32>
    %278 = vector.shape_cast %277 : vector<1x1x32xf32> to vector<1x32xf32>
    %cst_111 = arith.constant dense<0.000000e+00> : vector<32xf32>
    %279 = vector.multi_reduction <add>, %274, %cst_111 [1] : vector<32x32xf32> to vector<32xf32>
    %280 = vector.shape_cast %279 : vector<32xf32> to vector<32x1xf32>
    %cst_112 = arith.constant 3.200000e+01 : f32
    %281 = vector.broadcast %cst_112 : f32 to vector<32x1xf32>
    %282 = arith.divf %280, %281 : vector<32x1xf32>
    %283 = vector.broadcast %282 : vector<32x1xf32> to vector<32x32xf32>
    %284 = arith.subf %274, %283 : vector<32x32xf32>
    %285 = arith.mulf %284, %284 : vector<32x32xf32>
    %cst_113 = arith.constant dense<0.000000e+00> : vector<32xf32>
    %286 = vector.multi_reduction <add>, %285, %cst_113 [1] : vector<32x32xf32> to vector<32xf32>
    %287 = vector.shape_cast %286 : vector<32xf32> to vector<32x1xf32>
    %cst_114 = arith.constant 3.200000e+01 : f32
    %288 = vector.broadcast %cst_114 : f32 to vector<32x1xf32>
    %289 = arith.divf %287, %288 : vector<32x1xf32>
    %cst_115 = arith.constant 9.99999996E-13 : f32
    %290 = vector.broadcast %cst_115 : f32 to vector<32x1xf32>
    %291 = arith.addf %289, %290 : vector<32x1xf32>
    %292 = math.rsqrt %291 : vector<32x1xf32>
    %293 = vector.broadcast %292 : vector<32x1xf32> to vector<32x32xf32>
    %294 = arith.mulf %284, %293 : vector<32x32xf32>
    %295 = vector.broadcast %276 : vector<1x32xf32> to vector<32x32xf32>
    %296 = arith.mulf %294, %295 : vector<32x32xf32>
    %297 = vector.broadcast %278 : vector<1x32xf32> to vector<32x32xf32>
    %298 = arith.addf %296, %297 : vector<32x32xf32>
    %c1 = arith.constant 1 : index
    %c0_116 = arith.constant 0 : index
    %c0_117 = arith.constant 0 : index
    %299 = vector.load %arg9[%c1, %c0_116, %c0_117] : memref<2x32x96xf32, #tpu.memory_space<vmem>>, vector<1x32x96xf32>
    %300 = vector.shape_cast %299 : vector<1x32x96xf32> to vector<32x96xf32>
    %cst_118 = arith.constant dense<0.000000e+00> : vector<32x96xf32>
    %301 = tpu.matmul %298, %300, %cst_118 {dimension_numbers = #tpu.dot_dimension_numbers<[1], [0], [0], [1], [0, 0, 1, 1], [], []>} : vector<32x32xf32>, vector<32x96xf32>, vector<32x96xf32> -> vector<32x96xf32>
    %c1_119 = arith.constant 1 : index
    %c0_120 = arith.constant 0 : index
    %c0_121 = arith.constant 0 : index
    %302 = vector.load %arg10[%c1_119, %c0_120, %c0_121] : memref<2x1x96xf32, #tpu.memory_space<vmem>>, vector<1x1x96xf32>
    %303 = vector.shape_cast %302 : vector<1x1x96xf32> to vector<1x96xf32>
    %304 = vector.broadcast %303 : vector<1x96xf32> to vector<32x96xf32>
    %305 = arith.addf %301, %304 : vector<32x96xf32>
    %306 = vector.extract_strided_slice %305 {offsets = [0, 0], sizes = [32, 32], strides = [1, 1]} : vector<32x96xf32> to vector<32x32xf32>
    %307 = vector.extract_strided_slice %305 {offsets = [0, 32], sizes = [32, 32], strides = [1, 1]} : vector<32x96xf32> to vector<32x32xf32>
    %308 = vector.extract_strided_slice %305 {offsets = [0, 64], sizes = [32, 32], strides = [1, 1]} : vector<32x96xf32> to vector<32x32xf32>
    %309 = vector.extract_strided_slice %48 {offsets = [0, 0], sizes = [1, 8], strides = [1, 1]} : vector<4x8xf32> to vector<1x8xf32>
    %310 = vector.extract_strided_slice %306 {offsets = [0, 0], sizes = [8, 16], strides = [1, 1]} : vector<32x32xf32> to vector<8x16xf32>
    %311 = vector.extract_strided_slice %307 {offsets = [0, 0], sizes = [8, 16], strides = [1, 1]} : vector<32x32xf32> to vector<8x16xf32>
    %312 = vector.extract_strided_slice %308 {offsets = [0, 0], sizes = [8, 16], strides = [1, 1]} : vector<32x32xf32> to vector<8x16xf32>
    %cst_122 = arith.constant dense<0.000000e+00> : vector<8x8xf32>
    %313 = tpu.matmul %310, %311, %cst_122 {dimension_numbers = #tpu.dot_dimension_numbers<[1], [1], [0], [0], [0, 0, 1, 0], [], []>} : vector<8x16xf32>, vector<8x16xf32>, vector<8x8xf32> -> vector<8x8xf32>
    %cst_123 = arith.constant 2.500000e-01 : f32
    %314 = vector.broadcast %cst_123 : f32 to vector<8x8xf32>
    %315 = arith.mulf %313, %314 : vector<8x8xf32>
    %316 = vector.broadcast %309 : vector<1x8xf32> to vector<8x8xf32>
    %317 = arith.addf %315, %316 : vector<8x8xf32>
    %cst_124 = arith.constant dense<0xFF800000> : vector<8xf32>
    %318 = vector.multi_reduction <maximumf>, %317, %cst_124 [1] : vector<8x8xf32> to vector<8xf32>
    %319 = vector.shape_cast %318 : vector<8xf32> to vector<8x1xf32>
    %320 = vector.broadcast %319 : vector<8x1xf32> to vector<8x8xf32>
    %321 = arith.subf %317, %320 : vector<8x8xf32>
    %322 = math.exp %321 : vector<8x8xf32>
    %cst_125 = arith.constant dense<0.000000e+00> : vector<8xf32>
    %323 = vector.multi_reduction <add>, %322, %cst_125 [1] : vector<8x8xf32> to vector<8xf32>
    %324 = vector.shape_cast %323 : vector<8xf32> to vector<8x1xf32>
    %325 = tpu.reciprocal %324 {approx = true} : vector<8x1xf32> -> vector<8x1xf32>
    %326 = vector.broadcast %325 : vector<8x1xf32> to vector<8x8xf32>
    %327 = arith.mulf %322, %326 : vector<8x8xf32>
    %cst_126 = arith.constant dense<0.000000e+00> : vector<8x16xf32>
    %328 = tpu.matmul %327, %312, %cst_126 {dimension_numbers = #tpu.dot_dimension_numbers<[1], [0], [0], [1], [0, 0, 1, 1], [], []>} : vector<8x8xf32>, vector<8x16xf32>, vector<8x16xf32> -> vector<8x16xf32>
    %329 = vector.extract_strided_slice %306 {offsets = [0, 16], sizes = [8, 16], strides = [1, 1]} : vector<32x32xf32> to vector<8x16xf32>
    %330 = vector.extract_strided_slice %307 {offsets = [0, 16], sizes = [8, 16], strides = [1, 1]} : vector<32x32xf32> to vector<8x16xf32>
    %331 = vector.extract_strided_slice %308 {offsets = [0, 16], sizes = [8, 16], strides = [1, 1]} : vector<32x32xf32> to vector<8x16xf32>
    %cst_127 = arith.constant dense<0.000000e+00> : vector<8x8xf32>
    %332 = tpu.matmul %329, %330, %cst_127 {dimension_numbers = #tpu.dot_dimension_numbers<[1], [1], [0], [0], [0, 0, 1, 0], [], []>} : vector<8x16xf32>, vector<8x16xf32>, vector<8x8xf32> -> vector<8x8xf32>
    %cst_128 = arith.constant 2.500000e-01 : f32
    %333 = vector.broadcast %cst_128 : f32 to vector<8x8xf32>
    %334 = arith.mulf %332, %333 : vector<8x8xf32>
    %335 = vector.broadcast %309 : vector<1x8xf32> to vector<8x8xf32>
    %336 = arith.addf %334, %335 : vector<8x8xf32>
    %cst_129 = arith.constant dense<0xFF800000> : vector<8xf32>
    %337 = vector.multi_reduction <maximumf>, %336, %cst_129 [1] : vector<8x8xf32> to vector<8xf32>
    %338 = vector.shape_cast %337 : vector<8xf32> to vector<8x1xf32>
    %339 = vector.broadcast %338 : vector<8x1xf32> to vector<8x8xf32>
    %340 = arith.subf %336, %339 : vector<8x8xf32>
    %341 = math.exp %340 : vector<8x8xf32>
    %cst_130 = arith.constant dense<0.000000e+00> : vector<8xf32>
    %342 = vector.multi_reduction <add>, %341, %cst_130 [1] : vector<8x8xf32> to vector<8xf32>
    %343 = vector.shape_cast %342 : vector<8xf32> to vector<8x1xf32>
    %344 = tpu.reciprocal %343 {approx = true} : vector<8x1xf32> -> vector<8x1xf32>
    %345 = vector.broadcast %344 : vector<8x1xf32> to vector<8x8xf32>
    %346 = arith.mulf %341, %345 : vector<8x8xf32>
    %cst_131 = arith.constant dense<0.000000e+00> : vector<8x16xf32>
    %347 = tpu.matmul %346, %331, %cst_131 {dimension_numbers = #tpu.dot_dimension_numbers<[1], [0], [0], [1], [0, 0, 1, 1], [], []>} : vector<8x8xf32>, vector<8x16xf32>, vector<8x16xf32> -> vector<8x16xf32>
    %348 = tpu.concatenate %328, %347 in 1 : vector<8x16xf32>, vector<8x16xf32> -> vector<8x32xf32>
    %349 = vector.extract_strided_slice %48 {offsets = [1, 0], sizes = [1, 8], strides = [1, 1]} : vector<4x8xf32> to vector<1x8xf32>
    %350 = vector.extract_strided_slice %306 {offsets = [8, 0], sizes = [8, 16], strides = [1, 1]} : vector<32x32xf32> to vector<8x16xf32>
    %351 = vector.extract_strided_slice %307 {offsets = [8, 0], sizes = [8, 16], strides = [1, 1]} : vector<32x32xf32> to vector<8x16xf32>
    %352 = vector.extract_strided_slice %308 {offsets = [8, 0], sizes = [8, 16], strides = [1, 1]} : vector<32x32xf32> to vector<8x16xf32>
    %cst_132 = arith.constant dense<0.000000e+00> : vector<8x8xf32>
    %353 = tpu.matmul %350, %351, %cst_132 {dimension_numbers = #tpu.dot_dimension_numbers<[1], [1], [0], [0], [0, 0, 1, 0], [], []>} : vector<8x16xf32>, vector<8x16xf32>, vector<8x8xf32> -> vector<8x8xf32>
    %cst_133 = arith.constant 2.500000e-01 : f32
    %354 = vector.broadcast %cst_133 : f32 to vector<8x8xf32>
    %355 = arith.mulf %353, %354 : vector<8x8xf32>
    %356 = vector.broadcast %349 : vector<1x8xf32> to vector<8x8xf32>
    %357 = arith.addf %355, %356 : vector<8x8xf32>
    %cst_134 = arith.constant dense<0xFF800000> : vector<8xf32>
    %358 = vector.multi_reduction <maximumf>, %357, %cst_134 [1] : vector<8x8xf32> to vector<8xf32>
    %359 = vector.shape_cast %358 : vector<8xf32> to vector<8x1xf32>
    %360 = vector.broadcast %359 : vector<8x1xf32> to vector<8x8xf32>
    %361 = arith.subf %357, %360 : vector<8x8xf32>
    %362 = math.exp %361 : vector<8x8xf32>
    %cst_135 = arith.constant dense<0.000000e+00> : vector<8xf32>
    %363 = vector.multi_reduction <add>, %362, %cst_135 [1] : vector<8x8xf32> to vector<8xf32>
    %364 = vector.shape_cast %363 : vector<8xf32> to vector<8x1xf32>
    %365 = tpu.reciprocal %364 {approx = true} : vector<8x1xf32> -> vector<8x1xf32>
    %366 = vector.broadcast %365 : vector<8x1xf32> to vector<8x8xf32>
    %367 = arith.mulf %362, %366 : vector<8x8xf32>
    %cst_136 = arith.constant dense<0.000000e+00> : vector<8x16xf32>
    %368 = tpu.matmul %367, %352, %cst_136 {dimension_numbers = #tpu.dot_dimension_numbers<[1], [0], [0], [1], [0, 0, 1, 1], [], []>} : vector<8x8xf32>, vector<8x16xf32>, vector<8x16xf32> -> vector<8x16xf32>
    %369 = vector.extract_strided_slice %306 {offsets = [8, 16], sizes = [8, 16], strides = [1, 1]} : vector<32x32xf32> to vector<8x16xf32>
    %370 = vector.extract_strided_slice %307 {offsets = [8, 16], sizes = [8, 16], strides = [1, 1]} : vector<32x32xf32> to vector<8x16xf32>
    %371 = vector.extract_strided_slice %308 {offsets = [8, 16], sizes = [8, 16], strides = [1, 1]} : vector<32x32xf32> to vector<8x16xf32>
    %cst_137 = arith.constant dense<0.000000e+00> : vector<8x8xf32>
    %372 = tpu.matmul %369, %370, %cst_137 {dimension_numbers = #tpu.dot_dimension_numbers<[1], [1], [0], [0], [0, 0, 1, 0], [], []>} : vector<8x16xf32>, vector<8x16xf32>, vector<8x8xf32> -> vector<8x8xf32>
    %cst_138 = arith.constant 2.500000e-01 : f32
    %373 = vector.broadcast %cst_138 : f32 to vector<8x8xf32>
    %374 = arith.mulf %372, %373 : vector<8x8xf32>
    %375 = vector.broadcast %349 : vector<1x8xf32> to vector<8x8xf32>
    %376 = arith.addf %374, %375 : vector<8x8xf32>
    %cst_139 = arith.constant dense<0xFF800000> : vector<8xf32>
    %377 = vector.multi_reduction <maximumf>, %376, %cst_139 [1] : vector<8x8xf32> to vector<8xf32>
    %378 = vector.shape_cast %377 : vector<8xf32> to vector<8x1xf32>
    %379 = vector.broadcast %378 : vector<8x1xf32> to vector<8x8xf32>
    %380 = arith.subf %376, %379 : vector<8x8xf32>
    %381 = math.exp %380 : vector<8x8xf32>
    %cst_140 = arith.constant dense<0.000000e+00> : vector<8xf32>
    %382 = vector.multi_reduction <add>, %381, %cst_140 [1] : vector<8x8xf32> to vector<8xf32>
    %383 = vector.shape_cast %382 : vector<8xf32> to vector<8x1xf32>
    %384 = tpu.reciprocal %383 {approx = true} : vector<8x1xf32> -> vector<8x1xf32>
    %385 = vector.broadcast %384 : vector<8x1xf32> to vector<8x8xf32>
    %386 = arith.mulf %381, %385 : vector<8x8xf32>
    %cst_141 = arith.constant dense<0.000000e+00> : vector<8x16xf32>
    %387 = tpu.matmul %386, %371, %cst_141 {dimension_numbers = #tpu.dot_dimension_numbers<[1], [0], [0], [1], [0, 0, 1, 1], [], []>} : vector<8x8xf32>, vector<8x16xf32>, vector<8x16xf32> -> vector<8x16xf32>
    %388 = tpu.concatenate %368, %387 in 1 : vector<8x16xf32>, vector<8x16xf32> -> vector<8x32xf32>
    %389 = vector.extract_strided_slice %48 {offsets = [2, 0], sizes = [1, 8], strides = [1, 1]} : vector<4x8xf32> to vector<1x8xf32>
    %390 = vector.extract_strided_slice %306 {offsets = [16, 0], sizes = [8, 16], strides = [1, 1]} : vector<32x32xf32> to vector<8x16xf32>
    %391 = vector.extract_strided_slice %307 {offsets = [16, 0], sizes = [8, 16], strides = [1, 1]} : vector<32x32xf32> to vector<8x16xf32>
    %392 = vector.extract_strided_slice %308 {offsets = [16, 0], sizes = [8, 16], strides = [1, 1]} : vector<32x32xf32> to vector<8x16xf32>
    %cst_142 = arith.constant dense<0.000000e+00> : vector<8x8xf32>
    %393 = tpu.matmul %390, %391, %cst_142 {dimension_numbers = #tpu.dot_dimension_numbers<[1], [1], [0], [0], [0, 0, 1, 0], [], []>} : vector<8x16xf32>, vector<8x16xf32>, vector<8x8xf32> -> vector<8x8xf32>
    %cst_143 = arith.constant 2.500000e-01 : f32
    %394 = vector.broadcast %cst_143 : f32 to vector<8x8xf32>
    %395 = arith.mulf %393, %394 : vector<8x8xf32>
    %396 = vector.broadcast %389 : vector<1x8xf32> to vector<8x8xf32>
    %397 = arith.addf %395, %396 : vector<8x8xf32>
    %cst_144 = arith.constant dense<0xFF800000> : vector<8xf32>
    %398 = vector.multi_reduction <maximumf>, %397, %cst_144 [1] : vector<8x8xf32> to vector<8xf32>
    %399 = vector.shape_cast %398 : vector<8xf32> to vector<8x1xf32>
    %400 = vector.broadcast %399 : vector<8x1xf32> to vector<8x8xf32>
    %401 = arith.subf %397, %400 : vector<8x8xf32>
    %402 = math.exp %401 : vector<8x8xf32>
    %cst_145 = arith.constant dense<0.000000e+00> : vector<8xf32>
    %403 = vector.multi_reduction <add>, %402, %cst_145 [1] : vector<8x8xf32> to vector<8xf32>
    %404 = vector.shape_cast %403 : vector<8xf32> to vector<8x1xf32>
    %405 = tpu.reciprocal %404 {approx = true} : vector<8x1xf32> -> vector<8x1xf32>
    %406 = vector.broadcast %405 : vector<8x1xf32> to vector<8x8xf32>
    %407 = arith.mulf %402, %406 : vector<8x8xf32>
    %cst_146 = arith.constant dense<0.000000e+00> : vector<8x16xf32>
    %408 = tpu.matmul %407, %392, %cst_146 {dimension_numbers = #tpu.dot_dimension_numbers<[1], [0], [0], [1], [0, 0, 1, 1], [], []>} : vector<8x8xf32>, vector<8x16xf32>, vector<8x16xf32> -> vector<8x16xf32>
    %409 = vector.extract_strided_slice %306 {offsets = [16, 16], sizes = [8, 16], strides = [1, 1]} : vector<32x32xf32> to vector<8x16xf32>
    %410 = vector.extract_strided_slice %307 {offsets = [16, 16], sizes = [8, 16], strides = [1, 1]} : vector<32x32xf32> to vector<8x16xf32>
    %411 = vector.extract_strided_slice %308 {offsets = [16, 16], sizes = [8, 16], strides = [1, 1]} : vector<32x32xf32> to vector<8x16xf32>
    %cst_147 = arith.constant dense<0.000000e+00> : vector<8x8xf32>
    %412 = tpu.matmul %409, %410, %cst_147 {dimension_numbers = #tpu.dot_dimension_numbers<[1], [1], [0], [0], [0, 0, 1, 0], [], []>} : vector<8x16xf32>, vector<8x16xf32>, vector<8x8xf32> -> vector<8x8xf32>
    %cst_148 = arith.constant 2.500000e-01 : f32
    %413 = vector.broadcast %cst_148 : f32 to vector<8x8xf32>
    %414 = arith.mulf %412, %413 : vector<8x8xf32>
    %415 = vector.broadcast %389 : vector<1x8xf32> to vector<8x8xf32>
    %416 = arith.addf %414, %415 : vector<8x8xf32>
    %cst_149 = arith.constant dense<0xFF800000> : vector<8xf32>
    %417 = vector.multi_reduction <maximumf>, %416, %cst_149 [1] : vector<8x8xf32> to vector<8xf32>
    %418 = vector.shape_cast %417 : vector<8xf32> to vector<8x1xf32>
    %419 = vector.broadcast %418 : vector<8x1xf32> to vector<8x8xf32>
    %420 = arith.subf %416, %419 : vector<8x8xf32>
    %421 = math.exp %420 : vector<8x8xf32>
    %cst_150 = arith.constant dense<0.000000e+00> : vector<8xf32>
    %422 = vector.multi_reduction <add>, %421, %cst_150 [1] : vector<8x8xf32> to vector<8xf32>
    %423 = vector.shape_cast %422 : vector<8xf32> to vector<8x1xf32>
    %424 = tpu.reciprocal %423 {approx = true} : vector<8x1xf32> -> vector<8x1xf32>
    %425 = vector.broadcast %424 : vector<8x1xf32> to vector<8x8xf32>
    %426 = arith.mulf %421, %425 : vector<8x8xf32>
    %cst_151 = arith.constant dense<0.000000e+00> : vector<8x16xf32>
    %427 = tpu.matmul %426, %411, %cst_151 {dimension_numbers = #tpu.dot_dimension_numbers<[1], [0], [0], [1], [0, 0, 1, 1], [], []>} : vector<8x8xf32>, vector<8x16xf32>, vector<8x16xf32> -> vector<8x16xf32>
    %428 = tpu.concatenate %408, %427 in 1 : vector<8x16xf32>, vector<8x16xf32> -> vector<8x32xf32>
    %429 = vector.extract_strided_slice %48 {offsets = [3, 0], sizes = [1, 8], strides = [1, 1]} : vector<4x8xf32> to vector<1x8xf32>
    %430 = vector.extract_strided_slice %306 {offsets = [24, 0], sizes = [8, 16], strides = [1, 1]} : vector<32x32xf32> to vector<8x16xf32>
    %431 = vector.extract_strided_slice %307 {offsets = [24, 0], sizes = [8, 16], strides = [1, 1]} : vector<32x32xf32> to vector<8x16xf32>
    %432 = vector.extract_strided_slice %308 {offsets = [24, 0], sizes = [8, 16], strides = [1, 1]} : vector<32x32xf32> to vector<8x16xf32>
    %cst_152 = arith.constant dense<0.000000e+00> : vector<8x8xf32>
    %433 = tpu.matmul %430, %431, %cst_152 {dimension_numbers = #tpu.dot_dimension_numbers<[1], [1], [0], [0], [0, 0, 1, 0], [], []>} : vector<8x16xf32>, vector<8x16xf32>, vector<8x8xf32> -> vector<8x8xf32>
    %cst_153 = arith.constant 2.500000e-01 : f32
    %434 = vector.broadcast %cst_153 : f32 to vector<8x8xf32>
    %435 = arith.mulf %433, %434 : vector<8x8xf32>
    %436 = vector.broadcast %429 : vector<1x8xf32> to vector<8x8xf32>
    %437 = arith.addf %435, %436 : vector<8x8xf32>
    %cst_154 = arith.constant dense<0xFF800000> : vector<8xf32>
    %438 = vector.multi_reduction <maximumf>, %437, %cst_154 [1] : vector<8x8xf32> to vector<8xf32>
    %439 = vector.shape_cast %438 : vector<8xf32> to vector<8x1xf32>
    %440 = vector.broadcast %439 : vector<8x1xf32> to vector<8x8xf32>
    %441 = arith.subf %437, %440 : vector<8x8xf32>
    %442 = math.exp %441 : vector<8x8xf32>
    %cst_155 = arith.constant dense<0.000000e+00> : vector<8xf32>
    %443 = vector.multi_reduction <add>, %442, %cst_155 [1] : vector<8x8xf32> to vector<8xf32>
    %444 = vector.shape_cast %443 : vector<8xf32> to vector<8x1xf32>
    %445 = tpu.reciprocal %444 {approx = true} : vector<8x1xf32> -> vector<8x1xf32>
    %446 = vector.broadcast %445 : vector<8x1xf32> to vector<8x8xf32>
    %447 = arith.mulf %442, %446 : vector<8x8xf32>
    %cst_156 = arith.constant dense<0.000000e+00> : vector<8x16xf32>
    %448 = tpu.matmul %447, %432, %cst_156 {dimension_numbers = #tpu.dot_dimension_numbers<[1], [0], [0], [1], [0, 0, 1, 1], [], []>} : vector<8x8xf32>, vector<8x16xf32>, vector<8x16xf32> -> vector<8x16xf32>
    %449 = vector.extract_strided_slice %306 {offsets = [24, 16], sizes = [8, 16], strides = [1, 1]} : vector<32x32xf32> to vector<8x16xf32>
    %450 = vector.extract_strided_slice %307 {offsets = [24, 16], sizes = [8, 16], strides = [1, 1]} : vector<32x32xf32> to vector<8x16xf32>
    %451 = vector.extract_strided_slice %308 {offsets = [24, 16], sizes = [8, 16], strides = [1, 1]} : vector<32x32xf32> to vector<8x16xf32>
    %cst_157 = arith.constant dense<0.000000e+00> : vector<8x8xf32>
    %452 = tpu.matmul %449, %450, %cst_157 {dimension_numbers = #tpu.dot_dimension_numbers<[1], [1], [0], [0], [0, 0, 1, 0], [], []>} : vector<8x16xf32>, vector<8x16xf32>, vector<8x8xf32> -> vector<8x8xf32>
    %cst_158 = arith.constant 2.500000e-01 : f32
    %453 = vector.broadcast %cst_158 : f32 to vector<8x8xf32>
    %454 = arith.mulf %452, %453 : vector<8x8xf32>
    %455 = vector.broadcast %429 : vector<1x8xf32> to vector<8x8xf32>
    %456 = arith.addf %454, %455 : vector<8x8xf32>
    %cst_159 = arith.constant dense<0xFF800000> : vector<8xf32>
    %457 = vector.multi_reduction <maximumf>, %456, %cst_159 [1] : vector<8x8xf32> to vector<8xf32>
    %458 = vector.shape_cast %457 : vector<8xf32> to vector<8x1xf32>
    %459 = vector.broadcast %458 : vector<8x1xf32> to vector<8x8xf32>
    %460 = arith.subf %456, %459 : vector<8x8xf32>
    %461 = math.exp %460 : vector<8x8xf32>
    %cst_160 = arith.constant dense<0.000000e+00> : vector<8xf32>
    %462 = vector.multi_reduction <add>, %461, %cst_160 [1] : vector<8x8xf32> to vector<8xf32>
    %463 = vector.shape_cast %462 : vector<8xf32> to vector<8x1xf32>
    %464 = tpu.reciprocal %463 {approx = true} : vector<8x1xf32> -> vector<8x1xf32>
    %465 = vector.broadcast %464 : vector<8x1xf32> to vector<8x8xf32>
    %466 = arith.mulf %461, %465 : vector<8x8xf32>
    %cst_161 = arith.constant dense<0.000000e+00> : vector<8x16xf32>
    %467 = tpu.matmul %466, %451, %cst_161 {dimension_numbers = #tpu.dot_dimension_numbers<[1], [0], [0], [1], [0, 0, 1, 1], [], []>} : vector<8x8xf32>, vector<8x16xf32>, vector<8x16xf32> -> vector<8x16xf32>
    %468 = tpu.concatenate %448, %467 in 1 : vector<8x16xf32>, vector<8x16xf32> -> vector<8x32xf32>
    %469 = tpu.concatenate %348, %388, %428, %468 in 0 : vector<8x32xf32>, vector<8x32xf32>, vector<8x32xf32>, vector<8x32xf32> -> vector<32x32xf32>
    %c1_162 = arith.constant 1 : index
    %c0_163 = arith.constant 0 : index
    %c0_164 = arith.constant 0 : index
    %470 = vector.load %arg11[%c1_162, %c0_163, %c0_164] : memref<2x32x32xf32, #tpu.memory_space<vmem>>, vector<1x32x32xf32>
    %471 = vector.shape_cast %470 : vector<1x32x32xf32> to vector<32x32xf32>
    %cst_165 = arith.constant dense<0.000000e+00> : vector<32x32xf32>
    %472 = tpu.matmul %469, %471, %cst_165 {dimension_numbers = #tpu.dot_dimension_numbers<[1], [0], [0], [1], [0, 0, 1, 1], [], []>} : vector<32x32xf32>, vector<32x32xf32>, vector<32x32xf32> -> vector<32x32xf32>
    %c1_166 = arith.constant 1 : index
    %c0_167 = arith.constant 0 : index
    %c0_168 = arith.constant 0 : index
    %473 = vector.load %arg12[%c1_166, %c0_167, %c0_168] : memref<2x1x32xf32, #tpu.memory_space<vmem>>, vector<1x1x32xf32>
    %474 = vector.shape_cast %473 : vector<1x1x32xf32> to vector<1x32xf32>
    %475 = vector.broadcast %474 : vector<1x32xf32> to vector<32x32xf32>
    %476 = arith.addf %472, %475 : vector<32x32xf32>
    %477 = arith.addf %476, %298 : vector<32x32xf32>
    %c1_169 = arith.constant 1 : index
    %c0_170 = arith.constant 0 : index
    %c0_171 = arith.constant 0 : index
    %478 = vector.load %arg13[%c1_169, %c0_170, %c0_171] : memref<2x1x32xf32, #tpu.memory_space<vmem>>, vector<1x1x32xf32>
    %479 = vector.shape_cast %478 : vector<1x1x32xf32> to vector<1x32xf32>
    %c1_172 = arith.constant 1 : index
    %c0_173 = arith.constant 0 : index
    %c0_174 = arith.constant 0 : index
    %480 = vector.load %arg14[%c1_172, %c0_173, %c0_174] : memref<2x1x32xf32, #tpu.memory_space<vmem>>, vector<1x1x32xf32>
    %481 = vector.shape_cast %480 : vector<1x1x32xf32> to vector<1x32xf32>
    %cst_175 = arith.constant dense<0.000000e+00> : vector<32xf32>
    %482 = vector.multi_reduction <add>, %477, %cst_175 [1] : vector<32x32xf32> to vector<32xf32>
    %483 = vector.shape_cast %482 : vector<32xf32> to vector<32x1xf32>
    %cst_176 = arith.constant 3.200000e+01 : f32
    %484 = vector.broadcast %cst_176 : f32 to vector<32x1xf32>
    %485 = arith.divf %483, %484 : vector<32x1xf32>
    %486 = vector.broadcast %485 : vector<32x1xf32> to vector<32x32xf32>
    %487 = arith.subf %477, %486 : vector<32x32xf32>
    %488 = arith.mulf %487, %487 : vector<32x32xf32>
    %cst_177 = arith.constant dense<0.000000e+00> : vector<32xf32>
    %489 = vector.multi_reduction <add>, %488, %cst_177 [1] : vector<32x32xf32> to vector<32xf32>
    %490 = vector.shape_cast %489 : vector<32xf32> to vector<32x1xf32>
    %cst_178 = arith.constant 3.200000e+01 : f32
    %491 = vector.broadcast %cst_178 : f32 to vector<32x1xf32>
    %492 = arith.divf %490, %491 : vector<32x1xf32>
    %cst_179 = arith.constant 9.99999996E-13 : f32
    %493 = vector.broadcast %cst_179 : f32 to vector<32x1xf32>
    %494 = arith.addf %492, %493 : vector<32x1xf32>
    %495 = math.rsqrt %494 : vector<32x1xf32>
    %496 = vector.broadcast %495 : vector<32x1xf32> to vector<32x32xf32>
    %497 = arith.mulf %487, %496 : vector<32x32xf32>
    %498 = vector.broadcast %479 : vector<1x32xf32> to vector<32x32xf32>
    %499 = arith.mulf %497, %498 : vector<32x32xf32>
    %500 = vector.broadcast %481 : vector<1x32xf32> to vector<32x32xf32>
    %501 = arith.addf %499, %500 : vector<32x32xf32>
    %c1_180 = arith.constant 1 : index
    %c0_181 = arith.constant 0 : index
    %c0_182 = arith.constant 0 : index
    %502 = vector.load %arg15[%c1_180, %c0_181, %c0_182] : memref<2x32x128xf32, #tpu.memory_space<vmem>>, vector<1x32x128xf32>
    %503 = vector.shape_cast %502 : vector<1x32x128xf32> to vector<32x128xf32>
    %cst_183 = arith.constant dense<0.000000e+00> : vector<32x128xf32>
    %504 = tpu.matmul %501, %503, %cst_183 {dimension_numbers = #tpu.dot_dimension_numbers<[1], [0], [0], [1], [0, 0, 1, 1], [], []>} : vector<32x32xf32>, vector<32x128xf32>, vector<32x128xf32> -> vector<32x128xf32>
    %c1_184 = arith.constant 1 : index
    %c0_185 = arith.constant 0 : index
    %c0_186 = arith.constant 0 : index
    %505 = vector.load %arg16[%c1_184, %c0_185, %c0_186] : memref<2x1x128xf32, #tpu.memory_space<vmem>>, vector<1x1x128xf32>
    %506 = vector.shape_cast %505 : vector<1x1x128xf32> to vector<1x128xf32>
    %507 = vector.broadcast %506 : vector<1x128xf32> to vector<32x128xf32>
    %508 = arith.addf %504, %507 : vector<32x128xf32>
    %cst_187 = arith.constant 5.000000e-01 : f32
    %509 = vector.broadcast %cst_187 : f32 to vector<32x128xf32>
    %510 = arith.mulf %509, %508 : vector<32x128xf32>
    %cst_188 = arith.constant 0.707106769 : f32
    %511 = vector.broadcast %cst_188 : f32 to vector<32x128xf32>
    %512 = arith.mulf %508, %511 : vector<32x128xf32>
    %513 = math.erf %512 : vector<32x128xf32>
    %cst_189 = arith.constant 1.000000e+00 : f32
    %514 = vector.broadcast %cst_189 : f32 to vector<32x128xf32>
    %515 = arith.addf %514, %513 : vector<32x128xf32>
    %516 = arith.mulf %510, %515 : vector<32x128xf32>
    %c1_190 = arith.constant 1 : index
    %c0_191 = arith.constant 0 : index
    %c0_192 = arith.constant 0 : index
    %517 = vector.load %arg17[%c1_190, %c0_191, %c0_192] : memref<2x128x32xf32, #tpu.memory_space<vmem>>, vector<1x128x32xf32>
    %518 = vector.shape_cast %517 : vector<1x128x32xf32> to vector<128x32xf32>
    %cst_193 = arith.constant dense<0.000000e+00> : vector<32x32xf32>
    %519 = tpu.matmul %516, %518, %cst_193 {dimension_numbers = #tpu.dot_dimension_numbers<[1], [0], [0], [1], [0, 0, 1, 1], [], []>} : vector<32x128xf32>, vector<128x32xf32>, vector<32x32xf32> -> vector<32x32xf32>
    %c1_194 = arith.constant 1 : index
    %c0_195 = arith.constant 0 : index
    %c0_196 = arith.constant 0 : index
    %520 = vector.load %arg18[%c1_194, %c0_195, %c0_196] : memref<2x1x32xf32, #tpu.memory_space<vmem>>, vector<1x1x32xf32>
    %521 = vector.shape_cast %520 : vector<1x1x32xf32> to vector<1x32xf32>
    %522 = vector.broadcast %521 : vector<1x32xf32> to vector<32x32xf32>
    %523 = arith.addf %519, %522 : vector<32x32xf32>
    %524 = arith.addf %523, %501 : vector<32x32xf32>
    %c1_197 = arith.constant 1 : index
    %c0_198 = arith.constant 0 : index
    %c0_199 = arith.constant 0 : index
    %525 = vector.load %arg19[%c1_197, %c0_198, %c0_199] : memref<2x1x32xf32, #tpu.memory_space<vmem>>, vector<1x1x32xf32>
    %526 = vector.shape_cast %525 : vector<1x1x32xf32> to vector<1x32xf32>
    %c1_200 = arith.constant 1 : index
    %c0_201 = arith.constant 0 : index
    %c0_202 = arith.constant 0 : index
    %527 = vector.load %arg20[%c1_200, %c0_201, %c0_202] : memref<2x1x32xf32, #tpu.memory_space<vmem>>, vector<1x1x32xf32>
    %528 = vector.shape_cast %527 : vector<1x1x32xf32> to vector<1x32xf32>
    %cst_203 = arith.constant dense<0.000000e+00> : vector<32xf32>
    %529 = vector.multi_reduction <add>, %524, %cst_203 [1] : vector<32x32xf32> to vector<32xf32>
    %530 = vector.shape_cast %529 : vector<32xf32> to vector<32x1xf32>
    %cst_204 = arith.constant 3.200000e+01 : f32
    %531 = vector.broadcast %cst_204 : f32 to vector<32x1xf32>
    %532 = arith.divf %530, %531 : vector<32x1xf32>
    %533 = vector.broadcast %532 : vector<32x1xf32> to vector<32x32xf32>
    %534 = arith.subf %524, %533 : vector<32x32xf32>
    %535 = arith.mulf %534, %534 : vector<32x32xf32>
    %cst_205 = arith.constant dense<0.000000e+00> : vector<32xf32>
    %536 = vector.multi_reduction <add>, %535, %cst_205 [1] : vector<32x32xf32> to vector<32xf32>
    %537 = vector.shape_cast %536 : vector<32xf32> to vector<32x1xf32>
    %cst_206 = arith.constant 3.200000e+01 : f32
    %538 = vector.broadcast %cst_206 : f32 to vector<32x1xf32>
    %539 = arith.divf %537, %538 : vector<32x1xf32>
    %cst_207 = arith.constant 9.99999996E-13 : f32
    %540 = vector.broadcast %cst_207 : f32 to vector<32x1xf32>
    %541 = arith.addf %539, %540 : vector<32x1xf32>
    %542 = math.rsqrt %541 : vector<32x1xf32>
    %543 = vector.broadcast %542 : vector<32x1xf32> to vector<32x32xf32>
    %544 = arith.mulf %534, %543 : vector<32x32xf32>
    %545 = vector.broadcast %526 : vector<1x32xf32> to vector<32x32xf32>
    %546 = arith.mulf %544, %545 : vector<32x32xf32>
    %547 = vector.broadcast %528 : vector<1x32xf32> to vector<32x32xf32>
    %548 = arith.addf %546, %547 : vector<32x32xf32>
    %549 = vector.extract_strided_slice %548 {offsets = [0, 0], sizes = [1, 32], strides = [1, 1]} : vector<32x32xf32> to vector<1x32xf32>
    %550 = vector.extract_strided_slice %548 {offsets = [8, 0], sizes = [1, 32], strides = [1, 1]} : vector<32x32xf32> to vector<1x32xf32>
    %551 = vector.extract_strided_slice %548 {offsets = [16, 0], sizes = [1, 32], strides = [1, 1]} : vector<32x32xf32> to vector<1x32xf32>
    %552 = vector.extract_strided_slice %548 {offsets = [24, 0], sizes = [1, 32], strides = [1, 1]} : vector<32x32xf32> to vector<1x32xf32>
    %553 = tpu.concatenate %549, %550, %551, %552 in 0 : vector<1x32xf32>, vector<1x32xf32>, vector<1x32xf32>, vector<1x32xf32> -> vector<4x32xf32>
    %c0_208 = arith.constant 0 : index
    %c0_209 = arith.constant 0 : index
    %554 = vector.load %arg3[%c0_208, %c0_209] : memref<4x1xi32, #tpu.memory_space<vmem>>, vector<4x1xi32>
    %555 = tpu.iota {dimensions = array<i32: 1>} : vector<4x16xi32>
    %556 = vector.broadcast %554 : vector<4x1xi32> to vector<4x16xi32>
    %557 = arith.cmpi eq, %556, %555 : vector<4x16xi32>
    %558 = arith.extui %557 : vector<4x16xi1> to vector<4x16xi32>
    %559 = arith.sitofp %558 : vector<4x16xi32> to vector<4x16xf32>
    %c0_210 = arith.constant 0 : index
    %c0_211 = arith.constant 0 : index
    %560 = vector.load %arg21[%c0_210, %c0_211] : memref<16x32xf32, #tpu.memory_space<vmem>>, vector<16x32xf32>
    %cst_212 = arith.constant dense<0.000000e+00> : vector<4x32xf32>
    %561 = tpu.matmul %559, %560, %cst_212 {dimension_numbers = #tpu.dot_dimension_numbers<[1], [0], [0], [1], [0, 0, 1, 1], [], []>} : vector<4x16xf32>, vector<16x32xf32>, vector<4x32xf32> -> vector<4x32xf32>
    %562 = arith.addf %553, %561 : vector<4x32xf32>
    %c0_213 = arith.constant 0 : index
    %c0_214 = arith.constant 0 : index
    %563 = vector.load %arg22[%c0_213, %c0_214] : memref<32x128xf32, #tpu.memory_space<vmem>>, vector<32x128xf32>
    %cst_215 = arith.constant dense<0.000000e+00> : vector<4x128xf32>
    %564 = tpu.matmul %562, %563, %cst_215 {dimension_numbers = #tpu.dot_dimension_numbers<[1], [0], [0], [1], [0, 0, 1, 1], [], []>} : vector<4x32xf32>, vector<32x128xf32>, vector<4x128xf32> -> vector<4x128xf32>
    %c0_216 = arith.constant 0 : index
    %c0_217 = arith.constant 0 : index
    %565 = vector.load %arg24[%c0_216, %c0_217] : memref<1x128xf32, #tpu.memory_space<vmem>>, vector<1x128xf32>
    %566 = vector.broadcast %565 : vector<1x128xf32> to vector<4x128xf32>
    %567 = arith.addf %564, %566 : vector<4x128xf32>
    %c0_218 = arith.constant 0 : index
    %c0_219 = arith.constant 0 : index
    %568 = vector.load %arg23[%c0_218, %c0_219] : memref<32x128xf32, #tpu.memory_space<vmem>>, vector<32x128xf32>
    %cst_220 = arith.constant 0.000000e+00 : f32
    %569 = vector.broadcast %cst_220 : f32 to vector<1x32xf32>
    %cst_221 = arith.constant 0.000000e+00 : f32
    %570 = vector.broadcast %cst_221 : f32 to vector<1x32xf32>
    %571 = vector.extract_strided_slice %567 {offsets = [0, 0], sizes = [1, 128], strides = [1, 1]} : vector<4x128xf32> to vector<1x128xf32>
    %cst_222 = arith.constant dense<0.000000e+00> : vector<1x128xf32>
    %572 = tpu.matmul %569, %568, %cst_222 {dimension_numbers = #tpu.dot_dimension_numbers<[1], [0], [0], [1], [0, 0, 1, 1], [], []>} : vector<1x32xf32>, vector<32x128xf32>, vector<1x128xf32> -> vector<1x128xf32>
    %573 = arith.addf %571, %572 : vector<1x128xf32>
    %574 = vector.extract_strided_slice %573 {offsets = [0, 0], sizes = [1, 32], strides = [1, 1]} : vector<1x128xf32> to vector<1x32xf32>
    %575 = arith.negf %574 : vector<1x32xf32>
    %576 = math.exp %575 : vector<1x32xf32>
    %cst_223 = arith.constant 1.000000e+00 : f32
    %577 = vector.broadcast %cst_223 : f32 to vector<1x32xf32>
    %578 = arith.addf %577, %576 : vector<1x32xf32>
    %579 = arith.divf %577, %578 : vector<1x32xf32>
    %580 = vector.extract_strided_slice %573 {offsets = [0, 32], sizes = [1, 32], strides = [1, 1]} : vector<1x128xf32> to vector<1x32xf32>
    %581 = arith.negf %580 : vector<1x32xf32>
    %582 = math.exp %581 : vector<1x32xf32>
    %cst_224 = arith.constant 1.000000e+00 : f32
    %583 = vector.broadcast %cst_224 : f32 to vector<1x32xf32>
    %584 = arith.addf %583, %582 : vector<1x32xf32>
    %585 = arith.divf %583, %584 : vector<1x32xf32>
    %586 = vector.extract_strided_slice %573 {offsets = [0, 64], sizes = [1, 32], strides = [1, 1]} : vector<1x128xf32> to vector<1x32xf32>
    %587 = math.tanh %586 : vector<1x32xf32>
    %588 = vector.extract_strided_slice %573 {offsets = [0, 96], sizes = [1, 32], strides = [1, 1]} : vector<1x128xf32> to vector<1x32xf32>
    %589 = arith.negf %588 : vector<1x32xf32>
    %590 = math.exp %589 : vector<1x32xf32>
    %cst_225 = arith.constant 1.000000e+00 : f32
    %591 = vector.broadcast %cst_225 : f32 to vector<1x32xf32>
    %592 = arith.addf %591, %590 : vector<1x32xf32>
    %593 = arith.divf %591, %592 : vector<1x32xf32>
    %594 = arith.mulf %585, %570 : vector<1x32xf32>
    %595 = arith.mulf %579, %587 : vector<1x32xf32>
    %596 = arith.addf %594, %595 : vector<1x32xf32>
    %597 = math.tanh %596 : vector<1x32xf32>
    %598 = arith.mulf %593, %597 : vector<1x32xf32>
    %599 = vector.extract_strided_slice %567 {offsets = [1, 0], sizes = [1, 128], strides = [1, 1]} : vector<4x128xf32> to vector<1x128xf32>
    %cst_226 = arith.constant dense<0.000000e+00> : vector<1x128xf32>
    %600 = tpu.matmul %598, %568, %cst_226 {dimension_numbers = #tpu.dot_dimension_numbers<[1], [0], [0], [1], [0, 0, 1, 1], [], []>} : vector<1x32xf32>, vector<32x128xf32>, vector<1x128xf32> -> vector<1x128xf32>
    %601 = arith.addf %599, %600 : vector<1x128xf32>
    %602 = vector.extract_strided_slice %601 {offsets = [0, 0], sizes = [1, 32], strides = [1, 1]} : vector<1x128xf32> to vector<1x32xf32>
    %603 = arith.negf %602 : vector<1x32xf32>
    %604 = math.exp %603 : vector<1x32xf32>
    %cst_227 = arith.constant 1.000000e+00 : f32
    %605 = vector.broadcast %cst_227 : f32 to vector<1x32xf32>
    %606 = arith.addf %605, %604 : vector<1x32xf32>
    %607 = arith.divf %605, %606 : vector<1x32xf32>
    %608 = vector.extract_strided_slice %601 {offsets = [0, 32], sizes = [1, 32], strides = [1, 1]} : vector<1x128xf32> to vector<1x32xf32>
    %609 = arith.negf %608 : vector<1x32xf32>
    %610 = math.exp %609 : vector<1x32xf32>
    %cst_228 = arith.constant 1.000000e+00 : f32
    %611 = vector.broadcast %cst_228 : f32 to vector<1x32xf32>
    %612 = arith.addf %611, %610 : vector<1x32xf32>
    %613 = arith.divf %611, %612 : vector<1x32xf32>
    %614 = vector.extract_strided_slice %601 {offsets = [0, 64], sizes = [1, 32], strides = [1, 1]} : vector<1x128xf32> to vector<1x32xf32>
    %615 = math.tanh %614 : vector<1x32xf32>
    %616 = vector.extract_strided_slice %601 {offsets = [0, 96], sizes = [1, 32], strides = [1, 1]} : vector<1x128xf32> to vector<1x32xf32>
    %617 = arith.negf %616 : vector<1x32xf32>
    %618 = math.exp %617 : vector<1x32xf32>
    %cst_229 = arith.constant 1.000000e+00 : f32
    %619 = vector.broadcast %cst_229 : f32 to vector<1x32xf32>
    %620 = arith.addf %619, %618 : vector<1x32xf32>
    %621 = arith.divf %619, %620 : vector<1x32xf32>
    %622 = arith.mulf %613, %596 : vector<1x32xf32>
    %623 = arith.mulf %607, %615 : vector<1x32xf32>
    %624 = arith.addf %622, %623 : vector<1x32xf32>
    %625 = math.tanh %624 : vector<1x32xf32>
    %626 = arith.mulf %621, %625 : vector<1x32xf32>
    %627 = vector.extract_strided_slice %567 {offsets = [2, 0], sizes = [1, 128], strides = [1, 1]} : vector<4x128xf32> to vector<1x128xf32>
    %cst_230 = arith.constant dense<0.000000e+00> : vector<1x128xf32>
    %628 = tpu.matmul %626, %568, %cst_230 {dimension_numbers = #tpu.dot_dimension_numbers<[1], [0], [0], [1], [0, 0, 1, 1], [], []>} : vector<1x32xf32>, vector<32x128xf32>, vector<1x128xf32> -> vector<1x128xf32>
    %629 = arith.addf %627, %628 : vector<1x128xf32>
    %630 = vector.extract_strided_slice %629 {offsets = [0, 0], sizes = [1, 32], strides = [1, 1]} : vector<1x128xf32> to vector<1x32xf32>
    %631 = arith.negf %630 : vector<1x32xf32>
    %632 = math.exp %631 : vector<1x32xf32>
    %cst_231 = arith.constant 1.000000e+00 : f32
    %633 = vector.broadcast %cst_231 : f32 to vector<1x32xf32>
    %634 = arith.addf %633, %632 : vector<1x32xf32>
    %635 = arith.divf %633, %634 : vector<1x32xf32>
    %636 = vector.extract_strided_slice %629 {offsets = [0, 32], sizes = [1, 32], strides = [1, 1]} : vector<1x128xf32> to vector<1x32xf32>
    %637 = arith.negf %636 : vector<1x32xf32>
    %638 = math.exp %637 : vector<1x32xf32>
    %cst_232 = arith.constant 1.000000e+00 : f32
    %639 = vector.broadcast %cst_232 : f32 to vector<1x32xf32>
    %640 = arith.addf %639, %638 : vector<1x32xf32>
    %641 = arith.divf %639, %640 : vector<1x32xf32>
    %642 = vector.extract_strided_slice %629 {offsets = [0, 64], sizes = [1, 32], strides = [1, 1]} : vector<1x128xf32> to vector<1x32xf32>
    %643 = math.tanh %642 : vector<1x32xf32>
    %644 = vector.extract_strided_slice %629 {offsets = [0, 96], sizes = [1, 32], strides = [1, 1]} : vector<1x128xf32> to vector<1x32xf32>
    %645 = arith.negf %644 : vector<1x32xf32>
    %646 = math.exp %645 : vector<1x32xf32>
    %cst_233 = arith.constant 1.000000e+00 : f32
    %647 = vector.broadcast %cst_233 : f32 to vector<1x32xf32>
    %648 = arith.addf %647, %646 : vector<1x32xf32>
    %649 = arith.divf %647, %648 : vector<1x32xf32>
    %650 = arith.mulf %641, %624 : vector<1x32xf32>
    %651 = arith.mulf %635, %643 : vector<1x32xf32>
    %652 = arith.addf %650, %651 : vector<1x32xf32>
    %653 = math.tanh %652 : vector<1x32xf32>
    %654 = arith.mulf %649, %653 : vector<1x32xf32>
    %655 = vector.extract_strided_slice %567 {offsets = [3, 0], sizes = [1, 128], strides = [1, 1]} : vector<4x128xf32> to vector<1x128xf32>
    %cst_234 = arith.constant dense<0.000000e+00> : vector<1x128xf32>
    %656 = tpu.matmul %654, %568, %cst_234 {dimension_numbers = #tpu.dot_dimension_numbers<[1], [0], [0], [1], [0, 0, 1, 1], [], []>} : vector<1x32xf32>, vector<32x128xf32>, vector<1x128xf32> -> vector<1x128xf32>
    %657 = arith.addf %655, %656 : vector<1x128xf32>
    %658 = vector.extract_strided_slice %657 {offsets = [0, 0], sizes = [1, 32], strides = [1, 1]} : vector<1x128xf32> to vector<1x32xf32>
    %659 = arith.negf %658 : vector<1x32xf32>
    %660 = math.exp %659 : vector<1x32xf32>
    %cst_235 = arith.constant 1.000000e+00 : f32
    %661 = vector.broadcast %cst_235 : f32 to vector<1x32xf32>
    %662 = arith.addf %661, %660 : vector<1x32xf32>
    %663 = arith.divf %661, %662 : vector<1x32xf32>
    %664 = vector.extract_strided_slice %657 {offsets = [0, 32], sizes = [1, 32], strides = [1, 1]} : vector<1x128xf32> to vector<1x32xf32>
    %665 = arith.negf %664 : vector<1x32xf32>
    %666 = math.exp %665 : vector<1x32xf32>
    %cst_236 = arith.constant 1.000000e+00 : f32
    %667 = vector.broadcast %cst_236 : f32 to vector<1x32xf32>
    %668 = arith.addf %667, %666 : vector<1x32xf32>
    %669 = arith.divf %667, %668 : vector<1x32xf32>
    %670 = vector.extract_strided_slice %657 {offsets = [0, 64], sizes = [1, 32], strides = [1, 1]} : vector<1x128xf32> to vector<1x32xf32>
    %671 = math.tanh %670 : vector<1x32xf32>
    %672 = vector.extract_strided_slice %657 {offsets = [0, 96], sizes = [1, 32], strides = [1, 1]} : vector<1x128xf32> to vector<1x32xf32>
    %673 = arith.negf %672 : vector<1x32xf32>
    %674 = math.exp %673 : vector<1x32xf32>
    %cst_237 = arith.constant 1.000000e+00 : f32
    %675 = vector.broadcast %cst_237 : f32 to vector<1x32xf32>
    %676 = arith.addf %675, %674 : vector<1x32xf32>
    %677 = arith.divf %675, %676 : vector<1x32xf32>
    %678 = arith.mulf %669, %652 : vector<1x32xf32>
    %679 = arith.mulf %663, %671 : vector<1x32xf32>
    %680 = arith.addf %678, %679 : vector<1x32xf32>
    %681 = math.tanh %680 : vector<1x32xf32>
    %682 = arith.mulf %677, %681 : vector<1x32xf32>
    %c0_238 = arith.constant 0 : index
    %c0_239 = arith.constant 0 : index
    %683 = vector.load %arg25[%c0_238, %c0_239] : memref<32x100xf32, #tpu.memory_space<vmem>>, vector<32x100xf32>
    %cst_240 = arith.constant dense<0.000000e+00> : vector<1x100xf32>
    %684 = tpu.matmul %682, %683, %cst_240 {dimension_numbers = #tpu.dot_dimension_numbers<[1], [0], [0], [1], [0, 0, 1, 1], [], []>} : vector<1x32xf32>, vector<32x100xf32>, vector<1x100xf32> -> vector<1x100xf32>
    %c0_241 = arith.constant 0 : index
    %c0_242 = arith.constant 0 : index
    %685 = vector.load %arg26[%c0_241, %c0_242] : memref<1x100xf32, #tpu.memory_space<vmem>>, vector<1x100xf32>
    %686 = arith.addf %684, %685 : vector<1x100xf32>
    %c0_243 = arith.constant 0 : index
    %c0_244 = arith.constant 0 : index
    %687 = vector.load %arg27[%c0_243, %c0_244] : memref<100x5xf32, #tpu.memory_space<vmem>>, vector<100x5xf32>
    %cst_245 = arith.constant dense<0.000000e+00> : vector<1x5xf32>
    %688 = tpu.matmul %686, %687, %cst_245 {dimension_numbers = #tpu.dot_dimension_numbers<[1], [0], [0], [1], [0, 0, 1, 1], [], []>} : vector<1x100xf32>, vector<100x5xf32>, vector<1x5xf32> -> vector<1x5xf32>
    %c0_246 = arith.constant 0 : index
    %c0_247 = arith.constant 0 : index
    %689 = vector.load %arg28[%c0_246, %c0_247] : memref<1x5xf32, #tpu.memory_space<vmem>>, vector<1x5xf32>
    %690 = arith.addf %688, %689 : vector<1x5xf32>
    %cst_248 = arith.constant dense<0xFF800000> : vector<1xf32>
    %691 = vector.multi_reduction <maximumf>, %690, %cst_248 [1] : vector<1x5xf32> to vector<1xf32>
    %692 = vector.shape_cast %691 : vector<1xf32> to vector<1x1xf32>
    %693 = vector.broadcast %692 : vector<1x1xf32> to vector<1x5xf32>
    %694 = arith.subf %690, %693 : vector<1x5xf32>
    %695 = math.exp %694 : vector<1x5xf32>
    %cst_249 = arith.constant dense<0.000000e+00> : vector<1xf32>
    %696 = vector.multi_reduction <add>, %695, %cst_249 [1] : vector<1x5xf32> to vector<1xf32>
    %697 = vector.shape_cast %696 : vector<1xf32> to vector<1x1xf32>
    %698 = math.log %697 : vector<1x1xf32>
    %699 = vector.broadcast %698 : vector<1x1xf32> to vector<1x5xf32>
    %700 = arith.subf %694, %699 : vector<1x5xf32>
    %c0_250 = arith.constant 0 : index
    %c0_251 = arith.constant 0 : index
    %701 = vector.load %arg29[%c0_250, %c0_251] : memref<1x5xf32, #tpu.memory_space<vmem>>, vector<1x5xf32>
    tpu.vector_store %arg29[%c0_250, %c0_251], %700 {strides = array<i32>} : memref<1x5xf32, #tpu.memory_space<vmem>>, vector<1x5xf32>,
    return
  }
}

</mosaic_0001>

<bundles_post_ra>
// kernel: forward.1
= control target key start
LH: loop header
LB: loop body
LE: loop exit
PB: predicated region body
PF: predicated region fallthrough
CT: control target
= control target key end

     0   :  { %s6491_s6 = smov 1   ;;  %s6492_s10 = smov 2   ;;  %s7447_s0 = inlined_call_operand.smem [shape: u32[30], index: -1, kind: input, shape index: {}] }
   0x1   :  { %s6540_s5 = sld [smem:[%s7447_s0]]   ;;  %s6493_s14 = smov 3  }
   0x2   :  { %s6545_s9 = sld [smem:[%s7447_s0 + %s6491_s6]]   ;;  %s6494_s18 = smov 4  }
   0x3   :  { %s6550_s13 = sld [smem:[%s7447_s0 + %s6492_s10]]   ;;  %s6495_s22 = smov 5  }
   0x4   :  { %s6555_s17 = sld [smem:[%s7447_s0 + %s6493_s14]]   ;;  %s6496_s26 = smov 6  }
   0x5   :  { %s6560_s21 = sld [smem:[%s7447_s0 + %s6494_s18]]   ;;  %s6497_s30 = smov 7  }
   0x6   :  { %s6565_s25 = sld [smem:[%s7447_s0 + %s6495_s22]]   ;;  %s6498_s4 = smov 8  }
   0x7   :  { %s6570_s29 = sld [smem:[%s7447_s0 + %s6496_s26]]   ;;  %s6499_s10 = smov 9  }
   0x8   :  { %s6575_s3 = sld [smem:[%s7447_s0 + %s6497_s30]]   ;;  %s6500_s15 = smov 10  }
   0x9   :  { %s6580_s8 = sld [smem:[%s7447_s0 + %s6498_s4]]   ;;  %s6501_s20 = smov 11  }
   0xa   :  { %7458 = sst [smem:[#allocation5_spill]] %s6555_s17  ;;  %s6502_s26 = smov 12  }
   0xb   :  { %s6585_s14 = sld [smem:[%s7447_s0 + %s6499_s10]]   ;;  %s6503_s1 = smov 13  }
   0xc   :  { %s6590_s19 = sld [smem:[%s7447_s0 + %s6500_s15]]   ;;  %s6504_s7 = smov 14  }
   0xd   :  { %s6595_s24 = sld [smem:[%s7447_s0 + %s6501_s20]]   ;;  %s6505_s15 = smov 15  }
   0xe   :  { %s6600_s30 = sld [smem:[%s7447_s0 + %s6502_s26]]   ;;  %s6506_s22 = smov 16  }
   0xf   :  { %s6605_s6 = sld [smem:[%s7447_s0 + %s6503_s1]]   ;;  %s6507_s28 = smov 17  }
  0x10   :  { %s6610_s12 = sld [smem:[%s7447_s0 + %s6504_s7]]   ;;  %s6508_s7 = smov 18  }
  0x11   :  { %s6615_s20 = sld [smem:[%s7447_s0 + %s6505_s15]]   ;;  %s6509_s15 = smov 19  }
  0x12   :  { %s6620_s27 = sld [smem:[%s7447_s0 + %s6506_s22]]   ;;  %s6510_s22 = smov 20  }
  0x13   :  { %s6625_s4 = sld [smem:[%s7447_s0 + %s6507_s28]]   ;;  %s6511_s28 = smov 21  }
  0x14   :  { %s6630_s17 = sld [smem:[%s7447_s0 + %s6508_s7]]   ;;  %s6512_s7 = smov 22  }
  0x16   :  { %7459 = sst [smem:[#allocation6_spill]] %s6610_s12 }
  0x17   :  { %s6635_s12 = sld [smem:[%s7447_s0 + %s6509_s15]]   ;;  %s6513_s15 = smov 23  }
  0x18   :  { %7460 = sst [smem:[#allocation7_spill]] %s6620_s27 }
  0x19   :  { %7461 = sst [smem:[#allocation8_spill]] %s6625_s4 }
  0x1a   :  { %7462 = sst [smem:[#allocation9_spill]] %s6630_s17 }
  0x1b   :  { %s6640_s27 = sld [smem:[%s7447_s0 + %s6510_s22]]   ;;  %s6514_s22 = smov 24  }
  0x1c   :  { %s6645_s4 = sld [smem:[%s7447_s0 + %s6511_s28]]   ;;  %s6515_s28 = smov 25  }
  0x1d   :  { %7463 = sst [smem:[#allocation10_spill]] %s6635_s12 }
  0x1e   :  { %s6650_s17 = sld [smem:[%s7447_s0 + %s6512_s7]]   ;;  %s6516_s7 = smov 26  }
  0x1f   :  { %s6655_s12 = sld [smem:[%s7447_s0 + %s6513_s15]]   ;;  %s6517_s15 = smov 27  }
  0x21   :  { %7464 = sst [smem:[#allocation11_spill]] %s6640_s27 }
  0x22   :  { %7465 = sst [smem:[#allocation12_spill]] %s6645_s4 }
  0x23   :  { %s6660_s27 = sld [smem:[%s7447_s0 + %s6514_s22]]   ;;  %s6518_s22 = smov 28  }
  0x24   :  { %7466 = sst [smem:[#allocation13_spill]] %s6650_s17 }
  0x25   :  { %7467 = sst [smem:[#allocation14_spill]] %s6655_s12 }
  0x26   :  { %s6665_s4 = sld [smem:[%s7447_s0 + %s6515_s28]]   ;;  %s6519_s28 = smov 29  }
  0x27   :  { %s6670_s17 = sld [smem:[%s7447_s0 + %s6516_s7]]  }
  0x28   :  { %s6675_s12 = sld [smem:[%s7447_s0 + %s6517_s15]]  }
  0x29   :  { %7468 = sst [smem:[#allocation15_spill]] %s6660_s27 }
  0x2a   :  { %s6680_s27 = sld [smem:[%s7447_s0 + %s6518_s22]]  }
  0x2c   :  { %7469 = sst [smem:[#allocation16_spill]] %s6665_s4 }
  0x2d   :  { %s6685_s4 = sld [smem:[%s7447_s0 + %s6519_s28]]  }
  0x2e   :  { %v129_v0 = vld [vmem:[%s6545_s9 + $0x10] sm:$0xff]  ;;  %v127_v1 = vld [vmem:[%s6545_s9] sm:$0xff]  ;;  %v6520_v2 = vmov 0  }
  0x2f   :  { %6310 = vset.pattern.permute.xlu1 %v6520_v2  ;;  %6309 = vset.pattern.permute.xlu0 %v6520_v2 }
  0x30   :  { %164 = vperm.xlu1 %6310, %v129_v0   ;;  %158 = vperm.xlu0 %6309, %v127_v1  }
  0x31   :  { %64 = vsyncpa [#allocation3], 0  ;;  %v130_v3 = vld [vmem:[%s6545_s9 + $0x18] sm:$0xff]  ;;  %v128_v4 = vld [vmem:[%s6545_s9 + $0x8] sm:$0xff]  ;;  %v6521_v5 = vmov 0.0   ;;  %vm202_vm0 = vcmask 1041408   ;;  %v131_v14 = vlaneseq }
  0x32   :  { %5675 = vmatprep.subr.mxu1 %v6521_v5  ;;  %v188_v6 = vld [vmem:[%s6570_s29] sm:$0x3]  ;;  %v182_v8 = vld [vmem:[%s6560_s21 + $0x8] sm:$0xff]  ;;  %v126_v12 = vld [vmem:[%s6540_s5 + $0x18] sm:$0xff]  ;;  %vm189_vm1 = vcmask 15360   ;;  %vm291_vm7 = vcmask 408576  }
  0x33   :  { %v181_v7 = vld [vmem:[%s6560_s21] sm:$0xff]  ;;  %5633 = vmatprep.subr.msk.mxu0 %vm202_vm0, %v188_v6  ;;  %v124_v10 = vld [vmem:[%s6540_s5 + $0x8] sm:$0xff]  ;;  %v125_v13 = vld [vmem:[%s6540_s5 + $0x10] sm:$0xff]  ;;  %v6702_v15 = vand.u32 127, %v131_v14  ;;  %vm399_vm11 = vcmask 261120   ;;  %vm6522_vm12 = vmmov 0  }
  0x34   :  { %v6083_v9 = vpack.c.bf16 %v182_v8, %v181_v7  ;;  %167 = vperm.xlu1 %6310, %v130_v3   ;;  %161 = vperm.xlu0 %6309, %v128_v4   ;;  %v123_v11 = vld [vmem:[%s6540_s5] sm:$0xff]  ;;  %v183_v19 = vld [vmem:[%s6560_s21 + $0x10] sm:$0xff]  ;;  %v184_v20 = vld [vmem:[%s6560_s21 + $0x18] sm:$0xff]  ;;  %s6523_s0 = smov 96   ;;  %s6524_s5 = smov 80   ;;  %vm588_vm13 = vcmask 130048  }
  0x35   :  { %5634 = vmatpush3.msk.msra.mxu0 %vm202_vm0, %v188_v6  ;;  %v6087_v24 = vpack.c.bf16 %v184_v20, %v183_v19  ;;  %v185_v26 = vld [vmem:[%s6560_s21 + $0x20] sm:$0xff]  ;;  %v186_v27 = vld [vmem:[%s6560_s21 + $0x28] sm:$0xff]  ;;  %v187_v33 = vld [vmem:[%s6560_s21 + $0x30] sm:$0x3]  ;;  %5677 = vmatprep.mubr.msk.f32.mxu1 %vm6522_vm12, %v6521_v5  ;;  %s6525_s9 = smov 112   ;;  %vm669_vm14 = vcmask 64512  }
  0x36   :  { %6084 = vmatprep.subr.bf16.mxu0 %v6083_v9  ;;  %v6091_v30 = vpack.c.bf16 %v186_v27, %v185_v26  ;;  %v392_v39 = vld [vmem:[%s6565_s25] sm:$0xff]  ;;  %v478_v4 = vld [vmem:[%s6585_s14 + $0x8] sm:$0xff]  ;;  %v479_v7 = vld [vmem:[%s6585_s14 + $0x10] sm:$0xff]  ;;  %s6527_s21 = smov 48   ;;  %s6528_s25 = smov 16  }
  0x37   :  { %v477_v3 = vld [vmem:[%s6585_s14] sm:$0xff]  ;;  %v480_v8 = vld [vmem:[%s6585_s14 + $0x18] sm:$0xff]  ;;  %s7470_s29 = sld [smem:[#allocation6_spill]]  ;;  %s7473_s7 = sld [smem:[#allocation9_spill]] }
  0x38   :  { %137 = vperm.xlu1 %6310, %v124_v10   ;;  %134 = vperm.xlu0 %6309, %v123_v11   ;;  %v6095_v6 = vpack.c.bf16 %v478_v4, %v477_v3  ;;  %v5278_v27 = vld [vmem:[%s6575_s3] ss:$0 sm:$0xff]  ;;  %s7471_s3 = sld [smem:[#allocation8_spill]]  ;;  %s7474_s10 = sld [smem:[#allocation10_spill]] }
  0x39   :  { %s7475_s11 = sld [smem:[#allocation11_spill]]  ;;  %s7481_s15 = sld [smem:[#allocation16_spill]] }
  0x3c   :  { %143 = vperm.xlu1 %6310, %v126_v12   ;;  %140 = vperm.xlu0 %6309, %v125_v13  }
  0xaf   :  { %v165_v16 = vpop.permute.xlu1 %164  ;;  %v159_v17 = vpop.permute.xlu0 %158 }
  0xb0   :  { %vm169_vm2 = vcmp.eq.s32.totalorder %v159_v17, %v6702_v15  ;;  %vm171_vm3 = vcmp.eq.s32.totalorder %v165_v16, %v6702_v15 }
  0xb1   :  { %v5264_v18 = vsel %vm169_vm2, 1.0, %v6521_v5  ;;  %v5266_v23 = vsel %vm171_vm3, 1.0, %v6521_v5  ;;  %vm4439_vm2 = vcmask 1042432   ;;  %vm5125_vm3 = vcmask 818176  }
  0xb2   :  { %5635 = vmatprep.mubr.msk.f32.mxu0 %vm189_vm1, %v5264_v18 }
  0xb3   :  { %v168_v21 = vpop.permute.xlu1 %167  ;;  %v162_v22 = vpop.permute.xlu0 %161 }
  0xb4   :  { %vm172_vm4 = vcmp.eq.s32.totalorder %v168_v21, %v6702_v15  ;;  %vm170_vm5 = vcmp.eq.s32.totalorder %v162_v22, %v6702_v15 }
  0xb5   :  { %v5265_v25 = vsel %vm170_vm5, 1.0, %v6521_v5  ;;  %v5267_v28 = vsel %vm172_vm4, 1.0, %v6521_v5  ;;  %vm5203_vm4 = vcmask 32768  }
  0xb6   :  { %5636 = vmatmul.mubr.msk.f32.vlgmr.msra.gmra.mrb[0].mxu0 %vm189_vm1, %v5265_v25 }
  0xb7   :  { %6086 = vmatpush3.bf16.msra.mxu0 %v6083_v9  ;;  %v135_v29 = vpop.permute.xlu0 %134  ;;  %5638 = vmatprep.mubr.msk.f32.mxu0 %vm189_vm1, %v5266_v23  ;;  %v138_v32 = vpop.permute.xlu1 %137  ;;  %v6099_v9 = vpack.c.bf16 %v480_v8, %v479_v7 }
  0xb8   :  { %vm145_vm6 = vcmp.eq.s32.totalorder %v135_v29, %v6702_v15  ;;  %6088 = vmatprep.subr.bf16.mxu0 %v6087_v24  ;;  %vm146_vm8 = vcmp.eq.s32.totalorder %v138_v32, %v6702_v15  ;;  %v5279_v29 = vld [vmem:[%s6580_s8] ss:$0 sm:$0xff]  ;;  %s7472_s8 = sld [smem:[#allocation7_spill]] }
  0xb9   :  { %v5260_v31 = vsel %vm145_vm6, 1.0, %v6521_v5  ;;  %v5261_v36 = vsel %vm146_vm8, 1.0, %v6521_v5 }
  0xba   :  { %5639 = vmatmul.mubr.msk.f32.gmra.mrb[2].mxu0 %vm189_vm1, %v5267_v28  ;;  %vm4436_vm1 = vcmask 1040384  }
  0xbb   :  { %6090 = vmatpush3.bf16.msra.mxu0 %v6087_v24  ;;  %5655 = vmatprep.mubr.msk.f32.mxu0 %vm291_vm7, %v5260_v31  ;;  %v141_v34 = vpop.permute.xlu0 %140  ;;  %v144_v35 = vpop.permute.xlu1 %143 }
  0xbc   :  { %6092 = vmatprep.subr.bf16.mxu0 %v6091_v30  ;;  %vm147_vm9 = vcmp.eq.s32.totalorder %v141_v34, %v6702_v15  ;;  %vm148_vm10 = vcmp.eq.s32.totalorder %v144_v35, %v6702_v15 }
  0xbd   :  { %v5262_v37 = vsel %vm147_vm9, 1.0, %v6521_v5  ;;  %v5263_v38 = vsel %vm148_vm10, 1.0, %v6521_v5 }
  0xbf   :  { %6094 = vmatpush3.bf16.msra.mxu0 %v6091_v30 }
  0xc0   :  { %5653 = vmatprep.subr.msk.mxu0 %vm202_vm0, %v187_v33 }
  0xc3   :  { %5654 = vmatpush3.msk.msra.mxu0 %vm202_vm0, %v187_v33 }
  0xc4   :  { %5656 = vmatmul.mubr.msk.f32.vlgmr.msra.gmra.mrb[0].mxu0 %vm291_vm7, %v5261_v36  ;;  %6096 = vmatprep.subr.bf16.mxu0 %v6095_v6 }
  0xc5   :  { %5658 = vmatprep.mubr.msk.f32.mxu0 %vm291_vm7, %v5262_v37  ;;  %6098 = vmatpush3.bf16.msra.mxu0 %v6095_v6  ;;  %v6841_v6 = vshrl.u32 %v131_v14, 7 }
  0xc6   :  { %6100 = vmatprep.subr.bf16.mxu0 %v6099_v9 }
  0xc7   :  { %v666_v8 = vsub.s32 0, %v6841_v6 }
  0xc8   :  { %5659 = vmatmul.mubr.msk.f32.gmra.mrb[2].mxu0 %vm291_vm7, %v5263_v38 }
  0xc9   :  { %6102 = vmatpush3.bf16.msra.mxu0 %v6099_v9 }
  0xca   :  { %5685 = vmatprep.subr.mxu0 %v6521_v5 }
 0x197   :  { %v5657_v40 = vpop.f32.mrb[0].mxu0 }
 0x198   :  { %v394_v41 = vadd.f32 %v5657_v40, %v392_v39  ;;  %v373_v42 = vpop.f32.mrb[1].mxu0 }
 0x199   :  { %v393_v43 = vadd.f32 %v392_v39, %v373_v42 }
 0x19a   :  { %v403_v44 = vsel %vm399_vm11, %v394_v41, 0.0 }
 0x19b   :  { %404 = vadd.xlane.f32.xlu1 %v403_v44  ;;  %v5660_v45 = vpop.f32.mrb[2].mxu0  ;;  %v400_v46 = vsel %vm399_vm11, %v393_v43, 0.0 }
 0x19c   :  { %v396_v47 = vadd.f32 %v5660_v45, %v392_v39  ;;  %401 = vadd.xlane.f32.xlu0 %v400_v46  ;;  %v383_v48 = vpop.f32.mrb[3].mxu0 }
 0x19d   :  { %v395_v49 = vadd.f32 %v392_v39, %v383_v48 }
 0x19e   :  { %v409_v2 = vsel %vm399_vm11, %v396_v47, 0.0 }
 0x19f   :  { %v406_v50 = vsel %vm399_vm11, %v395_v49, 0.0 }
 0x1a0   :  { %407 = vadd.xlane.f32.xlu1 %v406_v50 }
 0x228   :  { %v405_v51 = vpop.xlane.xlu1 %404 }
 0x229   :  { %v414_v52 = vmul.f32 0.03125, %v405_v51  ;;  %v402_v53 = vpop.xlane.xlu0 %401 }
 0x22a   :  { %v413_v54 = vmul.f32 0.03125, %v402_v53 }
 0x22b   :  { %v418_v55 = vsub.f32 %v394_v41, %v414_v52 }
 0x22c   :  { %v417_v56 = vsub.f32 %v393_v43, %v413_v54 }
 0x22d   :  { %v408_v57 = vpop.xlane.xlu1 %407  ;;  %v422_v62 = vmul.f32 %v418_v55, %v418_v55 }
 0x22e   :  { %v415_v58 = vmul.f32 0.03125, %v408_v57  ;;  %v421_v59 = vmul.f32 %v417_v56, %v417_v56 }
 0x22f   :  { %v428_v1 = vsel %vm399_vm11, %v422_v62, 0.0 }
 0x230   :  { %v419_v60 = vsub.f32 %v395_v49, %v415_v58  ;;  %v425_v61 = vsel %vm399_vm11, %v421_v59, 0.0 }
 0x231   :  { %426 = vadd.xlane.f32.xlu0 %v425_v61 }
 0x232   :  { %v423_v63 = vmul.f32 %v419_v60, %v419_v60 }
 0x234   :  { %v431_v0 = vsel %vm399_vm11, %v423_v63, 0.0 }
 0x235   :  { %432 = vadd.xlane.f32.xlu1 %v431_v0  ;;  %429 = vadd.xlane.f32.xlu0 %v428_v1 }
 0x239   :  { %410 = vadd.xlane.f32.xlu0 %v409_v2  ;;  %v473_v2 = vld [vmem:[%s6550_s13] sm:$0xf]  ;;  %s6526_s13 = smov 64  }
 0x23a   :  { %v474_v3 = vcvt.s32.f32 %v473_v2 }
 0x23c   :  { %v475_v4 = vsub.f32 1.0, %v474_v3 }
 0x23e   :  { %v6843_v7 = vmul.f32 -10000.0, %v475_v4  ;;  %v1351_v4 = vsub.s32 2, %v6841_v6 }
 0x240   :  { %v6847_v9 = vrot.slane %v6843_v7, %v666_v8 }
 0x2be   :  { %v427_v10 = vpop.xlane.xlu0 %426 }
 0x2bf   :  { %v437_v11 = vmul.f32 0.03125, %v427_v10 }
 0x2c1   :  { %v441_v12 = vadd.f32 1e-12, %v437_v11 }
 0x2c2   :  { %v433_v13 = vpop.xlane.xlu1 %432  ;;  %v430_v16 = vpop.xlane.xlu0 %429 }
 0x2c3   :  { %6311 = vrsqrt.f32 %v441_v12  ;;  %v439_v17 = vmul.f32 0.03125, %v433_v13  ;;  %v438_v18 = vmul.f32 0.03125, %v430_v16 }
 0x2c5   :  { %v443_v19 = vadd.f32 1e-12, %v439_v17  ;;  %v442_v20 = vadd.f32 1e-12, %v438_v18 }
 0x2c6   :  { %v411_v21 = vpop.xlane.xlu0 %410 }
 0x2c7   :  { %6313 = vrsqrt.f32 %v443_v19  ;;  %v416_v22 = vmul.f32 0.03125, %v411_v21  ;;  %v1009_v19 = vsub.s32 1, %v6841_v6 }
 0x2c8   :  { %6315 = vrsqrt.f32 %v442_v20 }
 0x2c9   :  { %v420_v23 = vsub.f32 %v396_v47, %v416_v22  ;;  %v5280_v47 = vld [vmem:[%s6590_s19] ss:$0 sm:$0xff]  ;;  %v6855_v22 = vrot.slane %v6843_v7, %v1009_v19 }
 0x2cb   :  { %v424_v24 = vmul.f32 %v420_v23, %v420_v23 }
 0x2cd   :  { %v6312_v25 = vpop.eup %6311  ;;  %v434_v26 = vsel %vm399_vm11, %v424_v24, 0.0 }
 0x2ce   :  { %435 = vadd.xlane.f32.xlu0 %v434_v26  ;;  %v449_v28 = vmul.f32 %v6312_v25, %v417_v56 }
 0x2d0   :  { %v459_v30 = vmul.f32 %v5278_v27, %v449_v28 }
 0x2d1   :  { %v6314_v31 = vpop.eup %6313 }
 0x2d2   :  { %v6316_v32 = vpop.eup %6315  ;;  %v6751_v33 = vadd.f32 %v5279_v29, %v459_v30  ;;  %v451_v34 = vmul.f32 %v6314_v31, %v419_v60 }
 0x2d3   :  { %v450_v35 = vmul.f32 %v6316_v32, %v418_v55 }
 0x2d4   :  { %5669 = vmatprep.mubr.msk.f32.mxu0 %vm399_vm11, %v6751_v33  ;;  %v461_v36 = vmul.f32 %v5278_v27, %v451_v34 }
 0x2d5   :  { %v460_v37 = vmul.f32 %v5278_v27, %v450_v35 }
 0x2d6   :  { %v6755_v38 = vadd.f32 %v5279_v29, %v461_v36 }
 0x2d7   :  { %v6757_v39 = vadd.f32 %v5279_v29, %v460_v37 }
 0x2d9   :  { %5670 = vmatmul.mubr.msk.f32.vlgmr.msra.gmra.mrb[4].mxu0 %vm399_vm11, %v6757_v39 }
 0x2da   :  { %5672 = vmatprep.mubr.msk.f32.mxu0 %vm399_vm11, %v6755_v38 }
 0x35b   :  { %v436_v40 = vpop.xlane.xlu0 %435 }
 0x35c   :  { %v440_v41 = vmul.f32 0.03125, %v436_v40 }
 0x35e   :  { %v444_v42 = vadd.f32 1e-12, %v440_v41 }
 0x360   :  { %6317 = vrsqrt.f32 %v444_v42 }
 0x36a   :  { %v6318_v43 = vpop.eup %6317 }
 0x36b   :  { %v452_v44 = vmul.f32 %v6318_v43, %v420_v23 }
 0x36d   :  { %v462_v45 = vmul.f32 %v5278_v27, %v452_v44 }
 0x36f   :  { %v6763_v46 = vadd.f32 %v5279_v29, %v462_v45 }
 0x371   :  { %5673 = vmatmul.mubr.msk.f32.gmra.mrb[6].mxu0 %vm399_vm11, %v6763_v46 }
 0x372   :  { %5687 = vmatprep.mubr.msk.f32.mxu0 %vm6522_vm12, %v6521_v5 }
 0x3ac   :  { %v5671_v48 = vpop.f32.mrb[4].mxu0 }
 0x3ad   :  { %v566_v49 = vpop.f32.mrb[5].mxu0  ;;  %v6778_v51 = vadd.f32 %v5671_v48, %v5280_v47 }
 0x3ae   :  { %v6772_v50 = vadd.f32 %v5280_v47, %v566_v49 }
 0x3b0   :  { %586 = vrot.lane.b32.xlu1 %v6772_v50, %s6523_s0  ;;  %759 = vrot.lane.b32.xlu0 %v6772_v50, %s6524_s5 }
 0x3b4   :  { %757 = vrot.lane.b32.xlu1 %v6772_v50, %s6525_s9  ;;  %1101 = vrot.lane.b32.xlu0 %v6778_v51, %s6524_s5 }
 0x3b8   :  { %930 = vrot.lane.b32.xlu1 %v6778_v51, %s6523_s0 }
 0x3bc   :  { %1099 = vrot.lane.b32.xlu1 %v6778_v51, %s6525_s9 }
 0x422   :  { %v587_v52 = vpop.permute.xlu1 %586  ;;  %v760_v53 = vpop.permute.xlu0 %759 }
 0x423   :  { %5676 = vmatpush3.xpose.msk.msra.mxu1 %vm588_vm13, %v587_v52  ;;  %5686 = vmatpush3.xpose.msk.msra.mxu0 %vm588_vm13, %v760_v53 }
 0x424   :  { %5695 = vmatprep.subr.mxu0 %v6521_v5  ;;  %5680 = vmatprep.subr.mxu1 %v6521_v5 }
 0x426   :  { %5678 = vmatmul.mubr.msk.f32.vlgmr.msra.gmra.mrb[0].mxu1 %vm588_vm13, %v6772_v50  ;;  %v758_v54 = vpop.permute.xlu1 %757  ;;  %v1102_v56 = vpop.permute.xlu0 %1101 }
 0x427   :  { %5688 = vmatmul.mubr.msk.f32.vlgmr.msra.gmra.mrb[8].mxu0 %vm588_vm13, %v758_v54  ;;  %5682 = vmatprep.mubr.msk.f32.mxu1 %vm6522_vm12, %v6521_v5 }
 0x428   :  { %5697 = vmatprep.mubr.msk.f32.mxu0 %vm6522_vm12, %v6521_v5 }
 0x42a   :  { %v931_v55 = vpop.permute.xlu1 %930 }
 0x42b   :  { %5696 = vmatpush3.xpose.msk.msra.mxu0 %vm588_vm13, %v931_v55 }
 0x42c   :  { %5705 = vmatprep.subr.mxu0 %v6521_v5 }
 0x42e   :  { %5698 = vmatmul.mubr.msk.f32.vlgmr.msra.gmra.mrb[10].mxu0 %vm588_vm13, %v6778_v51  ;;  %v1100_v57 = vpop.permute.xlu1 %1099 }
 0x42f   :  { %5706 = vmatpush3.xpose.msk.msra.mxu0 %vm588_vm13, %v1102_v56  ;;  %5707 = vmatprep.mubr.msk.f32.mxu0 %vm6522_vm12, %v6521_v5 }
 0x430   :  { %5715 = vmatprep.subr.mxu0 %v6521_v5 }
 0x432   :  { %5708 = vmatmul.mubr.msk.f32.vlgmr.msra.gmra.mrb[12].mxu0 %vm588_vm13, %v1100_v57 }
 0x433   :  { %5717 = vmatprep.mubr.msk.f32.mxu0 %vm6522_vm12, %v6521_v5 }
 0x444   :  { %v5674_v58 = vpop.f32.mrb[6].mxu0 }
 0x445   :  { %v6810_v59 = vadd.f32 %v5674_v58, %v5280_v47  ;;  %v576_v60 = vpop.f32.mrb[7].mxu0 }
 0x446   :  { %v6812_v61 = vadd.f32 %v5280_v47, %v576_v60 }
 0x447   :  { %1614 = vrot.lane.b32.xlu1 %v6810_v59, %s6523_s0 }
 0x448   :  { %1272 = vrot.lane.b32.xlu0 %v6812_v61, %s6523_s0 }
 0x44b   :  { %1443 = vrot.lane.b32.xlu1 %v6812_v61, %s6524_s5 }
 0x44f   :  { %1441 = vrot.lane.b32.xlu1 %v6812_v61, %s6525_s9 }
 0x4b9   :  { %v1615_v62 = vpop.permute.xlu1 %1614 }
 0x4ba   :  { %v1273_v63 = vpop.permute.xlu0 %1272 }
 0x4bb   :  { %5716 = vmatpush3.xpose.msk.msra.mxu0 %vm588_vm13, %v1273_v63 }
 0x4bc   :  { %5725 = vmatprep.subr.mxu0 %v6521_v5 }
 0x4bd   :  { %v1444_v0 = vpop.permute.xlu1 %1443 }
 0x4be   :  { %5718 = vmatmul.mubr.msk.f32.vlgmr.msra.gmra.mrb[14].mxu0 %vm588_vm13, %v6812_v61 }
 0x4bf   :  { %5726 = vmatpush3.xpose.msk.msra.mxu0 %vm588_vm13, %v1444_v0  ;;  %5727 = vmatprep.mubr.msk.f32.mxu0 %vm6522_vm12, %v6521_v5 }
 0x4c0   :  { %5735 = vmatprep.subr.mxu0 %v6521_v5 }
 0x4c1   :  { %v1442_v1 = vpop.permute.xlu1 %1441 }
 0x4c2   :  { %5728 = vmatmul.mubr.msk.f32.vlgmr.msra.gmra.mrb[16].mxu0 %vm588_vm13, %v1442_v1 }
 0x4c3   :  { %5736 = vmatpush3.xpose.msk.msra.mxu0 %vm588_vm13, %v1615_v62  ;;  %5737 = vmatprep.mubr.msk.f32.mxu0 %vm6522_vm12, %v6521_v5 }
 0x4c4   :  { %5745 = vmatprep.subr.mxu0 %v6521_v5 }
 0x4c6   :  { %5738 = vmatmul.mubr.msk.f32.vlgmr.msra.gmra.mrb[18].mxu0 %vm588_vm13, %v6810_v59 }
 0x4c7   :  { %5747 = vmatprep.mubr.msk.f32.mxu0 %vm6522_vm12, %v6521_v5 }
 0x4f9   :  { %v659_v10 = vpop.f32.mrb[0].mxu1 }
 0x4fa   :  { %v663_v11 = vmul.f32 0.25, %v659_v10  ;;  %v5679_v12 = vpop.f32.mrb[1].mxu1  ;;  %v831_v13 = vpop.f32.mrb[8].mxu0  ;;  %v6879_v10 = vrot.slane %v6843_v7, %v1351_v4 }
 0x4fb   :  { %v835_v16 = vmul.f32 0.25, %v831_v13  ;;  %v5689_v17 = vpop.f32.mrb[9].mxu0 }
 0x4fc   :  { %v668_v18 = vadd.f32 %v6847_v9, %v663_v11  ;;  %v1693_v17 = vsub.s32 3, %v6841_v6 }
 0x4fd   :  { %v836_v14 = vadd.f32 %v835_v16, %v6847_v9 }
 0x4fe   :  { %v670_v20 = vsel %vm669_vm14, %v668_v18, -inf }
 0x4ff   :  { %671 = vmax.xlane.f32.xlu0 %v670_v20  ;;  %v837_v21 = vsel %vm669_vm14, %v836_v14, -inf }
 0x500   :  { %838 = vmax.xlane.f32.xlu1 %v837_v21 }
 0x501   :  { %v1002_v23 = vpop.f32.mrb[10].mxu0 }
 0x502   :  { %v1006_v24 = vmul.f32 0.25, %v1002_v23  ;;  %v5699_v25 = vpop.f32.mrb[11].mxu0 }
 0x504   :  { %v1011_v26 = vadd.f32 %v6855_v22, %v1006_v24 }
 0x505   :  { %v1173_v27 = vpop.f32.mrb[12].mxu0 }
 0x506   :  { %v5709_v28 = vpop.f32.mrb[13].mxu0  ;;  %v1012_v29 = vsel %vm669_vm14, %v1011_v26, -inf  ;;  %v1177_v30 = vmul.f32 0.25, %v1173_v27 }
 0x507   :  { %1013 = vmax.xlane.f32.xlu1 %v1012_v29 }
 0x508   :  { %v1178_v31 = vadd.f32 %v1177_v30, %v6855_v22 }
 0x50a   :  { %v1179_v32 = vsel %vm669_vm14, %v1178_v31, -inf }
 0x515   :  { %1785 = vrot.lane.b32.xlu0 %v6810_v59, %s6524_s5 }
 0x518   :  { %1783 = vrot.lane.b32.xlu1 %v6810_v59, %s6525_s9 }
 0x534   :  { %1180 = vmax.xlane.f32.xlu0 %v1179_v32 }
 0x54a   :  { %681 = vrot.lane.b32.xlu0 %v6772_v50, %s6526_s13 }
 0x58c   :  { %v672_v34 = vpop.xlane.xlu0 %671 }
 0x58d   :  { %v673_v35 = vsub.f32 %v668_v18, %v672_v34  ;;  %v839_v36 = vpop.xlane.xlu1 %838 }
 0x58e   :  { %v840_v37 = vsub.f32 %v836_v14, %v839_v36  ;;  %v6893_v14 = vrot.slane %v6843_v7, %v1693_v17  ;;  %v1957_v17 = vld [vmem:[%s6595_s24 + $0x10] sm:$0xff] }
 0x58f   :  { %v674_v40 = vmul.f32 1.442695, %v673_v35 }
 0x590   :  { %v841_v41 = vmul.f32 1.442695, %v840_v37  ;;  %v1786_v42 = vpop.permute.xlu0 %1785 }
 0x591   :  { %6319 = vpow2.f32 %v674_v40  ;;  %5746 = vmatpush3.xpose.msk.msra.mxu0 %vm588_vm13, %v1786_v42  ;;  %v1344_v43 = vpop.f32.mrb[14].mxu0 }
 0x592   :  { %6321 = vpow2.f32 %v841_v41  ;;  %v5719_v44 = vpop.f32.mrb[15].mxu0  ;;  %v1348_v16 = vmul.f32 0.25, %v1344_v43 }
 0x594   :  { %v1014_v45 = vpop.xlane.xlu1 %1013  ;;  %v1353_v19 = vadd.f32 %v6879_v10, %v1348_v16  ;;  %v1956_v16 = vld [vmem:[%s6595_s24 + $0x8] sm:$0xff] }
 0x595   :  { %v1015_v47 = vsub.f32 %v1011_v26, %v1014_v45  ;;  %v1515_v48 = vpop.f32.mrb[16].mxu0 }
 0x596   :  { %v5729_v49 = vpop.f32.mrb[17].mxu0  ;;  %v1519_v8 = vmul.f32 0.25, %v1515_v48  ;;  %v1354_v20 = vsel %vm669_vm14, %v1353_v19, -inf }
 0x597   :  { %v1016_v52 = vmul.f32 1.442695, %v1015_v47 }
 0x598   :  { %v1784_v53 = vpop.permute.xlu1 %1783  ;;  %v1520_v12 = vadd.f32 %v1519_v8, %v6879_v10 }
 0x599   :  { %6323 = vpow2.f32 %v1016_v52  ;;  %5748 = vmatmul.mubr.msk.f32.vlgmr.msra.gmra.mrb[20].mxu0 %vm588_vm13, %v1784_v53  ;;  %v1686_v54 = vpop.f32.mrb[18].mxu0 }
 0x59a   :  { %v5739_v55 = vpop.f32.mrb[19].mxu0  ;;  %v1521_v13 = vsel %vm669_vm14, %v1520_v12, -inf  ;;  %v1690_v18 = vmul.f32 0.25, %v1686_v54 }
 0x59b   :  { %v6320_v56 = vpop.eup %6319 }
 0x59c   :  { %v6322_v57 = vpop.eup %6321  ;;  %v676_v58 = vsel %vm669_vm14, %v6320_v56, 0.0  ;;  %v1695_v21 = vadd.f32 %v6893_v14, %v1690_v18 }
 0x59d   :  { %677 = vadd.xlane.f32.xlu1 %v676_v58  ;;  %v843_v60 = vsel %vm669_vm14, %v6322_v57, 0.0 }
 0x59e   :  { %844 = vadd.xlane.f32.xlu0 %v843_v60  ;;  %v1696_v23 = vsel %vm669_vm14, %v1695_v21, -inf }
 0x5a3   :  { %v6324_v62 = vpop.eup %6323 }
 0x5a4   :  { %v1018_v63 = vsel %vm669_vm14, %v6324_v62, 0.0 }
 0x5a5   :  { %1019 = vadd.xlane.f32.xlu0 %v1018_v63 }
 0x5ae   :  { %848 = vrot.lane.b32.xlu1 %v6772_v50, %s6527_s21 }
 0x5b2   :  { %1190 = vrot.lane.b32.xlu1 %v6778_v51, %s6527_s21 }
 0x5c1   :  { %v1181_v0 = vpop.xlane.xlu0 %1180 }
 0x5c2   :  { %v1182_v1 = vsub.f32 %v1178_v31, %v1181_v0 }
 0x5c4   :  { %v1183_v2 = vmul.f32 1.442695, %v1182_v1 }
 0x5c5   :  { %v682_v3 = vpop.permute.xlu0 %681 }
 0x5c6   :  { %6325 = vpow2.f32 %v1183_v2  ;;  %5681 = vmatpush3.msra.mxu1 %v682_v3 }
 0x5c7   :  { %5690 = vmatprep.subr.mxu1 %v6521_v5 }
 0x5d0   :  { %v6326_v11 = vpop.eup %6325 }
 0x5d1   :  { %v1185_v50 = vsel %vm669_vm14, %v6326_v11, 0.0 }
 0x5d2   :  { %1186 = vadd.xlane.f32.xlu0 %v1185_v50 }
 0x5d6   :  { %1522 = vmax.xlane.f32.xlu1 %v1521_v13  ;;  %v1955_v13 = vld [vmem:[%s6595_s24] sm:$0xff] }
 0x5d7   :  { %v6103_v18 = vpack.c.bf16 %v1956_v16, %v1955_v13 }
 0x5d9   :  { %6104 = vmatprep.subr.bf16.mxu0 %v6103_v18 }
 0x5da   :  { %6106 = vmatpush3.bf16.msra.mxu0 %v6103_v18 }
 0x5e7   :  { %1365 = vrot.lane.b32.xlu1 %v6812_v61, %s6526_s13 }
 0x5e8   :  { %1023 = vrot.lane.b32.xlu0 %v6778_v51, %s6526_s13 }
 0x5eb   :  { %1707 = vrot.lane.b32.xlu1 %v6810_v59, %s6526_s13 }
 0x607   :  { %1355 = vmax.xlane.f32.xlu0 %v1354_v20 }
 0x60b   :  { %1697 = vmax.xlane.f32.xlu0 %v1696_v23 }
 0x62a   :  { %v678_v51 = vpop.xlane.xlu1 %677 }
 0x62b   :  { %6327 = vrcp.f32 %v678_v51  ;;  %v845_v24 = vpop.xlane.xlu0 %844 }
 0x62c   :  { %6329 = vrcp.f32 %v845_v24 }
 0x62e   :  { %v849_v27 = vpop.permute.xlu1 %848 }
 0x632   :  { %v1020_v28 = vpop.xlane.xlu0 %1019  ;;  %v1191_v31 = vpop.permute.xlu1 %1190 }
 0x633   :  { %6331 = vrcp.f32 %v1020_v28 }
 0x635   :  { %v6328_v25 = vpop.eup %6327 }
 0x636   :  { %v680_v6 = vmul.f32 %v6328_v25, %v6320_v56  ;;  %v6330_v26 = vpop.eup %6329 }
 0x637   :  { %v847_v7 = vmul.f32 %v6330_v26, %v6322_v57 }
 0x638   :  { %5683 = vmatmul.mubr.msk.f32.vlgmr.msra.gmra.mrb[2].mxu1 %vm669_vm14, %v680_v6 }
 0x639   :  { %5691 = vmatpush3.msra.mxu1 %v849_v27  ;;  %5692 = vmatprep.mubr.msk.f32.mxu1 %vm6522_vm12, %v6521_v5 }
 0x63a   :  { %5700 = vmatprep.subr.mxu1 %v6521_v5 }
 0x63c   :  { %5693 = vmatmul.mubr.msk.f32.vlgmr.msra.gmra.mrb[4].mxu1 %vm669_vm14, %v847_v7 }
 0x63d   :  { %5702 = vmatprep.mubr.msk.f32.mxu1 %vm6522_vm12, %v6521_v5  ;;  %v6332_v30 = vpop.eup %6331 }
 0x63e   :  { %v1022_v34 = vmul.f32 %v6332_v30, %v6324_v62 }
 0x65f   :  { %v1187_v29 = vpop.xlane.xlu0 %1186 }
 0x660   :  { %6333 = vrcp.f32 %v1187_v29 }
 0x663   :  { %v1024_v32 = vpop.permute.xlu0 %1023  ;;  %v1523_v35 = vpop.xlane.xlu1 %1522 }
 0x664   :  { %5701 = vmatpush3.msra.mxu1 %v1024_v32  ;;  %v1524_v47 = vsub.f32 %v1520_v12, %v1523_v35 }
 0x665   :  { %5703 = vmatmul.mubr.msk.f32.vlgmr.msra.gmra.mrb[6].mxu1 %vm669_vm14, %v1022_v34  ;;  %5710 = vmatprep.subr.mxu1 %v6521_v5 }
 0x666   :  { %5711 = vmatpush3.msra.mxu1 %v1191_v31  ;;  %5712 = vmatprep.mubr.msk.f32.mxu1 %vm6522_vm12, %v6521_v5  ;;  %v1525_v48 = vmul.f32 1.442695, %v1524_v47 }
 0x667   :  { %5720 = vmatprep.subr.mxu1 %v6521_v5  ;;  %v1366_v41 = vpop.permute.xlu1 %1365 }
 0x668   :  { %6335 = vpow2.f32 %v1525_v48 }
 0x66a   :  { %v6334_v36 = vpop.eup %6333 }
 0x66b   :  { %v1189_v37 = vmul.f32 %v6334_v36, %v6326_v11 }
 0x66c   :  { %v1857_v40 = vpop.f32.mrb[20].mxu0 }
 0x66d   :  { %v1861_v42 = vmul.f32 0.25, %v1857_v40  ;;  %5713 = vmatmul.mubr.msk.f32.vlgmr.msra.gmra.mrb[8].mxu1 %vm669_vm14, %v1189_v37  ;;  %v5749_v43 = vpop.f32.mrb[21].mxu0 }
 0x66e   :  { %5721 = vmatpush3.msra.mxu1 %v1366_v41  ;;  %5722 = vmatprep.mubr.msk.f32.mxu1 %vm6522_vm12, %v6521_v5 }
 0x66f   :  { %v1862_v44 = vadd.f32 %v1861_v42, %v6893_v14  ;;  %5730 = vmatprep.subr.mxu1 %v6521_v5 }
 0x671   :  { %v1863_v45 = vsel %vm669_vm14, %v1862_v44, -inf }
 0x672   :  { %1864 = vmax.xlane.f32.xlu0 %v1863_v45  ;;  %v6336_v57 = vpop.eup %6335 }
 0x673   :  { %v1527_v62 = vsel %vm669_vm14, %v6336_v57, 0.0 }
 0x688   :  { %1532 = vrot.lane.b32.xlu0 %v6812_v61, %s6527_s21 }
 0x694   :  { %v1356_v49 = vpop.xlane.xlu0 %1355 }
 0x695   :  { %v1357_v52 = vsub.f32 %v1353_v19, %v1356_v49  ;;  %v1958_v19 = vld [vmem:[%s6595_s24 + $0x18] sm:$0xff] }
 0x696   :  { %v6107_v20 = vpack.c.bf16 %v1958_v19, %v1957_v17  ;;  %v2141_v19 = vld [vmem:[%s6615_s20] sm:$0xff] }
 0x697   :  { %v1358_v53 = vmul.f32 1.442695, %v1357_v52 }
 0x698   :  { %v1698_v54 = vpop.xlane.xlu0 %1697  ;;  %6108 = vmatprep.subr.bf16.mxu0 %v6107_v20 }
 0x699   :  { %6337 = vpow2.f32 %v1358_v53  ;;  %v1699_v55 = vsub.f32 %v1695_v21, %v1698_v54  ;;  %v1708_v21 = vpop.permute.xlu1 %1707  ;;  %6110 = vmatpush3.bf16.msra.mxu0 %v6107_v20  ;;  %v2142_v20 = vld [vmem:[%s6615_s20 + $0x8] sm:$0xff] }
 0x69b   :  { %v1700_v56 = vmul.f32 1.442695, %v1699_v55  ;;  %v5309_v55 = vld [vmem:[%s6600_s30] ss:$0 sm:$0xff] }
 0x69d   :  { %6339 = vpow2.f32 %v1700_v56 }
 0x6a3   :  { %v6338_v58 = vpop.eup %6337 }
 0x6a4   :  { %v1360_v60 = vsel %vm669_vm14, %v6338_v58, 0.0 }
 0x6a5   :  { %1361 = vadd.xlane.f32.xlu1 %v1360_v60 }
 0x6a7   :  { %v6340_v63 = vpop.eup %6339  ;;  %1528 = vadd.xlane.f32.xlu0 %v1527_v62 }
 0x6a8   :  { %v1702_v61 = vsel %vm669_vm14, %v6340_v63, 0.0 }
 0x6a9   :  { %1703 = vadd.xlane.f32.xlu1 %v1702_v61 }
 0x6ff   :  { %v1865_v0 = vpop.xlane.xlu0 %1864 }
 0x700   :  { %v1866_v1 = vsub.f32 %v1862_v44, %v1865_v0 }
 0x702   :  { %v1867_v2 = vmul.f32 1.442695, %v1866_v1 }
 0x703   :  { %v1533_v23 = vpop.permute.xlu0 %1532 }
 0x704   :  { %6341 = vpow2.f32 %v1867_v2 }
 0x70b   :  { %v753_v3 = vpop.f32.mrb[2].mxu1 }
 0x70c   :  { %v5684_v4 = vpop.f32.mrb[3].mxu1 }
 0x70e   :  { %v6342_v8 = vpop.eup %6341 }
 0x70f   :  { %v920_v11 = vpop.f32.mrb[4].mxu1  ;;  %v1869_v50 = vsel %vm669_vm14, %v6342_v8, 0.0 }
 0x710   :  { %v5694_v12 = vpop.f32.mrb[5].mxu1  ;;  %925 = vrot.lane.b32.xlu1 %v920_v11, %s6528_s25  ;;  %1870 = vadd.xlane.f32.xlu0 %v1869_v50 }
 0x714   :  { %1874 = vrot.lane.b32.xlu1 %v6810_v59, %s6527_s21 }
 0x732   :  { %v1362_v51 = vpop.xlane.xlu1 %1361 }
 0x733   :  { %6343 = vrcp.f32 %v1362_v51  ;;  %v2144_v51 = vld [vmem:[%s6615_s20 + $0x18] sm:$0xff] }
 0x734   :  { %v1529_v24 = vpop.xlane.xlu0 %1528 }
 0x735   :  { %6345 = vrcp.f32 %v1529_v24 }
 0x736   :  { %v1704_v25 = vpop.xlane.xlu1 %1703 }
 0x737   :  { %6347 = vrcp.f32 %v1704_v25 }
 0x738   :  { %v1095_v6 = vpop.f32.mrb[6].mxu1 }
 0x739   :  { %v5704_v59 = vpop.f32.mrb[7].mxu1 }
 0x73d   :  { %v6344_v26 = vpop.eup %6343 }
 0x73e   :  { %v1364_v27 = vmul.f32 %v6344_v26, %v6338_v58 }
 0x73f   :  { %v6346_v7 = vpop.eup %6345 }
 0x740   :  { %v1262_v28 = vpop.f32.mrb[8].mxu1  ;;  %5723 = vmatmul.mubr.msk.f32.vlgmr.msra.gmra.mrb[10].mxu1 %vm669_vm14, %v1364_v27  ;;  %v1531_v30 = vmul.f32 %v6346_v7, %v6336_v57  ;;  %v6964_v27 = vld [vmem:[%s6605_s6] ss:$0 sm:$0xff] }
 0x741   :  { %5731 = vmatpush3.msra.mxu1 %v1533_v23  ;;  %v5714_v29 = vpop.f32.mrb[9].mxu1  ;;  %1267 = vrot.lane.b32.xlu0 %v1262_v28, %s6528_s25  ;;  %v6348_v31 = vpop.eup %6347  ;;  %v2143_v23 = vld [vmem:[%s6615_s20 + $0x10] sm:$0xff]  ;;  %v6967_v28 = vld [vmem:[%s7470_s29] ss:$0 sm:$0xff] }
 0x742   :  { %5732 = vmatprep.mubr.msk.f32.mxu1 %vm6522_vm12, %v6521_v5  ;;  %5740 = vmatprep.subr.mxu1 %v6521_v5  ;;  %v1706_v32 = vmul.f32 %v6348_v31, %v6340_v63  ;;  %v6115_v24 = vpack.c.bf16 %v2144_v51, %v2143_v23 }
 0x744   :  { %5733 = vmatmul.mubr.msk.f32.vlgmr.msra.gmra.mrb[12].mxu1 %vm669_vm14, %v1531_v30 }
 0x745   :  { %5741 = vmatpush3.msra.mxu1 %v1708_v21  ;;  %5742 = vmatprep.mubr.msk.f32.mxu1 %vm6522_vm12, %v6521_v5  ;;  %v6111_v21 = vpack.c.bf16 %v2142_v20, %v2141_v19 }
 0x746   :  { %5750 = vmatprep.subr.mxu1 %v6521_v5 }
 0x748   :  { %5743 = vmatmul.mubr.msk.f32.vlgmr.msra.gmra.mrb[14].mxu1 %vm669_vm14, %v1706_v32 }
 0x749   :  { %5752 = vmatprep.mubr.msk.f32.mxu1 %vm6522_vm12, %v6521_v5 }
 0x782   :  { %v926_v34 = vpop.permute.xlu1 %925 }
 0x783   :  { %v928_v35 = vsel %vm588_vm13, %v753_v3, %v926_v34 }
 0x784   :  { %5763 = vmatprep.mubr.msk.f32.mxu0 %vm399_vm11, %v928_v35 }
 0x786   :  { %v1875_v36 = vpop.permute.xlu1 %1874 }
 0x787   :  { %5751 = vmatpush3.msra.mxu1 %v1875_v36 }
 0x788   :  { %6112 = vmatprep.subr.bf16.mxu1 %v6111_v21 }
 0x79d   :  { %v1871_v37 = vpop.xlane.xlu0 %1870 }
 0x79e   :  { %6349 = vrcp.f32 %v1871_v37 }
 0x7a8   :  { %v6350_v40 = vpop.eup %6349 }
 0x7a9   :  { %v1873_v41 = vmul.f32 %v6350_v40, %v6342_v8 }
 0x7ab   :  { %5753 = vmatmul.mubr.msk.f32.vlgmr.msra.gmra.mrb[16].mxu1 %vm669_vm14, %v1873_v41 }
 0x7ac   :  { %6114 = vmatpush3.bf16.msra.mxu1 %v6111_v21 }
 0x7ad   :  { %6116 = vmatprep.subr.bf16.mxu1 %v6115_v24 }
 0x7b0   :  { %6118 = vmatpush3.bf16.msra.mxu1 %v6115_v24 }
 0x7b3   :  { %v1268_v42 = vpop.permute.xlu0 %1267 }
 0x7b4   :  { %v1270_v43 = vsel %vm588_vm13, %v1095_v6, %v1268_v42 }
 0x7b5   :  { %5764 = vmatmul.mubr.msk.f32.vlgmr.msra.gmra.mrb[22].mxu0 %vm399_vm11, %v1270_v43 }
 0x813   :  { %v1437_v44 = vpop.f32.mrb[10].mxu1 }
 0x814   :  { %v5724_v45 = vpop.f32.mrb[11].mxu1 }
 0x817   :  { %v1604_v47 = vpop.f32.mrb[12].mxu1 }
 0x818   :  { %1609 = vrot.lane.b32.xlu0 %v1604_v47, %s6528_s25  ;;  %v5734_v48 = vpop.f32.mrb[13].mxu1 }
 0x81b   :  { %v1779_v49 = vpop.f32.mrb[14].mxu1 }
 0x81c   :  { %v5744_v52 = vpop.f32.mrb[15].mxu1 }
 0x81d   :  { %v2271_v52 = vld [vmem:[%s7471_s3 + $0x10] sm:$0xff] }
 0x87e   :  { %v1946_v53 = vpop.f32.mrb[16].mxu1 }
 0x87f   :  { %1951 = vrot.lane.b32.xlu1 %v1946_v53, %s6528_s25  ;;  %v5754_v54 = vpop.f32.mrb[17].mxu1 }
 0x880   :  { %v2272_v54 = vld [vmem:[%s7471_s3 + $0x18] sm:$0xff] }
 0x888   :  { %v5765_v56 = vpop.f32.mrb[22].mxu0 }
 0x889   :  { %v2044_v57 = vpop.f32.mrb[23].mxu0  ;;  %v2050_v0 = vadd.f32 %v5765_v56, %v5309_v55  ;;  %v2273_v56 = vld [vmem:[%s7471_s3 + $0x20] sm:$0xff] }
 0x88a   :  { %v2045_v58 = vadd.f32 %v5309_v55, %v2044_v57  ;;  %v1610_v60 = vpop.permute.xlu0 %1609  ;;  %v2274_v57 = vld [vmem:[%s7471_s3 + $0x28] sm:$0xff] }
 0x88b   :  { %v1612_v62 = vsel %vm588_vm13, %v1437_v44, %v1610_v60  ;;  %v2064_v1 = vadd.f32 %v2050_v0, %v6757_v39  ;;  %v2275_v60 = vld [vmem:[%s7471_s3 + $0x30] sm:$0xff]  ;;  %v2278_v0 = vld [vmem:[%s7471_s3 + $0x48] sm:$0xff] }
 0x88c   :  { %5766 = vmatprep.mubr.msk.f32.mxu0 %vm399_vm11, %v1612_v62  ;;  %v2063_v63 = vadd.f32 %v2045_v58, %v6751_v33  ;;  %v6127_v58 = vpack.c.bf16 %v2274_v57, %v2273_v56  ;;  %v2276_v62 = vld [vmem:[%s7471_s3 + $0x38] sm:$0xff] }
 0x88d   :  { %v2072_v2 = vsel %vm399_vm11, %v2064_v1, 0.0 }
 0x88e   :  { %v2069_v61 = vsel %vm399_vm11, %v2063_v63, 0.0 }
 0x88f   :  { %2070 = vadd.xlane.f32.xlu0 %v2069_v61  ;;  %v2277_v61 = vld [vmem:[%s7471_s3 + $0x40] sm:$0xff] }
 0x8a3   :  { %2073 = vadd.xlane.f32.xlu1 %v2072_v2  ;;  %v2279_v2 = vld [vmem:[%s7471_s3 + $0x50] sm:$0xff] }
 0x8f1   :  { %v1952_v3 = vpop.permute.xlu1 %1951 }
 0x8f2   :  { %v1954_v4 = vsel %vm588_vm13, %v1779_v49, %v1952_v3  ;;  %v2280_v3 = vld [vmem:[%s7471_s3 + $0x58] sm:$0xff] }
 0x8f3   :  { %5767 = vmatmul.mubr.msk.f32.gmra.mrb[24].mxu0 %vm399_vm11, %v1954_v4  ;;  %v6139_v4 = vpack.c.bf16 %v2280_v3, %v2279_v2 }
 0x91c   :  { %v2071_v8 = vpop.xlane.xlu0 %2070 }
 0x91d   :  { %v2081_v11 = vmul.f32 0.03125, %v2071_v8  ;;  %v2281_v8 = vld [vmem:[%s7471_s3 + $0x60] sm:$0xff] }
 0x91f   :  { %v2085_v33 = vsub.f32 %v2063_v63, %v2081_v11  ;;  %v6131_v63 = vpack.c.bf16 %v2276_v62, %v2275_v60  ;;  %v2282_v11 = vld [vmem:[%s7471_s3 + $0x68] sm:$0xff]  ;;  %v7018_v60 = vld [vmem:[%s7473_s7] ss:$0 sm:$0xff] }
 0x921   :  { %v2089_v50 = vmul.f32 %v2085_v33, %v2085_v33 }
 0x923   :  { %v2093_v12 = vsel %vm399_vm11, %v2089_v50, 0.0  ;;  %v2283_v50 = vld [vmem:[%s7471_s3 + $0x70] sm:$0xff] }
 0x924   :  { %2094 = vadd.xlane.f32.xlu0 %v2093_v12  ;;  %v2284_v12 = vld [vmem:[%s7471_s3 + $0x78] sm:$0xff] }
 0x930   :  { %v2074_v39 = vpop.xlane.xlu1 %2073 }
 0x931   :  { %v2082_v13 = vmul.f32 0.03125, %v2074_v39  ;;  %v6147_v39 = vpack.c.bf16 %v2284_v12, %v2283_v50 }
 0x933   :  { %v2086_v16 = vsub.f32 %v2064_v1, %v2082_v13  ;;  %v6135_v1 = vpack.c.bf16 %v2278_v0, %v2277_v61 }
 0x935   :  { %v2090_v17 = vmul.f32 %v2086_v16, %v2086_v16 }
 0x937   :  { %v2096_v18 = vsel %vm399_vm11, %v2090_v17, 0.0 }
 0x938   :  { %2097 = vadd.xlane.f32.xlu0 %v2096_v18 }
 0x9b1   :  { %v2095_v25 = vpop.xlane.xlu0 %2094 }
 0x9b2   :  { %v2105_v6 = vmul.f32 0.03125, %v2095_v25  ;;  %v5316_v25 = vld [vmem:[%s7472_s8] ss:$0 sm:$0xff] }
 0x9b4   :  { %v2109_v59 = vadd.f32 1e-12, %v2105_v6 }
 0x9b6   :  { %6351 = vrsqrt.f32 %v2109_v59 }
 0x9c0   :  { %v6352_v26 = vpop.eup %6351 }
 0x9c1   :  { %v2117_v7 = vmul.f32 %v6352_v26, %v2085_v33  ;;  %v6143_v33 = vpack.c.bf16 %v2282_v11, %v2281_v8 }
 0x9c3   :  { %v2127_v29 = vmul.f32 %v6964_v27, %v2117_v7 }
 0x9c5   :  { %v2098_v30 = vpop.xlane.xlu0 %2097  ;;  %v6971_v31 = vadd.f32 %v6967_v28, %v2127_v29 }
 0x9c6   :  { %v2106_v32 = vmul.f32 0.03125, %v2098_v30  ;;  %v5768_v34 = vpop.f32.mrb[24].mxu0 }
 0x9c7   :  { %v2060_v35 = vadd.f32 %v5768_v34, %v5309_v55  ;;  %v2054_v36 = vpop.f32.mrb[25].mxu0  ;;  %5777 = vmatprep.mubr.msk.f32.mxu1 %vm399_vm11, %v6971_v31 }
 0x9c8   :  { %v2110_v37 = vadd.f32 1e-12, %v2106_v32  ;;  %v2055_v40 = vadd.f32 %v5309_v55, %v2054_v36  ;;  %v6123_v55 = vpack.c.bf16 %v2272_v54, %v2271_v52 }
 0x9c9   :  { %v2066_v41 = vadd.f32 %v2060_v35, %v6763_v46  ;;  %v2270_v46 = vld [vmem:[%s7471_s3 + $0x8] sm:$0xff] }
 0x9ca   :  { %6353 = vrsqrt.f32 %v2110_v37  ;;  %v2065_v42 = vadd.f32 %v2055_v40, %v6755_v38  ;;  %v2269_v38 = vld [vmem:[%s7471_s3] sm:$0xff] }
 0x9cb   :  { %v2078_v43 = vsel %vm399_vm11, %v2066_v41, 0.0  ;;  %v6119_v53 = vpack.c.bf16 %v2270_v46, %v2269_v38 }
 0x9cc   :  { %2079 = vadd.xlane.f32.xlu0 %v2078_v43  ;;  %v2075_v44 = vsel %vm399_vm11, %v2065_v42, 0.0 }
 0x9cd   :  { %2076 = vadd.xlane.f32.xlu1 %v2075_v44  ;;  %6120 = vmatprep.subr.bf16.mxu0 %v6119_v53 }
 0x9ce   :  { %6122 = vmatpush3.bf16.msra.mxu0 %v6119_v53 }
 0x9cf   :  { %6124 = vmatprep.subr.bf16.mxu0 %v6123_v55 }
 0x9d2   :  { %6126 = vmatpush3.bf16.msra.mxu0 %v6123_v55 }
 0x9d3   :  { %6128 = vmatprep.subr.bf16.mxu0 %v6127_v58 }
 0x9d4   :  { %v6354_v45 = vpop.eup %6353 }
 0x9d5   :  { %v2118_v47 = vmul.f32 %v6354_v45, %v2086_v16 }
 0x9d6   :  { %6130 = vmatpush3.bf16.msra.mxu0 %v6127_v58 }
 0x9d7   :  { %v2128_v48 = vmul.f32 %v6964_v27, %v2118_v47  ;;  %6132 = vmatprep.subr.bf16.mxu0 %v6131_v63 }
 0x9d9   :  { %v6981_v49 = vadd.f32 %v6967_v28, %v2128_v48 }
 0x9da   :  { %6134 = vmatpush3.bf16.msra.mxu0 %v6131_v63 }
 0x9db   :  { %5778 = vmatmul.mubr.msk.f32.vlgmr.msra.gmra.mrb[18].mxu1 %vm399_vm11, %v6981_v49  ;;  %6136 = vmatprep.subr.bf16.mxu0 %v6135_v1 }
 0x9de   :  { %6138 = vmatpush3.bf16.msra.mxu0 %v6135_v1 }
 0x9df   :  { %6140 = vmatprep.subr.bf16.mxu0 %v6139_v4 }
 0x9e2   :  { %6142 = vmatpush3.bf16.msra.mxu0 %v6139_v4 }
 0x9e3   :  { %6144 = vmatprep.subr.bf16.mxu0 %v6143_v33 }
 0x9e6   :  { %6146 = vmatpush3.bf16.msra.mxu0 %v6143_v33 }
 0x9e7   :  { %6148 = vmatprep.subr.bf16.mxu0 %v6147_v39 }
 0x9ea   :  { %6150 = vmatpush3.bf16.msra.mxu0 %v6147_v39 }
 0x9eb   :  { %5865 = vmatprep.subr.mxu0 %v6521_v5 }
 0xa59   :  { %v2080_v13 = vpop.xlane.xlu0 %2079 }
 0xa5a   :  { %v2084_v16 = vmul.f32 0.03125, %v2080_v13  ;;  %v2077_v17 = vpop.xlane.xlu1 %2076 }
 0xa5b   :  { %v2083_v18 = vmul.f32 0.03125, %v2077_v17 }
 0xa5c   :  { %v2088_v19 = vsub.f32 %v2066_v41, %v2084_v16 }
 0xa5d   :  { %v2087_v20 = vsub.f32 %v2065_v42, %v2083_v18 }
 0xa5e   :  { %v2092_v21 = vmul.f32 %v2088_v19, %v2088_v19 }
 0xa5f   :  { %v2091_v23 = vmul.f32 %v2087_v20, %v2087_v20 }
 0xa60   :  { %v2102_v51 = vsel %vm399_vm11, %v2092_v21, 0.0 }
 0xa61   :  { %2103 = vadd.xlane.f32.xlu0 %v2102_v51  ;;  %v2099_v24 = vsel %vm399_vm11, %v2091_v23, 0.0 }
 0xa62   :  { %2100 = vadd.xlane.f32.xlu1 %v2099_v24 }
 0xaae   :  { %v5779_v6 = vpop.f32.mrb[18].mxu1 }
 0xaaf   :  { %v2236_v59 = vadd.f32 %v5779_v6, %v5316_v25  ;;  %v2230_v26 = vpop.f32.mrb[19].mxu1 }
 0xab0   :  { %v2231_v7 = vadd.f32 %v5316_v25, %v2230_v26 }
 0xab1   :  { %v2254_v29 = vmul.f32 0.70710677, %v2236_v59  ;;  %v2250_v40 = vmul.f32 0.5, %v2236_v59 }
 0xab2   :  { %v2253_v30 = vmul.f32 0.70710677, %v2231_v7  ;;  %v2249_v36 = vmul.f32 0.5, %v2231_v7  ;;  %v5324_v7 = vld [vmem:[%s6585_s14 + $0x20] sm:$0xff] }
 0xab3   :  { %6355 = verf.f32 %v2254_v29  ;;  %v5325_v29 = vld [vmem:[%s6585_s14 + $0x28] sm:$0xff] }
 0xab4   :  { %6357 = verf.f32 %v2253_v30  ;;  %v6151_v30 = vpack.c.bf16 %v5325_v29, %v5324_v7 }
 0xab6   :  { %6152 = vmatprep.subr.bf16.mxu1 %v6151_v30 }
 0xab7   :  { %6154 = vmatpush3.bf16.msra.mxu1 %v6151_v30 }
 0xabd   :  { %v6356_v32 = vpop.eup %6355 }
 0xabe   :  { %v6358_v34 = vpop.eup %6357  ;;  %v2262_v35 = vadd.f32 1.0, %v6356_v32  ;;  %v5326_v32 = vld [vmem:[%s6585_s14 + $0x30] sm:$0xff] }
 0xabf   :  { %v2261_v37 = vadd.f32 1.0, %v6358_v34  ;;  %v5327_v34 = vld [vmem:[%s6585_s14 + $0x38] sm:$0xff]  ;;  %s7476_s14 = sld [smem:[#allocation5_spill]] }
 0xac0   :  { %v2266_v42 = vmul.f32 %v2262_v35, %v2250_v40  ;;  %v6155_v35 = vpack.c.bf16 %v5327_v34, %v5326_v32 }
 0xac1   :  { %v2265_v41 = vmul.f32 %v2261_v37, %v2249_v36 }
 0xac2   :  { %6156 = vmatprep.subr.bf16.mxu1 %v6155_v35 }
 0xac3   :  { %5815 = vmatprep.mubr.f32.mxu0 %v2265_v41  ;;  %6158 = vmatpush3.bf16.msra.mxu1 %v6155_v35 }
 0xac4   :  { %5816 = vmatmul.mubr.f32.vlgmr.msra.gmra.mrb[26].mxu0 %v2266_v42  ;;  %5835 = vmatprep.subr.mxu1 %v6521_v5 }
 0xaee   :  { %v2104_v43 = vpop.xlane.xlu0 %2103 }
 0xaef   :  { %v2108_v44 = vmul.f32 0.03125, %v2104_v43  ;;  %v2101_v45 = vpop.xlane.xlu1 %2100 }
 0xaf0   :  { %v2107_v47 = vmul.f32 0.03125, %v2101_v45 }
 0xaf1   :  { %v2112_v48 = vadd.f32 1e-12, %v2108_v44 }
 0xaf2   :  { %v2111_v38 = vadd.f32 1e-12, %v2107_v47 }
 0xaf3   :  { %6359 = vrsqrt.f32 %v2112_v48 }
 0xaf4   :  { %6361 = vrsqrt.f32 %v2111_v38 }
 0xafd   :  { %v6360_v46 = vpop.eup %6359 }
 0xafe   :  { %v6362_v52 = vpop.eup %6361  ;;  %v2120_v53 = vmul.f32 %v6360_v46, %v2088_v19 }
 0xaff   :  { %v2119_v54 = vmul.f32 %v6362_v52, %v2087_v20 }
 0xb00   :  { %v2130_v55 = vmul.f32 %v6964_v27, %v2120_v53 }
 0xb01   :  { %v2129_v56 = vmul.f32 %v6964_v27, %v2119_v54 }
 0xb02   :  { %v7011_v58 = vadd.f32 %v6967_v28, %v2130_v55  ;;  %v5322_v55 = vld [vmem:[%s7474_s10] ss:$0 sm:$0xff] }
 0xb03   :  { %v7008_v57 = vadd.f32 %v6967_v28, %v2129_v56 }
 0xb05   :  { %5780 = vmatprep.mubr.msk.f32.mxu1 %vm399_vm11, %v7008_v57 }
 0xb06   :  { %5781 = vmatmul.mubr.msk.f32.gmra.mrb[20].mxu1 %vm399_vm11, %v7011_v58 }
 0xb97   :  { %v5817_v62 = vpop.f32.mrb[26].mxu0 }
 0xb98   :  { %v2364_v63 = vadd.f32 %v5817_v62, %v7018_v60  ;;  %v2358_v61 = vpop.f32.mrb[27].mxu0 }
 0xb99   :  { %v2359_v27 = vadd.f32 %v7018_v60, %v2358_v61  ;;  %v5323_v61 = vld [vmem:[%s7475_s11] ss:$0 sm:$0xff] }
 0xb9a   :  { %v2378_v0 = vadd.f32 %v2364_v63, %v6981_v49 }
 0xb9b   :  { %v2377_v1 = vadd.f32 %v2359_v27, %v6971_v31 }
 0xb9c   :  { %v2386_v28 = vsel %vm399_vm11, %v2378_v0, 0.0 }
 0xb9d   :  { %2387 = vadd.xlane.f32.xlu0 %v2386_v28  ;;  %v2383_v2 = vsel %vm399_vm11, %v2377_v1, 0.0 }
 0xb9e   :  { %2384 = vadd.xlane.f32.xlu1 %v2383_v2 }
 0xbd9   :  { %v5782_v3 = vpop.f32.mrb[20].mxu1 }
 0xbda   :  { %v2246_v4 = vadd.f32 %v5782_v3, %v5316_v25  ;;  %v2240_v8 = vpop.f32.mrb[21].mxu1 }
 0xbdb   :  { %v2241_v11 = vadd.f32 %v5316_v25, %v2240_v8 }
 0xbdc   :  { %v2256_v33 = vmul.f32 0.70710677, %v2246_v4  ;;  %v2252_v31 = vmul.f32 0.5, %v2246_v4 }
 0xbdd   :  { %v2255_v50 = vmul.f32 0.70710677, %v2241_v11  ;;  %v2251_v49 = vmul.f32 0.5, %v2241_v11 }
 0xbde   :  { %6363 = verf.f32 %v2256_v33 }
 0xbdf   :  { %6365 = verf.f32 %v2255_v50 }
 0xbe8   :  { %v6364_v12 = vpop.eup %6363 }
 0xbe9   :  { %v6366_v39 = vpop.eup %6365  ;;  %v2264_v13 = vadd.f32 1.0, %v6364_v12  ;;  %v7054_v12 = vld [vmem:[%s6590_s19 + $0x1] ss:$0 sm:$0xff]  ;;  %s7477_s19 = sld [smem:[#allocation12_spill]] }
 0xbea   :  { %v2263_v16 = vadd.f32 1.0, %v6366_v39 }
 0xbeb   :  { %v2268_v18 = vmul.f32 %v2264_v13, %v2252_v31 }
 0xbec   :  { %v2267_v17 = vmul.f32 %v2263_v16, %v2251_v49 }
 0xbee   :  { %5818 = vmatprep.mubr.f32.mxu0 %v2267_v17 }
 0xbef   :  { %5819 = vmatmul.mubr.f32.gmra.mrb[28].mxu0 %v2268_v18 }
 0xbf0   :  { %5867 = vmatprep.mubr.msk.f32.mxu0 %vm6522_vm12, %v6521_v5 }
 0xc2a   :  { %v2388_v19 = vpop.xlane.xlu0 %2387 }
 0xc2b   :  { %v2396_v20 = vmul.f32 0.03125, %v2388_v19  ;;  %v2385_v21 = vpop.xlane.xlu1 %2384 }
 0xc2c   :  { %v2395_v23 = vmul.f32 0.03125, %v2385_v21 }
 0xc2d   :  { %v2400_v51 = vsub.f32 %v2378_v0, %v2396_v20 }
 0xc2e   :  { %v2399_v24 = vsub.f32 %v2377_v1, %v2395_v23 }
 0xc2f   :  { %v2404_v25 = vmul.f32 %v2400_v51, %v2400_v51 }
 0xc30   :  { %v2403_v6 = vmul.f32 %v2399_v24, %v2399_v24 }
 0xc31   :  { %v2410_v59 = vsel %vm399_vm11, %v2404_v25, 0.0 }
 0xc32   :  { %2411 = vadd.xlane.f32.xlu0 %v2410_v59  ;;  %v2407_v26 = vsel %vm399_vm11, %v2403_v6, 0.0 }
 0xc33   :  { %2408 = vadd.xlane.f32.xlu1 %v2407_v26 }
 0xcbf   :  { %v2412_v36 = vpop.xlane.xlu0 %2411 }
 0xcc0   :  { %v2420_v37 = vmul.f32 0.03125, %v2412_v36  ;;  %v2409_v40 = vpop.xlane.xlu1 %2408 }
 0xcc1   :  { %v2419_v41 = vmul.f32 0.03125, %v2409_v40 }
 0xcc2   :  { %v2424_v42 = vadd.f32 1e-12, %v2420_v37  ;;  %v5820_v43 = vpop.f32.mrb[28].mxu0 }
 0xcc3   :  { %v2423_v44 = vadd.f32 1e-12, %v2419_v41  ;;  %v2374_v45 = vadd.f32 %v5820_v43, %v7018_v60  ;;  %v2368_v47 = vpop.f32.mrb[29].mxu0 }
 0xcc4   :  { %6367 = vrsqrt.f32 %v2424_v42  ;;  %v2369_v48 = vadd.f32 %v7018_v60, %v2368_v47 }
 0xcc5   :  { %6369 = vrsqrt.f32 %v2423_v44  ;;  %v2380_v38 = vadd.f32 %v2374_v45, %v7011_v58 }
 0xcc6   :  { %v2379_v46 = vadd.f32 %v2369_v48, %v7008_v57 }
 0xcc7   :  { %v2392_v52 = vsel %vm399_vm11, %v2380_v38, 0.0 }
 0xcc8   :  { %2393 = vadd.xlane.f32.xlu0 %v2392_v52  ;;  %v2389_v53 = vsel %vm399_vm11, %v2379_v46, 0.0 }
 0xcc9   :  { %2390 = vadd.xlane.f32.xlu1 %v2389_v53 }
 0xcce   :  { %v6368_v54 = vpop.eup %6367 }
 0xccf   :  { %v6370_v56 = vpop.eup %6369  ;;  %v2432_v62 = vmul.f32 %v6368_v54, %v2400_v51 }
 0xcd0   :  { %v2431_v63 = vmul.f32 %v6370_v56, %v2399_v24 }
 0xcd1   :  { %v2442_v27 = vmul.f32 %v5322_v55, %v2432_v62 }
 0xcd2   :  { %v2441_v0 = vmul.f32 %v5322_v55, %v2431_v63 }
 0xcd3   :  { %v7045_v58 = vadd.f32 %v5323_v61, %v2442_v27 }
 0xcd4   :  { %v7043_v60 = vadd.f32 %v5323_v61, %v2441_v0 }
 0xcd6   :  { %5829 = vmatprep.mubr.msk.f32.mxu1 %vm399_vm11, %v7043_v60 }
 0xcd7   :  { %5830 = vmatmul.mubr.msk.f32.vlgmr.msra.gmra.mrb[22].mxu1 %vm399_vm11, %v7045_v58 }
 0xd55   :  { %v2394_v57 = vpop.xlane.xlu0 %2393 }
 0xd56   :  { %v2398_v1 = vmul.f32 0.03125, %v2394_v57  ;;  %v2391_v28 = vpop.xlane.xlu1 %2390 }
 0xd57   :  { %v2397_v2 = vmul.f32 0.03125, %v2391_v28 }
 0xd58   :  { %v2402_v3 = vsub.f32 %v2380_v38, %v2398_v1 }
 0xd59   :  { %v2401_v4 = vsub.f32 %v2379_v46, %v2397_v2 }
 0xd5a   :  { %v2406_v8 = vmul.f32 %v2402_v3, %v2402_v3 }
 0xd5b   :  { %v2405_v11 = vmul.f32 %v2401_v4, %v2401_v4 }
 0xd5c   :  { %v2416_v33 = vsel %vm399_vm11, %v2406_v8, 0.0 }
 0xd5d   :  { %2417 = vadd.xlane.f32.xlu0 %v2416_v33  ;;  %v2413_v50 = vsel %vm399_vm11, %v2405_v11, 0.0 }
 0xd5e   :  { %2414 = vadd.xlane.f32.xlu1 %v2413_v50 }
 0xdaa   :  { %v7056_v39 = vpop.f32.mrb[22].mxu1 }
 0xdab   :  { %v2546_v13 = vpop.f32.mrb[23].mxu1  ;;  %v7105_v27 = vadd.f32 %v7056_v39, %v7054_v12 }
 0xdac   :  { %v7059_v49 = vadd.f32 %v7054_v12, %v2546_v13 }
 0xdae   :  { %2566 = vrot.lane.b32.xlu1 %v7059_v49, %s6523_s0 }
 0xdb2   :  { %2733 = vrot.lane.b32.xlu1 %v7059_v49, %s6524_s5 }
 0xdb6   :  { %2731 = vrot.lane.b32.xlu1 %v7059_v49, %s6525_s9 }
 0xdea   :  { %v2418_v16 = vpop.xlane.xlu0 %2417 }
 0xdeb   :  { %v2422_v31 = vmul.f32 0.03125, %v2418_v16  ;;  %v2415_v17 = vpop.xlane.xlu1 %2414 }
 0xdec   :  { %v2421_v18 = vmul.f32 0.03125, %v2415_v17 }
 0xded   :  { %v2426_v19 = vadd.f32 1e-12, %v2422_v31 }
 0xdee   :  { %v2425_v20 = vadd.f32 1e-12, %v2421_v18 }
 0xdef   :  { %6371 = vrsqrt.f32 %v2426_v19 }
 0xdf0   :  { %6373 = vrsqrt.f32 %v2425_v20 }
 0xdf9   :  { %v6372_v21 = vpop.eup %6371 }
 0xdfa   :  { %v6374_v23 = vpop.eup %6373  ;;  %v2434_v51 = vmul.f32 %v6372_v21, %v2402_v3 }
 0xdfb   :  { %v2433_v24 = vmul.f32 %v6374_v23, %v2401_v4 }
 0xdfc   :  { %v2444_v25 = vmul.f32 %v5322_v55, %v2434_v51 }
 0xdfd   :  { %v2443_v6 = vmul.f32 %v5322_v55, %v2433_v24 }
 0xdfe   :  { %v7069_v26 = vadd.f32 %v5323_v61, %v2444_v25 }
 0xdff   :  { %v7067_v59 = vadd.f32 %v5323_v61, %v2443_v6 }
 0xe01   :  { %5832 = vmatprep.mubr.msk.f32.mxu1 %vm399_vm11, %v7067_v59 }
 0xe02   :  { %5833 = vmatmul.mubr.msk.f32.gmra.mrb[24].mxu1 %vm399_vm11, %v7069_v26 }
 0xe03   :  { %5837 = vmatprep.mubr.msk.f32.mxu1 %vm6522_vm12, %v6521_v5 }
 0xe20   :  { %v2567_v7 = vpop.permute.xlu1 %2566 }
 0xe21   :  { %5836 = vmatpush3.xpose.msk.msra.mxu1 %vm588_vm13, %v2567_v7 }
 0xe22   :  { %5840 = vmatprep.subr.mxu1 %v6521_v5 }
 0xe24   :  { %5838 = vmatmul.mubr.msk.f32.vlgmr.msra.gmra.mrb[26].mxu1 %vm588_vm13, %v7059_v49  ;;  %v2734_v38 = vpop.permute.xlu1 %2733 }
 0xe25   :  { %5842 = vmatprep.mubr.msk.f32.mxu1 %vm6522_vm12, %v6521_v5 }
 0xe28   :  { %v2732_v52 = vpop.permute.xlu1 %2731 }
 0xed5   :  { %v5834_v29 = vpop.f32.mrb[24].mxu1 }
 0xed6   :  { %v2556_v30 = vpop.f32.mrb[25].mxu1 }
 0xed7   :  { %v7112_v0 = vadd.f32 %v7054_v12, %v2556_v30 }
 0xef7   :  { %v2638_v32 = vpop.f32.mrb[26].mxu1 }
 0xef8   :  { %v2642_v34 = vmul.f32 0.25, %v2638_v32  ;;  %v5839_v35 = vpop.f32.mrb[27].mxu1 }
 0xefa   :  { %v2643_v36 = vadd.f32 %v2642_v34, %v6847_v9 }
 0xefc   :  { %v2644_v37 = vsel %vm669_vm14, %v2643_v36, -inf }
 0xefd   :  { %2645 = vmax.xlane.f32.xlu0 %v2644_v37 }
 0xf8a   :  { %v2646_v40 = vpop.xlane.xlu0 %2645 }
 0xf8b   :  { %v2647_v41 = vsub.f32 %v2643_v36, %v2646_v40 }
 0xf8d   :  { %v2648_v42 = vmul.f32 1.442695, %v2647_v41 }
 0xf8f   :  { %6375 = vpow2.f32 %v2648_v42 }
 0xf99   :  { %v6376_v43 = vpop.eup %6375 }
 0xf9a   :  { %v2650_v44 = vsel %vm669_vm14, %v6376_v43, 0.0 }
 0xf9b   :  { %2651 = vadd.xlane.f32.xlu0 %v2650_v44 }
 0xfb1   :  { %2655 = vrot.lane.b32.xlu0 %v7059_v49, %s6526_s13 }
0x1028   :  { %v2652_v45 = vpop.xlane.xlu0 %2651 }
0x1029   :  { %6377 = vrcp.f32 %v2652_v45 }
0x102c   :  { %v2656_v47 = vpop.permute.xlu0 %2655 }
0x102d   :  { %5841 = vmatpush3.msra.mxu1 %v2656_v47 }
0x102e   :  { %5845 = vmatprep.subr.mxu1 %v6521_v5 }
0x1033   :  { %v6378_v48 = vpop.eup %6377 }
0x1034   :  { %v2654_v46 = vmul.f32 %v6378_v48, %v6376_v43 }
0x1036   :  { %5843 = vmatmul.mubr.msk.f32.vlgmr.msra.gmra.mrb[28].mxu1 %vm669_vm14, %v2654_v46 }
0x1037   :  { %5846 = vmatpush3.xpose.msk.msra.mxu1 %vm588_vm13, %v2734_v38  ;;  %5847 = vmatprep.mubr.msk.f32.mxu1 %vm6522_vm12, %v6521_v5 }
0x1038   :  { %5850 = vmatprep.subr.mxu1 %v6521_v5 }
0x103a   :  { %5848 = vmatmul.mubr.msk.f32.vlgmr.msra.gmra.mrb[30].mxu1 %vm588_vm13, %v2732_v52 }
0x103b   :  { %5852 = vmatprep.mubr.msk.f32.mxu1 %vm6522_vm12, %v6521_v5 }
0x1109   :  { %v7097_v53 = vpop.f32.mrb[28].mxu1 }
0x110a   :  { %v5844_v54 = vpop.f32.mrb[29].mxu1 }
0x110d   :  { %v2805_v55 = vpop.f32.mrb[30].mxu1 }
0x110e   :  { %v2809_v56 = vmul.f32 0.25, %v2805_v55  ;;  %v5849_v62 = vpop.f32.mrb[31].mxu1 }
0x1110   :  { %v2810_v63 = vadd.f32 %v2809_v56, %v6847_v9  ;;  %v7117_v9 = vadd.f32 %v5834_v29, %v7054_v12 }
0x1112   :  { %v2811_v61 = vsel %vm669_vm14, %v2810_v63, -inf }
0x1113   :  { %2812 = vmax.xlane.f32.xlu1 %v2811_v61 }
0x1124   :  { %2822 = vrot.lane.b32.xlu1 %v7059_v49, %s6527_s21 }
0x1128   :  { %3071 = vrot.lane.b32.xlu1 %v7105_v27, %s6524_s5 }
0x112c   :  { %3069 = vrot.lane.b32.xlu1 %v7105_v27, %s6525_s9 }
0x1130   :  { %3409 = vrot.lane.b32.xlu1 %v7112_v0, %s6524_s5 }
0x1134   :  { %3580 = vrot.lane.b32.xlu1 %v7117_v9, %s6523_s0 }
0x1138   :  { %3745 = vrot.lane.b32.xlu1 %v7117_v9, %s6525_s9 }
0x11a0   :  { %v2813_v57 = vpop.xlane.xlu1 %2812 }
0x11a1   :  { %v2814_v1 = vsub.f32 %v2810_v63, %v2813_v57 }
0x11a3   :  { %v2815_v28 = vmul.f32 1.442695, %v2814_v1 }
0x11a4   :  { %v2823_v2 = vpop.permute.xlu1 %2822 }
0x11a5   :  { %6379 = vpow2.f32 %v2815_v28  ;;  %5851 = vmatpush3.msra.mxu1 %v2823_v2 }
0x11a6   :  { %5855 = vmatprep.subr.mxu1 %v6521_v5 }
0x11a8   :  { %v3072_v3 = vpop.permute.xlu1 %3071 }
0x11a9   :  { %5866 = vmatpush3.xpose.msk.msra.mxu0 %vm588_vm13, %v3072_v3 }
0x11aa   :  { %5875 = vmatprep.subr.mxu0 %v6521_v5 }
0x11ac   :  { %v3070_v4 = vpop.permute.xlu1 %3069 }
0x11ad   :  { %5868 = vmatmul.mubr.msk.f32.vlgmr.msra.gmra.mrb[30].mxu0 %vm588_vm13, %v3070_v4 }
0x11ae   :  { %5877 = vmatprep.mubr.msk.f32.mxu0 %vm6522_vm12, %v6521_v5 }
0x11af   :  { %v6380_v8 = vpop.eup %6379 }
0x11b0   :  { %v2817_v11 = vsel %vm669_vm14, %v6380_v8, 0.0  ;;  %v3410_v39 = vpop.permute.xlu1 %3409 }
0x11b1   :  { %2818 = vadd.xlane.f32.xlu0 %v2817_v11 }
0x11b4   :  { %v3581_v31 = vpop.permute.xlu1 %3580 }
0x11b8   :  { %v3746_v18 = vpop.permute.xlu1 %3745 }
0x11c7   :  { %2904 = vrot.lane.b32.xlu0 %v7105_v27, %s6523_s0 }
0x11cb   :  { %3242 = vrot.lane.b32.xlu0 %v7112_v0, %s6523_s0 }
0x11cf   :  { %3407 = vrot.lane.b32.xlu0 %v7112_v0, %s6525_s9 }
0x11d3   :  { %3747 = vrot.lane.b32.xlu0 %v7117_v9, %s6524_s5 }
0x123e   :  { %v2819_v33 = vpop.xlane.xlu0 %2818 }
0x123f   :  { %6381 = vrcp.f32 %v2819_v33 }
0x1242   :  { %v2905_v50 = vpop.permute.xlu0 %2904 }
0x1246   :  { %v3243_v12 = vpop.permute.xlu0 %3242 }
0x1247   :  { %5876 = vmatpush3.xpose.msk.msra.mxu0 %vm588_vm13, %v3243_v12 }
0x1248   :  { %5885 = vmatprep.subr.mxu0 %v6521_v5 }
0x1249   :  { %v6382_v13 = vpop.eup %6381 }
0x124a   :  { %v2821_v49 = vmul.f32 %v6382_v13, %v6380_v8  ;;  %5878 = vmatmul.mubr.msk.f32.vlgmr.msra.gmra.mrb[32].mxu0 %vm588_vm13, %v7112_v0  ;;  %v3408_v16 = vpop.permute.xlu0 %3407 }
0x124b   :  { %5886 = vmatpush3.xpose.msk.msra.mxu0 %vm588_vm13, %v3410_v39  ;;  %5887 = vmatprep.mubr.msk.f32.mxu0 %vm6522_vm12, %v6521_v5 }
0x124c   :  { %5853 = vmatmul.mubr.msk.f32.vlgmr.msra.gmra.mrb[32].mxu1 %vm669_vm14, %v2821_v49  ;;  %5895 = vmatprep.subr.mxu0 %v6521_v5 }
0x124d   :  { %5856 = vmatpush3.xpose.msk.msra.mxu1 %vm588_vm13, %v2905_v50  ;;  %5857 = vmatprep.mubr.msk.f32.mxu1 %vm6522_vm12, %v6521_v5 }
0x124e   :  { %5888 = vmatmul.mubr.msk.f32.vlgmr.msra.gmra.mrb[34].mxu0 %vm588_vm13, %v3408_v16  ;;  %5860 = vmatprep.subr.mxu1 %v6521_v5  ;;  %v3748_v17 = vpop.permute.xlu0 %3747 }
0x124f   :  { %5896 = vmatpush3.xpose.msk.msra.mxu0 %vm588_vm13, %v3581_v31  ;;  %5897 = vmatprep.mubr.msk.f32.mxu0 %vm6522_vm12, %v6521_v5 }
0x1250   :  { %5858 = vmatmul.mubr.msk.f32.vlgmr.msra.gmra.mrb[34].mxu1 %vm588_vm13, %v7105_v27  ;;  %5905 = vmatprep.subr.mxu0 %v6521_v5 }
0x1251   :  { %5862 = vmatprep.mubr.msk.f32.mxu1 %vm6522_vm12, %v6521_v5 }
0x1252   :  { %5898 = vmatmul.mubr.msk.f32.vlgmr.msra.gmra.mrb[36].mxu0 %vm588_vm13, %v7117_v9 }
0x1253   :  { %5906 = vmatpush3.xpose.msk.msra.mxu0 %vm588_vm13, %v3748_v17  ;;  %5907 = vmatprep.mubr.msk.f32.mxu0 %vm6522_vm12, %v6521_v5 }
0x1256   :  { %5908 = vmatmul.mubr.msk.f32.vlgmr.msra.gmra.mrb[38].mxu0 %vm588_vm13, %v3746_v18 }
0x1280   :  { %v3143_v19 = vpop.f32.mrb[30].mxu0 }
0x1281   :  { %v3147_v20 = vmul.f32 0.25, %v3143_v19  ;;  %v5869_v21 = vpop.f32.mrb[31].mxu0 }
0x1283   :  { %v3148_v23 = vadd.f32 %v3147_v20, %v6855_v22 }
0x1285   :  { %v3149_v51 = vsel %vm669_vm14, %v3148_v23, -inf }
0x1286   :  { %3150 = vmax.xlane.f32.xlu1 %v3149_v51 }
0x1313   :  { %v3151_v7 = vpop.xlane.xlu1 %3150 }
0x1314   :  { %v3152_v34 = vsub.f32 %v3148_v23, %v3151_v7 }
0x1316   :  { %v3153_v45 = vmul.f32 1.442695, %v3152_v34 }
0x1318   :  { %6383 = vpow2.f32 %v3153_v45 }
0x131d   :  { %v3314_v24 = vpop.f32.mrb[32].mxu0 }
0x131e   :  { %v5879_v25 = vpop.f32.mrb[33].mxu0  ;;  %v3318_v36 = vmul.f32 0.25, %v3314_v24 }
0x131f   :  { %v7168_v6 = vpop.f32.mrb[32].mxu1 }
0x1320   :  { %v5854_v29 = vpop.f32.mrb[33].mxu1  ;;  %v3319_v46 = vadd.f32 %v3318_v36, %v6879_v10 }
0x1321   :  { %v3481_v30 = vpop.f32.mrb[34].mxu0 }
0x1322   :  { %v5889_v32 = vpop.f32.mrb[35].mxu0  ;;  %v3485_v47 = vmul.f32 0.25, %v3481_v30  ;;  %v3320_v62 = vsel %vm669_vm14, %v3319_v46, -inf  ;;  %v7180_v1 = vpop.eup %6383 }
0x1323   :  { %v2976_v35 = vpop.f32.mrb[34].mxu1  ;;  %v3155_v28 = vsel %vm669_vm14, %v7180_v1, 0.0 }
0x1324   :  { %v2980_v37 = vmul.f32 0.25, %v2976_v35  ;;  %v5859_v40 = vpop.f32.mrb[35].mxu1 }
0x1325   :  { %v3652_v41 = vpop.f32.mrb[36].mxu0 }
0x1326   :  { %v3656_v42 = vmul.f32 0.25, %v3652_v41  ;;  %v5899_v43 = vpop.f32.mrb[37].mxu0  ;;  %v2981_v44 = vadd.f32 %v2980_v37, %v6855_v22  ;;  %v3486_v22 = vadd.f32 %v3485_v47, %v6879_v10 }
0x1328   :  { %v2982_v48 = vsel %vm669_vm14, %v2981_v44, -inf  ;;  %v3657_v38 = vadd.f32 %v3656_v42, %v6893_v14  ;;  %v3487_v63 = vsel %vm669_vm14, %v3486_v22, -inf }
0x1329   :  { %2983 = vmax.xlane.f32.xlu0 %v2982_v48  ;;  %v3819_v52 = vpop.f32.mrb[38].mxu0 }
0x132a   :  { %v5909_v54 = vpop.f32.mrb[39].mxu0  ;;  %v3658_v55 = vsel %vm669_vm14, %v3657_v38, -inf  ;;  %v3823_v56 = vmul.f32 0.25, %v3819_v52 }
0x132b   :  { %3659 = vmax.xlane.f32.xlu1 %v3658_v55 }
0x132c   :  { %v3824_v61 = vadd.f32 %v3823_v56, %v6893_v14 }
0x132d   :  { %3321 = vmax.xlane.f32.xlu0 %v3320_v62  ;;  %v5358_v62 = vld [vmem:[%s6595_s24 + $0x20] sm:$0xff] }
0x132e   :  { %v3825_v57 = vsel %vm669_vm14, %v3824_v61, -inf }
0x1331   :  { %3488 = vmax.xlane.f32.xlu0 %v3487_v63  ;;  %v5360_v63 = vld [vmem:[%s6595_s24 + $0x30] sm:$0xff] }
0x1335   :  { %3826 = vmax.xlane.f32.xlu0 %v3825_v57  ;;  %v5361_v57 = vld [vmem:[%s6595_s24 + $0x38] sm:$0xff] }
0x1339   :  { %3156 = vadd.xlane.f32.xlu0 %v3155_v28 }
0x13b6   :  { %v2984_v2 = vpop.xlane.xlu0 %2983 }
0x13b7   :  { %v2985_v51 = vsub.f32 %v2981_v44, %v2984_v2 }
0x13b8   :  { %v3660_v3 = vpop.xlane.xlu1 %3659 }
0x13b9   :  { %v3661_v4 = vsub.f32 %v3657_v38, %v3660_v3  ;;  %v2986_v24 = vmul.f32 1.442695, %v2985_v51 }
0x13ba   :  { %v3322_v8 = vpop.xlane.xlu0 %3321 }
0x13bb   :  { %v3323_v10 = vsub.f32 %v3319_v46, %v3322_v8  ;;  %v3662_v11 = vmul.f32 1.442695, %v3661_v4 }
0x13bd   :  { %v3324_v33 = vmul.f32 1.442695, %v3323_v10 }
0x13be   :  { %v3489_v50 = vpop.xlane.xlu0 %3488 }
0x13bf   :  { %6385 = vpow2.f32 %v3324_v33  ;;  %v3490_v14 = vsub.f32 %v3486_v22, %v3489_v50  ;;  %v5359_v22 = vld [vmem:[%s6595_s24 + $0x28] sm:$0xff]  ;;  %s7478_s24 = sld [smem:[#allocation13_spill]] }
0x13c0   :  { %6387 = vpow2.f32 %v3662_v11 }
0x13c1   :  { %v3491_v12 = vmul.f32 1.442695, %v3490_v14 }
0x13c2   :  { %v3827_v39 = vpop.xlane.xlu0 %3826 }
0x13c3   :  { %6389 = vpow2.f32 %v3491_v12  ;;  %v3828_v13 = vsub.f32 %v3824_v61, %v3827_v39  ;;  %v6159_v61 = vpack.c.bf16 %v5359_v22, %v5358_v62  ;;  %v5373_v62 = vld [vmem:[%s6615_s20 + $0x28] sm:$0xff] }
0x13c5   :  { %v3829_v49 = vmul.f32 1.442695, %v3828_v13  ;;  %6160 = vmatprep.subr.bf16.mxu0 %v6159_v61 }
0x13c6   :  { %6162 = vmatpush3.bf16.msra.mxu0 %v6159_v61  ;;  %v5374_v61 = vld [vmem:[%s6615_s20 + $0x30] sm:$0xff] }
0x13c7   :  { %6391 = vpow2.f32 %v3829_v49 }
0x13c8   :  { %6393 = vpow2.f32 %v2986_v24 }
0x13c9   :  { %v6386_v16 = vpop.eup %6385 }
0x13ca   :  { %v3326_v31 = vsel %vm669_vm14, %v6386_v16, 0.0  ;;  %v7185_v17 = vpop.eup %6387 }
0x13cb   :  { %3327 = vadd.xlane.f32.xlu1 %v3326_v31  ;;  %v3664_v19 = vsel %vm669_vm14, %v7185_v17, 0.0 }
0x13cd   :  { %v6390_v18 = vpop.eup %6389 }
0x13ce   :  { %v3493_v20 = vsel %vm669_vm14, %v6390_v18, 0.0 }
0x13cf   :  { %3665 = vadd.xlane.f32.xlu1 %v3664_v19  ;;  %3494 = vadd.xlane.f32.xlu0 %v3493_v20  ;;  %v5363_v19 = vld [vmem:[%s6600_s30 + $0x1] ss:$0 sm:$0xff]  ;;  %s7479_s30 = sld [smem:[#allocation14_spill]] }
0x13d1   :  { %v7190_v21 = vpop.eup %6391 }
0x13d2   :  { %v3831_v23 = vsel %vm669_vm14, %v7190_v21, 0.0  ;;  %v6394_v25 = vpop.eup %6393 }
0x13d3   :  { %3832 = vadd.xlane.f32.xlu0 %v3831_v23  ;;  %v2988_v7 = vsel %vm669_vm14, %v6394_v25, 0.0 }
0x13e0   :  { %2993 = vrot.lane.b32.xlu1 %v7105_v27, %s6526_s13 }
0x13e9   :  { %3160 = vrot.lane.b32.xlu0 %v7105_v27, %s6527_s21  ;;  %v3157_v27 = vpop.xlane.xlu0 %3156 }
0x13ed   :  { %3669 = vrot.lane.b32.xlu0 %v7117_v9, %s6526_s13 }
0x13f1   :  { %2899 = vrot.lane.b32.xlu0 %v7168_v6, %s6528_s25 }
0x1404   :  { %2989 = vadd.xlane.f32.xlu1 %v2988_v7 }
0x1415   :  { %3331 = vrot.lane.b32.xlu1 %v7112_v0, %s6526_s13 }
0x1419   :  { %3498 = vrot.lane.b32.xlu1 %v7112_v0, %s6527_s21 }
0x141d   :  { %3836 = vrot.lane.b32.xlu1 %v7117_v9, %s6527_s21 }
0x1458   :  { %v3328_v29 = vpop.xlane.xlu1 %3327 }
0x145c   :  { %v3666_v30 = vpop.xlane.xlu1 %3665  ;;  %v3495_v32 = vpop.xlane.xlu0 %3494 }
0x1460   :  { %v2994_v6 = vpop.permute.xlu1 %2993  ;;  %v3833_v34 = vpop.xlane.xlu0 %3832 }
0x1461   :  { %5861 = vmatpush3.msra.mxu1 %v2994_v6 }
0x1462   :  { %5870 = vmatprep.subr.mxu1 %v6521_v5 }
0x1464   :  { %v3161_v35 = vpop.permute.xlu0 %3160 }
0x1468   :  { %v3670_v36 = vpop.permute.xlu0 %3669 }
0x146c   :  { %v2900_v37 = vpop.permute.xlu0 %2899 }
0x146d   :  { %v2902_v40 = vsel %vm588_vm13, %v7097_v53, %v2900_v37 }
0x146e   :  { %5923 = vmatprep.mubr.msk.f32.mxu0 %vm399_vm11, %v2902_v40 }
0x1491   :  { %v2990_v0 = vpop.xlane.xlu1 %2989 }
0x1492   :  { %6395 = vrcp.f32 %v2990_v0 }
0x1493   :  { %6397 = vrcp.f32 %v3157_v27 }
0x1494   :  { %6399 = vrcp.f32 %v3328_v29 }
0x1495   :  { %6401 = vrcp.f32 %v3495_v32  ;;  %v3332_v53 = vpop.permute.xlu1 %3331 }
0x1496   :  { %6403 = vrcp.f32 %v3666_v30 }
0x1497   :  { %6405 = vrcp.f32 %v3833_v34 }
0x1499   :  { %v3499_v48 = vpop.permute.xlu1 %3498 }
0x149c   :  { %v6396_v9 = vpop.eup %6395 }
0x149d   :  { %v2992_v41 = vmul.f32 %v6396_v9, %v6394_v25  ;;  %v6398_v42 = vpop.eup %6397  ;;  %v3837_v55 = vpop.permute.xlu1 %3836 }
0x149e   :  { %v3159_v43 = vmul.f32 %v6398_v42, %v7180_v1  ;;  %v6400_v44 = vpop.eup %6399  ;;  %v6163_v1 = vpack.c.bf16 %v5361_v57, %v5360_v63  ;;  %v4441_v63 = vld [vmem:[%s7476_s14] sm:$0xf]  ;;  %v5375_v57 = vld [vmem:[%s6615_s20 + $0x38] sm:$0xff] }
0x149f   :  { %5863 = vmatmul.mubr.msk.f32.vlgmr.msra.gmra.mrb[36].mxu1 %vm669_vm14, %v2992_v41  ;;  %v3330_v45 = vmul.f32 %v6400_v44, %v6386_v16  ;;  %v6402_v47 = vpop.eup %6401 }
0x14a0   :  { %5871 = vmatpush3.msra.mxu1 %v3161_v35  ;;  %5872 = vmatprep.mubr.msk.f32.mxu1 %vm6522_vm12, %v6521_v5  ;;  %v3497_v38 = vmul.f32 %v6402_v47, %v6390_v18  ;;  %v6404_v46 = vpop.eup %6403 }
0x14a1   :  { %5880 = vmatprep.subr.mxu1 %v6521_v5  ;;  %v3668_v52 = vmul.f32 %v6404_v46, %v7185_v17  ;;  %v6406_v54 = vpop.eup %6405  ;;  %6164 = vmatprep.subr.bf16.mxu0 %v6163_v1 }
0x14a2   :  { %v3835_v56 = vmul.f32 %v6406_v54, %v7190_v21  ;;  %6166 = vmatpush3.bf16.msra.mxu0 %v6163_v1  ;;  %v6171_v1 = vpack.c.bf16 %v5375_v57, %v5374_v61  ;;  %v5377_v61 = vld [vmem:[%s7472_s8 + $0x1] ss:$0 sm:$0xff] }
0x14a3   :  { %5873 = vmatmul.mubr.msk.f32.vlgmr.msra.gmra.mrb[38].mxu1 %vm669_vm14, %v3159_v43 }
0x14a4   :  { %5881 = vmatpush3.msra.mxu1 %v3332_v53  ;;  %5882 = vmatprep.mubr.msk.f32.mxu1 %vm6522_vm12, %v6521_v5 }
0x14a5   :  { %5890 = vmatprep.subr.mxu1 %v6521_v5 }
0x14a7   :  { %5883 = vmatmul.mubr.msk.f32.vlgmr.msra.gmra.mrb[40].mxu1 %vm669_vm14, %v3330_v45 }
0x14a8   :  { %5891 = vmatpush3.msra.mxu1 %v3499_v48  ;;  %5892 = vmatprep.mubr.msk.f32.mxu1 %vm6522_vm12, %v6521_v5 }
0x14a9   :  { %5900 = vmatprep.subr.mxu1 %v6521_v5 }
0x14ab   :  { %5893 = vmatmul.mubr.msk.f32.vlgmr.msra.gmra.mrb[42].mxu1 %vm669_vm14, %v3497_v38 }
0x14ac   :  { %5901 = vmatpush3.msra.mxu1 %v3670_v36  ;;  %5902 = vmatprep.mubr.msk.f32.mxu1 %vm6522_vm12, %v6521_v5 }
0x14ad   :  { %5910 = vmatprep.subr.mxu1 %v6521_v5 }
0x14af   :  { %5903 = vmatmul.mubr.msk.f32.vlgmr.msra.gmra.mrb[44].mxu1 %vm669_vm14, %v3668_v52 }
0x14b0   :  { %5911 = vmatpush3.msra.mxu1 %v3837_v55  ;;  %5912 = vmatprep.mubr.msk.f32.mxu1 %vm6522_vm12, %v6521_v5 }
0x14b3   :  { %5913 = vmatmul.mubr.msk.f32.vlgmr.msra.gmra.mrb[46].mxu1 %vm669_vm14, %v3835_v56  ;;  %v5372_v56 = vld [vmem:[%s6615_s20 + $0x20] sm:$0xff]  ;;  %s6530_s20 = smov 32  }
0x14b4   :  { %v6167_v22 = vpack.c.bf16 %v5373_v62, %v5372_v56  ;;  %v5396_v62 = vld [vmem:[%s7471_s3 + $0xf0] sm:$0xff] }
0x14b6   :  { %6168 = vmatprep.subr.bf16.mxu1 %v6167_v22 }
0x14b7   :  { %6170 = vmatpush3.bf16.msra.mxu1 %v6167_v22  ;;  %v5397_v22 = vld [vmem:[%s7471_s3 + $0xf8] sm:$0xff] }
0x14b8   :  { %6172 = vmatprep.subr.bf16.mxu1 %v6171_v1 }
0x14bb   :  { %6174 = vmatpush3.bf16.msra.mxu1 %v6171_v1 }
0x1572   :  { %v3065_v28 = vpop.f32.mrb[36].mxu1 }
0x1573   :  { %v5864_v2 = vpop.f32.mrb[37].mxu1 }
0x1574   :  { %v5382_v2 = vld [vmem:[%s7471_s3 + $0x80] sm:$0xff] }
0x1576   :  { %v3232_v3 = vpop.f32.mrb[38].mxu1 }
0x1577   :  { %3237 = vrot.lane.b32.xlu1 %v3232_v3, %s6528_s25  ;;  %v5874_v4 = vpop.f32.mrb[39].mxu1  ;;  %v5383_v3 = vld [vmem:[%s7471_s3 + $0x88] sm:$0xff] }
0x1578   :  { %v5384_v4 = vld [vmem:[%s7471_s3 + $0x90] sm:$0xff] }
0x157a   :  { %v3403_v8 = vpop.f32.mrb[40].mxu1 }
0x157b   :  { %v5884_v10 = vpop.f32.mrb[41].mxu1 }
0x157c   :  { %v5385_v10 = vld [vmem:[%s7471_s3 + $0x98] sm:$0xff] }
0x157e   :  { %v3570_v11 = vpop.f32.mrb[42].mxu1 }
0x157f   :  { %3575 = vrot.lane.b32.xlu0 %v3570_v11, %s6528_s25  ;;  %v5894_v33 = vpop.f32.mrb[43].mxu1  ;;  %v6179_v11 = vpack.c.bf16 %v5385_v10, %v5384_v4 }
0x1580   :  { %v5386_v33 = vld [vmem:[%s7471_s3 + $0xa0] sm:$0xff] }
0x1582   :  { %v3741_v50 = vpop.f32.mrb[44].mxu1 }
0x1583   :  { %v5904_v14 = vpop.f32.mrb[45].mxu1 }
0x1586   :  { %v3908_v12 = vpop.f32.mrb[46].mxu1 }
0x1587   :  { %3913 = vrot.lane.b32.xlu1 %v3908_v12, %s6528_s25  ;;  %v5914_v39 = vpop.f32.mrb[47].mxu1 }
0x15e9   :  { %v3238_v13 = vpop.permute.xlu1 %3237 }
0x15ea   :  { %v3240_v49 = vsel %vm588_vm13, %v3065_v28, %v3238_v13  ;;  %v6529_v28 = vmov 0.0|0.0  }
0x15eb   :  { %5924 = vmatmul.mubr.msk.f32.vlgmr.msra.gmra.mrb[40].mxu0 %vm399_vm11, %v3240_v49  ;;  %6207 = vmatprep.subr.bf16.mxu1 %v6529_v28 }
0x15f1   :  { %v3576_v16 = vpop.permute.xlu0 %3575 }
0x15f2   :  { %v3578_v31 = vsel %vm588_vm13, %v3403_v8, %v3576_v16  ;;  %v6175_v8 = vpack.c.bf16 %v5383_v3, %v5382_v2 }
0x15f3   :  { %5926 = vmatprep.mubr.msk.f32.mxu0 %vm399_vm11, %v3578_v31 }
0x15f4   :  { %6176 = vmatprep.subr.bf16.mxu0 %v6175_v8 }
0x15f5   :  { %6178 = vmatpush3.bf16.msra.mxu0 %v6175_v8 }
0x15f6   :  { %6180 = vmatprep.subr.bf16.mxu0 %v6179_v11 }
0x15f9   :  { %v3914_v17 = vpop.permute.xlu1 %3913  ;;  %6182 = vmatpush3.bf16.msra.mxu0 %v6179_v11 }
0x15fa   :  { %v3916_v18 = vsel %vm588_vm13, %v3741_v50, %v3914_v17  ;;  %v5387_v50 = vld [vmem:[%s7471_s3 + $0xa8] sm:$0xff] }
0x15fb   :  { %5927 = vmatmul.mubr.msk.f32.gmra.mrb[42].mxu0 %vm399_vm11, %v3916_v18  ;;  %v6183_v14 = vpack.c.bf16 %v5387_v50, %v5386_v33  ;;  %v5370_v18 = vld [vmem:[%s6605_s6 + $0x1] ss:$0 sm:$0xff]  ;;  %s7480_s6 = sld [smem:[#allocation15_spill]] }
0x15fd   :  { %6184 = vmatprep.subr.bf16.mxu0 %v6183_v14 }
0x15fe   :  { %6186 = vmatpush3.bf16.msra.mxu0 %v6183_v14 }
0x16be   :  { %v5925_v20 = vpop.f32.mrb[40].mxu0 }
0x16bf   :  { %v4014_v21 = vadd.f32 %v5925_v20, %v5363_v19  ;;  %v4008_v23 = vpop.f32.mrb[41].mxu0 }
0x16c0   :  { %v4009_v51 = vadd.f32 %v5363_v19, %v4008_v23 }
0x16c1   :  { %v4028_v24 = vadd.f32 %v4014_v21, %v7045_v58 }
0x16c2   :  { %v4027_v25 = vadd.f32 %v4009_v51, %v7043_v60 }
0x16c3   :  { %v4038_v7 = vsel %vm399_vm11, %v4028_v24, 0.0 }
0x16c4   :  { %4039 = vadd.xlane.f32.xlu1 %v4038_v7  ;;  %v4035_v27 = vsel %vm399_vm11, %v4027_v25, 0.0  ;;  %v4448_v7 = vld [vmem:[%s7477_s19] sm:$0xff] }
0x16c5   :  { %4036 = vadd.xlane.f32.xlu0 %v4035_v27  ;;  %v4449_v27 = vld [vmem:[%s7477_s19 + $0x8] sm:$0xff] }
0x16ce   :  { %v5928_v29 = vpop.f32.mrb[42].mxu0 }
0x16cf   :  { %v4018_v30 = vpop.f32.mrb[43].mxu0  ;;  %v4024_v32 = vadd.f32 %v5928_v29, %v5363_v19 }
0x16d0   :  { %v4019_v6 = vadd.f32 %v5363_v19, %v4018_v30 }
0x16d1   :  { %v4030_v35 = vadd.f32 %v4024_v32, %v7069_v26 }
0x16d2   :  { %v4029_v34 = vadd.f32 %v4019_v6, %v7067_v59 }
0x16d3   :  { %v4044_v58 = vsel %vm399_vm11, %v4030_v35, 0.0 }
0x16d4   :  { %v4041_v36 = vsel %vm399_vm11, %v4029_v34, 0.0 }
0x16d5   :  { %4042 = vadd.xlane.f32.xlu0 %v4041_v36 }
0x16d9   :  { %4045 = vadd.xlane.f32.xlu0 %v4044_v58 }
0x1751   :  { %v4040_v60 = vpop.xlane.xlu1 %4039 }
0x1752   :  { %v4048_v37 = vmul.f32 0.03125, %v4040_v60  ;;  %v4037_v40 = vpop.xlane.xlu0 %4036 }
0x1753   :  { %v4047_v0 = vmul.f32 0.03125, %v4037_v40 }
0x1754   :  { %v4052_v9 = vsub.f32 %v4028_v24, %v4048_v37  ;;  %v5371_v24 = vld [vmem:[%s7470_s29 + $0x1] ss:$0 sm:$0xff] }
0x1755   :  { %v4051_v41 = vsub.f32 %v4027_v25, %v4047_v0 }
0x1756   :  { %v4056_v42 = vmul.f32 %v4052_v9, %v4052_v9 }
0x1757   :  { %v4055_v43 = vmul.f32 %v4051_v41, %v4051_v41 }
0x1758   :  { %v4062_v53 = vsel %vm399_vm11, %v4056_v42, 0.0 }
0x1759   :  { %4063 = vadd.xlane.f32.xlu0 %v4062_v53  ;;  %v4059_v59 = vsel %vm399_vm11, %v4055_v43, 0.0 }
0x175a   :  { %4060 = vadd.xlane.f32.xlu1 %v4059_v59 }
0x1762   :  { %v4043_v26 = vpop.xlane.xlu0 %4042 }
0x1763   :  { %v4049_v44 = vmul.f32 0.03125, %v4043_v26  ;;  %v5388_v26 = vld [vmem:[%s7471_s3 + $0xb0] sm:$0xff] }
0x1765   :  { %v7260_v45 = vsub.f32 %v4029_v34, %v4049_v44  ;;  %v6208_v34 = vpack.c.bf16 %v4449_v27, %v4448_v7  ;;  %v5389_v44 = vld [vmem:[%s7471_s3 + $0xb8] sm:$0xff] }
0x1766   :  { %v4046_v47 = vpop.xlane.xlu0 %4045 }
0x1767   :  { %v4050_v48 = vmul.f32 0.03125, %v4046_v47  ;;  %v4057_v38 = vmul.f32 %v7260_v45, %v7260_v45  ;;  %v5391_v47 = vld [vmem:[%s7471_s3 + $0xc8] sm:$0xff] }
0x1769   :  { %v7264_v46 = vsub.f32 %v4030_v35, %v4050_v48  ;;  %v4065_v52 = vsel %vm399_vm11, %v4057_v38, 0.0  ;;  %v5392_v38 = vld [vmem:[%s7471_s3 + $0xd0] sm:$0xff] }
0x176a   :  { %4066 = vadd.xlane.f32.xlu1 %v4065_v52 }
0x176b   :  { %v4058_v54 = vmul.f32 %v7264_v46, %v7264_v46 }
0x176d   :  { %v4068_v55 = vsel %vm399_vm11, %v4058_v54, 0.0  ;;  %v5394_v54 = vld [vmem:[%s7471_s3 + $0xe0] sm:$0xff] }
0x176e   :  { %4069 = vadd.xlane.f32.xlu0 %v4068_v55  ;;  %v5395_v55 = vld [vmem:[%s7471_s3 + $0xe8] sm:$0xff] }
0x176f   :  { %v6199_v56 = vpack.c.bf16 %v5395_v55, %v5394_v54 }
0x177b   :  { %4443 = vperm.xlu1 %6310, %v4441_v63   ;;  %v6203_v63 = vpack.c.bf16 %v5397_v22, %v5396_v62 }
0x17e6   :  { %v4064_v12 = vpop.xlane.xlu0 %4063 }
0x17e7   :  { %v4072_v39 = vmul.f32 0.03125, %v4064_v12  ;;  %v4061_v13 = vpop.xlane.xlu1 %4060 }
0x17e8   :  { %v4071_v49 = vmul.f32 0.03125, %v4061_v13 }
0x17e9   :  { %v4076_v16 = vadd.f32 1e-12, %v4072_v39 }
0x17ea   :  { %v4075_v31 = vadd.f32 1e-12, %v4071_v49 }
0x17eb   :  { %6407 = vrsqrt.f32 %v4076_v16 }
0x17ec   :  { %6409 = vrsqrt.f32 %v4075_v31 }
0x17f5   :  { %v6408_v17 = vpop.eup %6407 }
0x17f6   :  { %v6410_v19 = vpop.eup %6409  ;;  %v4084_v20 = vmul.f32 %v6408_v17, %v4052_v9 }
0x17f7   :  { %v4067_v21 = vpop.xlane.xlu1 %4066  ;;  %v4083_v23 = vmul.f32 %v6410_v19, %v4051_v41 }
0x17f8   :  { %v4073_v51 = vmul.f32 0.03125, %v4067_v21  ;;  %v4094_v25 = vmul.f32 %v5370_v18, %v4084_v20 }
0x17f9   :  { %v4093_v29 = vmul.f32 %v5370_v18, %v4083_v23 }
0x17fa   :  { %v4077_v30 = vadd.f32 1e-12, %v4073_v51  ;;  %v7288_v36 = vadd.f32 %v5371_v24, %v4094_v25 }
0x17fb   :  { %v4070_v32 = vpop.xlane.xlu0 %4069  ;;  %v7286_v6 = vadd.f32 %v5371_v24, %v4093_v29  ;;  %v4444_v43 = vpop.permute.xlu1 %4443 }
0x17fc   :  { %6411 = vrsqrt.f32 %v4077_v30  ;;  %v4074_v35 = vmul.f32 0.03125, %v4070_v32  ;;  %vm4445_vm15 = vcmp.eq.s32.totalorder %v4444_v43, %v6702_v15  ;;  %v6187_v15 = vpack.c.bf16 %v5389_v44, %v5388_v26  ;;  %v5399_v32 = vld [vmem:[%s7473_s7 + $0x1] ss:$0 sm:$0xff] }
0x17fd   :  { %5937 = vmatprep.mubr.msk.f32.mxu1 %vm399_vm11, %v7286_v6  ;;  %v5404_v59 = vsel %vm4445_vm15, 1.0, %v6521_v5 }
0x17fe   :  { %v4078_v58 = vadd.f32 1e-12, %v4074_v35  ;;  %5938 = vmatmul.mubr.msk.f32.vlgmr.msra.gmra.mrb[48].mxu1 %vm399_vm11, %v7288_v36  ;;  %6188 = vmatprep.subr.bf16.mxu0 %v6187_v15 }
0x17ff   :  { %6209 = vmatpush3.bf16.msra.mxu1 %v6208_v34  ;;  %6190 = vmatpush3.bf16.msra.mxu0 %v6187_v15 }
0x1800   :  { %6413 = vrsqrt.f32 %v4078_v58  ;;  %6210 = vmatprep.subr.bf16.mxu1 %v6529_v28 }
0x1806   :  { %v6412_v60 = vpop.eup %6411 }
0x1807   :  { %v4085_v37 = vmul.f32 %v6412_v60, %v7260_v45  ;;  %v5390_v45 = vld [vmem:[%s7471_s3 + $0xc0] sm:$0xff] }
0x1808   :  { %v6191_v48 = vpack.c.bf16 %v5391_v47, %v5390_v45 }
0x1809   :  { %v4095_v40 = vmul.f32 %v5370_v18, %v4085_v37 }
0x180a   :  { %v6414_v0 = vpop.eup %6413  ;;  %6192 = vmatprep.subr.bf16.mxu0 %v6191_v48 }
0x180b   :  { %v7296_v9 = vadd.f32 %v5371_v24, %v4095_v40  ;;  %v4086_v41 = vmul.f32 %v6414_v0, %v7264_v46  ;;  %6194 = vmatpush3.bf16.msra.mxu0 %v6191_v48  ;;  %v5393_v46 = vld [vmem:[%s7471_s3 + $0xd8] sm:$0xff] }
0x180c   :  { %v6195_v52 = vpack.c.bf16 %v5393_v46, %v5392_v38 }
0x180d   :  { %5940 = vmatprep.mubr.msk.f32.mxu1 %vm399_vm11, %v7296_v9  ;;  %v4096_v42 = vmul.f32 %v5370_v18, %v4086_v41 }
0x180e   :  { %6196 = vmatprep.subr.bf16.mxu0 %v6195_v52 }
0x180f   :  { %v7301_v53 = vadd.f32 %v5371_v24, %v4096_v42  ;;  %6198 = vmatpush3.bf16.msra.mxu0 %v6195_v52 }
0x1810   :  { %6200 = vmatprep.subr.bf16.mxu0 %v6199_v56 }
0x1811   :  { %5941 = vmatmul.mubr.msk.f32.gmra.mrb[50].mxu1 %vm399_vm11, %v7301_v53 }
0x1812   :  { %5985 = vmatprep.mubr.msk.f32.mxu1 %vm6522_vm12, %v6521_v5 }
0x1813   :  { %6202 = vmatpush3.bf16.msra.mxu0 %v6199_v56 }
0x1814   :  { %6204 = vmatprep.subr.bf16.mxu0 %v6203_v63 }
0x1815   :  { %5986 = vmatmul.mubr.msk.f32.vlgmr.msra.gmra.mrb[52].mxu1 %vm588_vm13, %v5404_v59 }
0x1816   :  { %5996 = vmatprep.mubr.msk.f32.mxu1 %vm6522_vm12, %v6521_v5 }
0x1817   :  { %6206 = vmatpush3.bf16.msra.mxu0 %v6203_v63 }
0x1818   :  { %6228 = vmatprep.subr.bf16.mxu0 %v6529_v28 }
0x18d1   :  { %v5939_v57 = vpop.f32.mrb[48].mxu1 }
0x18d2   :  { %v4204_v1 = vadd.f32 %v5939_v57, %v5377_v61  ;;  %v4198_v2 = vpop.f32.mrb[49].mxu1 }
0x18d3   :  { %v4199_v3 = vadd.f32 %v5377_v61, %v4198_v2 }
0x18d4   :  { %v4222_v4 = vmul.f32 0.70710677, %v4204_v1  ;;  %v4218_v12 = vmul.f32 0.5, %v4204_v1 }
0x18d5   :  { %v4221_v8 = vmul.f32 0.70710677, %v4199_v3  ;;  %v4217_v50 = vmul.f32 0.5, %v4199_v3 }
0x18d6   :  { %6415 = verf.f32 %v4222_v4 }
0x18d7   :  { %6417 = verf.f32 %v4221_v8  ;;  %v4524_v8 = vld [vmem:[%s7478_s24] sm:$0xff] }
0x18e0   :  { %v6416_v10 = vpop.eup %6415 }
0x18e1   :  { %v6418_v11 = vpop.eup %6417  ;;  %v4230_v33 = vadd.f32 1.0, %v6416_v10  ;;  %v4525_v10 = vld [vmem:[%s7478_s24 + $0x8] sm:$0xff] }
0x18e2   :  { %v4229_v14 = vadd.f32 1.0, %v6418_v11  ;;  %v6211_v11 = vpack.c.bf16 %v4525_v10, %v4524_v8 }
0x18e3   :  { %v4234_v49 = vmul.f32 %v4230_v33, %v4218_v12  ;;  %v4526_v33 = vld [vmem:[%s7478_s24 + $0x10] sm:$0xff]  ;;  %v4608_v12 = vld [vmem:[%s7479_s30] sm:$0xff] }
0x18e4   :  { %v5942_v39 = vpop.f32.mrb[50].mxu1  ;;  %v4233_v13 = vmul.f32 %v4229_v14, %v4217_v50  ;;  %6212 = vmatpush3.bf16.msra.mxu1 %v6211_v11  ;;  %v4527_v50 = vld [vmem:[%s7478_s24 + $0x18] sm:$0xff] }
0x18e5   :  { %v4214_v16 = vadd.f32 %v5942_v39, %v5377_v61  ;;  %v4208_v31 = vpop.f32.mrb[51].mxu1  ;;  %6213 = vmatprep.subr.bf16.mxu1 %v6529_v28  ;;  %v6214_v14 = vpack.c.bf16 %v4527_v50, %v4526_v33  ;;  %v4609_v39 = vld [vmem:[%s7479_s30 + $0x8] sm:$0xff] }
0x18e6   :  { %v4209_v17 = vadd.f32 %v5377_v61, %v4208_v31  ;;  %5975 = vmatprep.mubr.f32.mxu0 %v4233_v13  ;;  %v7349_v13 = vpack.c.bf16 %v4609_v39, %v4608_v12 }
0x18e7   :  { %v4224_v18 = vmul.f32 0.70710677, %v4214_v16  ;;  %5976 = vmatmul.mubr.f32.vlgmr.msra.gmra.mrb[44].mxu0 %v4234_v49  ;;  %v4220_v27 = vmul.f32 0.5, %v4214_v16  ;;  %v4610_v49 = vld [vmem:[%s7479_s30 + $0x10] sm:$0xff]  ;;  %v4611_v16 = vld [vmem:[%s7479_s30 + $0x18] sm:$0xff] }
0x18e8   :  { %v4223_v19 = vmul.f32 0.70710677, %v4209_v17  ;;  %v7324_v20 = vpop.f32.mrb[52].mxu1  ;;  %v4219_v25 = vmul.f32 0.5, %v4209_v17  ;;  %6215 = vmatpush3.bf16.msra.mxu1 %v6214_v14  ;;  %6230 = vmatpush3.bf16.msra.mxu0 %v7349_v13  ;;  %v7355_v31 = vpack.c.bf16 %v4611_v16, %v4610_v49 }
0x18e9   :  { %6419 = verf.f32 %v4224_v18  ;;  %v5987_v21 = vpop.f32.mrb[53].mxu1  ;;  %6216 = vmatprep.subr.bf16.mxu1 %v6529_v28  ;;  %6231 = vmatprep.subr.bf16.mxu0 %v6529_v28 }
0x18ea   :  { %6421 = verf.f32 %v4223_v19 }
0x18ec   :  { %6233 = vmatpush3.bf16.msra.mxu0 %v7355_v31 }
0x18ed   :  { %6240 = vmatprep.subr.bf16.mxu0 %v6529_v28 }
0x18f3   :  { %v6420_v23 = vpop.eup %6419 }
0x18f4   :  { %v6422_v51 = vpop.eup %6421  ;;  %v4232_v24 = vadd.f32 1.0, %v6420_v23 }
0x18f5   :  { %v4231_v7 = vadd.f32 1.0, %v6422_v51 }
0x18f6   :  { %v4236_v30 = vmul.f32 %v4232_v24, %v4220_v27 }
0x18f7   :  { %v4235_v29 = vmul.f32 %v4231_v7, %v4219_v25 }
0x18f9   :  { %5978 = vmatprep.mubr.f32.mxu0 %v4235_v29 }
0x18fa   :  { %5979 = vmatmul.mubr.f32.gmra.mrb[46].mxu0 %v4236_v30 }
0x18fb   :  { %6029 = vmatprep.mubr.msk.f32.mxu0 %vm6522_vm12, %v6521_v5 }
0x19ba   :  { %v5977_v34 = vpop.f32.mrb[44].mxu0 }
0x19bb   :  { %v4334_v35 = vadd.f32 %v5977_v34, %v5399_v32  ;;  %v4328_v58 = vpop.f32.mrb[45].mxu0 }
0x19bc   :  { %v4329_v60 = vadd.f32 %v5399_v32, %v4328_v58  ;;  %v5402_v58 = vld [vmem:[%s7474_s10 + $0x1] ss:$0 sm:$0xff] }
0x19bd   :  { %v4348_v37 = vadd.f32 %v4334_v35, %v7288_v36 }
0x19be   :  { %v4347_v40 = vadd.f32 %v4329_v60, %v7286_v6 }
0x19bf   :  { %v4358_v0 = vsel %vm399_vm11, %v4348_v37, 0.0 }
0x19c0   :  { %4359 = vadd.xlane.f32.xlu0 %v4358_v0  ;;  %v4355_v41 = vsel %vm399_vm11, %v4347_v40, 0.0 }
0x19c4   :  { %4356 = vadd.xlane.f32.xlu0 %v4355_v41  ;;  %v5403_v41 = vld [vmem:[%s7475_s11 + $0x1] ss:$0 sm:$0xff] }
0x19cd   :  { %v5980_v42 = vpop.f32.mrb[46].mxu0 }
0x19ce   :  { %v4338_v43 = vpop.f32.mrb[47].mxu0  ;;  %v4344_v59 = vadd.f32 %v5980_v42, %v5399_v32 }
0x19cf   :  { %v4339_v26 = vadd.f32 %v5399_v32, %v4338_v43 }
0x19d0   :  { %v4350_v15 = vadd.f32 %v4344_v59, %v7301_v53 }
0x19d1   :  { %v4349_v44 = vadd.f32 %v4339_v26, %v7296_v9 }
0x19d2   :  { %v4364_v36 = vsel %vm399_vm11, %v4350_v15, 0.0 }
0x19d3   :  { %v4361_v45 = vsel %vm399_vm11, %v4349_v44, 0.0 }
0x19d4   :  { %4362 = vadd.xlane.f32.xlu0 %v4361_v45 }
0x19d8   :  { %4365 = vadd.xlane.f32.xlu0 %v4364_v36 }
0x1a4d   :  { %v4360_v6 = vpop.xlane.xlu0 %4359 }
0x1a4e   :  { %v4368_v47 = vmul.f32 0.03125, %v4360_v6 }
0x1a50   :  { %v4372_v48 = vsub.f32 %v4348_v37, %v4368_v47 }
0x1a51   :  { %v4357_v38 = vpop.xlane.xlu0 %4356 }
0x1a52   :  { %v4367_v46 = vmul.f32 0.03125, %v4357_v38  ;;  %v4376_v52 = vmul.f32 %v4372_v48, %v4372_v48 }
0x1a54   :  { %v4371_v54 = vsub.f32 %v4347_v40, %v4367_v46  ;;  %v4382_v55 = vsel %vm399_vm11, %v4376_v52, 0.0 }
0x1a55   :  { %4383 = vadd.xlane.f32.xlu1 %v4382_v55 }
0x1a56   :  { %v4375_v9 = vmul.f32 %v4371_v54, %v4371_v54 }
0x1a58   :  { %v4379_v53 = vsel %vm399_vm11, %v4375_v9, 0.0 }
0x1a59   :  { %4380 = vadd.xlane.f32.xlu0 %v4379_v53  ;;  %v5406_v53 = vld [vmem:[%s7480_s6] ss:$0 sm:$0xff] }
0x1a61   :  { %v4363_v56 = vpop.xlane.xlu0 %4362 }
0x1a62   :  { %v4369_v62 = vmul.f32 0.03125, %v4363_v56 }
0x1a64   :  { %v4373_v22 = vsub.f32 %v4349_v44, %v4369_v62 }
0x1a65   :  { %v4366_v63 = vpop.xlane.xlu0 %4365 }
0x1a66   :  { %v4370_v61 = vmul.f32 0.03125, %v4366_v63  ;;  %v4377_v57 = vmul.f32 %v4373_v22, %v4373_v22 }
0x1a68   :  { %v4374_v1 = vsub.f32 %v4350_v15, %v4370_v61  ;;  %v4385_v2 = vsel %vm399_vm11, %v4377_v57, 0.0 }
0x1a69   :  { %4386 = vadd.xlane.f32.xlu0 %v4385_v2 }
0x1a6a   :  { %v4378_v3 = vmul.f32 %v4374_v1, %v4374_v1 }
0x1a6c   :  { %v4388_v4 = vsel %vm399_vm11, %v4378_v3, 0.0 }
0x1a6d   :  { %4389 = vadd.xlane.f32.xlu0 %v4388_v4 }
0x1ae2   :  { %v4384_v17 = vpop.xlane.xlu1 %4383 }
0x1ae3   :  { %v4392_v19 = vmul.f32 0.03125, %v4384_v17 }
0x1ae5   :  { %v4396_v23 = vadd.f32 1e-12, %v4392_v19 }
0x1ae6   :  { %v4381_v18 = vpop.xlane.xlu0 %4380 }
0x1ae7   :  { %v4391_v21 = vmul.f32 0.03125, %v4381_v18  ;;  %6423 = vrsqrt.f32 %v4396_v23 }
0x1ae9   :  { %v4395_v51 = vadd.f32 1e-12, %v4391_v21 }
0x1aeb   :  { %6425 = vrsqrt.f32 %v4395_v51 }
0x1af1   :  { %v6424_v32 = vpop.eup %6423 }
0x1af2   :  { %v4404_v35 = vmul.f32 %v6424_v32, %v4372_v48 }
0x1af4   :  { %v4414_v40 = vmul.f32 %v5402_v58, %v4404_v35 }
0x1af5   :  { %v6426_v34 = vpop.eup %6425 }
0x1af6   :  { %v4387_v24 = vpop.xlane.xlu0 %4386  ;;  %v4403_v60 = vmul.f32 %v6426_v34, %v4371_v54  ;;  %v4424_v26 = vadd.f32 %v5403_v41, %v4414_v40 }
0x1af7   :  { %v4393_v25 = vmul.f32 0.03125, %v4387_v24 }
0x1af8   :  { %v4413_v42 = vmul.f32 %v5402_v58, %v4403_v60  ;;  %v4428_v47 = vrot.slane %v4424_v26, 7 }
0x1af9   :  { %v4397_v7 = vadd.f32 1e-12, %v4393_v25 }
0x1afa   :  { %v4390_v27 = vpop.xlane.xlu0 %4389  ;;  %v4423_v45 = vadd.f32 %v5403_v41, %v4413_v42 }
0x1afb   :  { %6427 = vrsqrt.f32 %v4397_v7  ;;  %v4394_v29 = vmul.f32 0.03125, %v4390_v27 }
0x1afc   :  { %v4437_v46 = vsel %vm4436_vm1, %v4423_v45, %v4428_v47 }
0x1afd   :  { %v4398_v30 = vadd.f32 1e-12, %v4394_v29 }
0x1aff   :  { %6429 = vrsqrt.f32 %v4398_v30 }
0x1b05   :  { %v6428_v37 = vpop.eup %6427 }
0x1b06   :  { %v4405_v0 = vmul.f32 %v6428_v37, %v4373_v22 }
0x1b08   :  { %v4415_v43 = vmul.f32 %v5402_v58, %v4405_v0 }
0x1b09   :  { %v6430_v59 = vpop.eup %6429 }
0x1b0a   :  { %v4425_v44 = vadd.f32 %v5403_v41, %v4415_v43  ;;  %v4406_v15 = vmul.f32 %v6430_v59, %v4374_v1 }
0x1b0c   :  { %v4416_v36 = vmul.f32 %v5402_v58, %v4406_v15  ;;  %v4431_v6 = vrot.slane %v4425_v44, 6 }
0x1b0e   :  { %v4426_v38 = vadd.f32 %v5403_v41, %v4416_v36  ;;  %v4438_v52 = vsel %vm202_vm0, %v4437_v46, %v4431_v6  ;;  %vm5129_vm0 = vcmask 1043456  }
0x1b10   :  { %v4434_v48 = vrot.slane %v4426_v38, 5 }
0x1b12   :  { %v4440_v54 = vsel %vm4439_vm2, %v4438_v52, %v4434_v48 }
0x1b13   :  { %v4523_v55 = vadd.f32 %v7324_v20, %v4440_v54 }
0x1b15   :  { %5997 = vmatmul.mubr.msk.f32.vlgmr.msra.gmra.mrb[54].mxu1 %vm399_vm11, %v4523_v55 }
0x1b16   :  { %6218 = vmatpush3.bf16.msra.mxu1 %v7349_v13  ;;  %6007 = vmatprep.mubr.msk.f32.mxu1 %vm6522_vm12, %v6521_v5 }
0x1b17   :  { %6219 = vmatprep.subr.bf16.mxu1 %v6529_v28 }
0x1b1a   :  { %6221 = vmatpush3.bf16.msra.mxu1 %v7355_v31 }
0x1b1b   :  { %6222 = vmatprep.subr.bf16.mxu1 %v6529_v28 }
0x1b1d   :  { %6008 = vmatmul.mubr.f32.vlgmr.msra.gmra.mrb[56].mxu1 %v6521_v5 }
0x1b1e   :  { %6224 = vmatpush3.bf16.msra.mxu1 %v7349_v13  ;;  %6018 = vmatprep.mubr.msk.f32.mxu1 %vm6522_vm12, %v6521_v5 }
0x1b1f   :  { %6225 = vmatprep.subr.bf16.mxu1 %v6529_v28 }
0x1b22   :  { %6227 = vmatpush3.bf16.msra.mxu1 %v7355_v31 }
0x1b23   :  { %6234 = vmatprep.subr.bf16.mxu1 %v6529_v28 }
0x1be8   :  { %v4604_v20 = vpop.f32.mrb[54].mxu1 }
0x1be9   :  { %v5998_v9 = vpop.f32.mrb[55].mxu1  ;;  %v7378_v56 = vadd.f32 %v5406_v53, %v4604_v20 }
0x1bf0   :  { %v4681_v62 = vpop.f32.mrb[56].mxu1 }
0x1bf1   :  { %v4685_v22 = vadd.f32 %v4681_v62, %v7378_v56  ;;  %v6009_v63 = vpop.f32.mrb[57].mxu1 }
0x1bf3   :  { %6431 = vtanh.f32 %v4685_v22  ;;  %v5408_v57 = vmul.f32 -1.442695, %v4685_v22 }
0x1bf5   :  { %6433 = vpow2.f32 %v5408_v57 }
0x1bfd   :  { %v6432_v61 = vpop.eup %6431 }
0x1bfe   :  { %4695 = vrot.lane.b32.xlu0 %v6432_v61, %s6526_s13 }
0x1bff   :  { %v6434_v1 = vpop.eup %6433 }
0x1c00   :  { %v4689_v2 = vadd.f32 1.0, %v6434_v1 }
0x1c02   :  { %6435 = vrcp.f32 %v4689_v2 }
0x1c0c   :  { %v6436_v3 = vpop.eup %6435 }
0x1c0d   :  { %v4693_v10 = vmul.f32 0.0, %v6436_v3 }
0x1c70   :  { %v4696_v4 = vpop.permute.xlu0 %4695 }
0x1c71   :  { %v4698_v8 = vmul.f32 %v6436_v3, %v4696_v4 }
0x1c73   :  { %4700 = vrot.lane.b32.xlu0 %v4698_v8, %s6530_s20 }
0x1ce5   :  { %v4701_v11 = vpop.permute.xlu0 %4700 }
0x1ce6   :  { %v4703_v33 = vadd.f32 %v4701_v11, %v4693_v10  ;;  %v5030_v10 = vld [vmem:[%s7481_s15] sm:$0xff]  ;;  %v5031_v11 = vld [vmem:[%s7481_s15 + $0x8] sm:$0xff] }
0x1ce8   :  { %6437 = vtanh.f32 %v4703_v33 }
0x1cf2   :  { %v6438_v50 = vpop.eup %6437 }
0x1cf3   :  { %4706 = vrot.lane.b32.xlu1 %v6438_v50, %s6526_s13  ;;  %v6241_v50 = vpack.c.bf16 %v5031_v11, %v5030_v10 }
0x1d65   :  { %v4707_v14 = vpop.permute.xlu1 %4706 }
0x1d66   :  { %v4709_v12 = vmul.f32 %v6436_v3, %v4707_v14  ;;  %v5033_v14 = vld [vmem:[%s7481_s15 + $0x18] sm:$0xff] }
0x1d68   :  { %4711 = vrot.lane.b32.xlu0 %v4709_v12, %s6530_s20 }
0x1dda   :  { %v4712_v39 = vpop.permute.xlu0 %4711 }
0x1ddb   :  { %6019 = vmatmul.mubr.msk.f32.vlgmr.msra.gmra.mrb[58].mxu1 %vm399_vm11, %v4712_v39 }
0x1ddc   :  { %6236 = vmatpush3.bf16.msra.mxu1 %v7349_v13  ;;  %6040 = vmatprep.mubr.msk.f32.mxu1 %vm6522_vm12, %v6521_v5 }
0x1ddd   :  { %6237 = vmatprep.subr.bf16.mxu1 %v6529_v28 }
0x1de0   :  { %6239 = vmatpush3.bf16.msra.mxu1 %v7355_v31  ;;  %v4797_v31 = vrot.slane %v4703_v33, 7  ;;  %v5032_v33 = vld [vmem:[%s7481_s15 + $0x10] sm:$0xff] }
0x1de1   :  { %6246 = vmatprep.subr.bf16.mxu1 %v6529_v28  ;;  %v6244_v12 = vpack.c.bf16 %v5033_v14, %v5032_v33 }
0x1eae   :  { %v4781_v49 = vpop.f32.mrb[58].mxu1 }
0x1eaf   :  { %v4786_v16 = vrot.slane %v4781_v49, 7  ;;  %v6020_v17 = vpop.f32.mrb[59].mxu1  ;;  %v5111_v49 = vld [vmem:[%s6675_s12] sm:$0xff] }
0x1eb0   :  { %v5113_v17 = vld [vmem:[%s6675_s12 + $0x10] sm:$0xff] }
0x1eb1   :  { %v4788_v18 = vadd.f32 %v4786_v16, %v7378_v56  ;;  %v5112_v16 = vld [vmem:[%s6675_s12 + $0x8] sm:$0xff] }
0x1eb3   :  { %6439 = vtanh.f32 %v4788_v18  ;;  %v5410_v21 = vmul.f32 -1.442695, %v4788_v18  ;;  %v6247_v18 = vpack.c.bf16 %v5112_v16, %v5111_v49 }
0x1eb5   :  { %6441 = vpow2.f32 %v5410_v21 }
0x1ebd   :  { %v6440_v19 = vpop.eup %6439 }
0x1ebe   :  { %4801 = vrot.lane.b32.xlu0 %v6440_v19, %s6526_s13  ;;  %v5114_v19 = vld [vmem:[%s6675_s12 + $0x18] sm:$0xff] }
0x1ebf   :  { %v6442_v13 = vpop.eup %6441  ;;  %v6250_v21 = vpack.c.bf16 %v5114_v19, %v5113_v17 }
0x1ec0   :  { %v4792_v23 = vadd.f32 1.0, %v6442_v13  ;;  %v5115_v13 = vld [vmem:[%s6675_s12 + $0x20] sm:$0xff] }
0x1ec2   :  { %6443 = vrcp.f32 %v4792_v23  ;;  %v5116_v23 = vld [vmem:[%s6675_s12 + $0x28] sm:$0xff] }
0x1ecc   :  { %v6444_v51 = vpop.eup %6443 }
0x1ecd   :  { %v4799_v7 = vmul.f32 %v6444_v51, %v4797_v31  ;;  %v5118_v31 = vld [vmem:[%s6675_s12 + $0x38] sm:$0xff] }
0x1f30   :  { %v4802_v24 = vpop.permute.xlu0 %4801 }
0x1f31   :  { %v4804_v25 = vmul.f32 %v6444_v51, %v4802_v24 }
0x1f33   :  { %4806 = vrot.lane.b32.xlu0 %v4804_v25, %s6530_s20  ;;  %v5117_v25 = vld [vmem:[%s6675_s12 + $0x30] sm:$0xff] }
0x1fa5   :  { %v4807_v27 = vpop.permute.xlu0 %4806 }
0x1fa6   :  { %v4809_v29 = vadd.f32 %v4807_v27, %v4799_v7 }
0x1fa8   :  { %6445 = vtanh.f32 %v4809_v29  ;;  %v4904_v45 = vrot.slane %v4809_v29, 7  ;;  %v6256_v29 = vpack.c.bf16 %v5118_v31, %v5117_v25 }
0x1fb2   :  { %v6446_v30 = vpop.eup %6445 }
0x1fb3   :  { %4812 = vrot.lane.b32.xlu0 %v6446_v30, %s6526_s13  ;;  %v5119_v30 = vld [vmem:[%s6675_s12 + $0x40] sm:$0xff] }
0x2025   :  { %v4813_v32 = vpop.permute.xlu0 %4812 }
0x2026   :  { %v4815_v34 = vmul.f32 %v6444_v51, %v4813_v32  ;;  %v6253_v51 = vpack.c.bf16 %v5116_v23, %v5115_v13  ;;  %v5120_v32 = vld [vmem:[%s6675_s12 + $0x48] sm:$0xff] }
0x2028   :  { %v4817_v35 = vrot.slane %v4815_v34, 1  ;;  %v6259_v34 = vpack.c.bf16 %v5120_v32, %v5119_v30 }
0x202a   :  { %4818 = vrot.lane.b32.xlu1 %v4817_v35, %s6530_s20  ;;  %v5121_v35 = vld [vmem:[%s6675_s12 + $0x50] sm:$0xff] }
0x209c   :  { %v4819_v58 = vpop.permute.xlu1 %4818 }
0x209d   :  { %6030 = vmatmul.mubr.msk.f32.vlgmr.msra.gmra.mrb[48].mxu0 %vm399_vm11, %v4819_v58  ;;  %v5122_v58 = vld [vmem:[%s6675_s12 + $0x58] sm:$0xff] }
0x209e   :  { %6051 = vmatprep.mubr.msk.f32.mxu0 %vm6522_vm12, %v6521_v5  ;;  %6242 = vmatpush3.bf16.msra.mxu0 %v6241_v50 }
0x209f   :  { %6243 = vmatprep.subr.bf16.mxu0 %v6529_v28 }
0x20a2   :  { %6245 = vmatpush3.bf16.msra.mxu0 %v6244_v12 }
0x2170   :  { %v4888_v60 = vpop.f32.mrb[48].mxu0 }
0x2171   :  { %v4893_v37 = vrot.slane %v4888_v60, 6  ;;  %v6031_v40 = vpop.f32.mrb[49].mxu0  ;;  %v6262_v60 = vpack.c.bf16 %v5122_v58, %v5121_v35 }
0x2172   :  { %v5123_v40 = vld [vmem:[%s6675_s12 + $0x60] sm:$0xf] }
0x2173   :  { %v4895_v0 = vadd.f32 %v4893_v37, %v7378_v56 }
0x2175   :  { %6447 = vtanh.f32 %v4895_v0  ;;  %v5412_v42 = vmul.f32 -1.442695, %v4895_v0  ;;  %v5034_v0 = vld [vmem:[%s6670_s17] sm:$0x1]  ;;  %s6531_s17 = smov [#allocation2]  }
0x2176   :  { %s5223_s12 = sshll.u32 %s6531_s17, 4  ;;  %s5224_s12 = int_to_ptr.vmem [resolvable:$true] %s5223_s12 }
0x2177   :  { %6449 = vpow2.f32 %v5412_v42  ;;  %s6471_s16 = scalar_lea.vmem %s5224_s12, 32  ;;  %p6472_p1 = scmp.lt.s32.totalorder %s5224_s12, %s5224_s12 }
0x217f   :  { %v6448_v41 = vpop.eup %6447 }
0x2180   :  { %4908 = vrot.lane.b32.xlu0 %v6448_v41, %s6526_s13 }
0x2181   :  { %v6450_v43 = vpop.eup %6449 }
0x2182   :  { %v4899_v59 = vadd.f32 1.0, %v6450_v43 }
0x2184   :  { %6451 = vrcp.f32 %v4899_v59  ;;  %v5124_v59 = vld [vmem:[%s6680_s27] sm:$0x1]  ;;  %s6467_s27 = scalar_lea.vmem %s5224_s12, 16 }
0x2185   :  { %p6468_p0 = scmp.ne.s32.totalorder %s5224_s12, %s6467_s27  ;;  %p6473_p2 = scmp.lt.s32.totalorder %s6471_s16, %s6467_s27 }
0x2187   :  { %p6474_p3 = por %p6473_p2, %p6472_p1 }
0x2189   :  { %p6475_p4 = pnand %p6474_p3, %p6468_p0 }
0x218e   :  { %v6452_v26 = vpop.eup %6451 }
0x218f   :  { %v4906_v36 = vmul.f32 %v6452_v26, %v4904_v45 }
0x21f2   :  { %v4909_v44 = vpop.permute.xlu0 %4908 }
0x21f3   :  { %v4911_v15 = vmul.f32 %v6452_v26, %v4909_v44 }
0x21f5   :  { %4913 = vrot.lane.b32.xlu1 %v4911_v15, %s6530_s20 }
0x2267   :  { %v4914_v6 = vpop.permute.xlu1 %4913 }
0x2268   :  { %v4916_v47 = vadd.f32 %v4914_v6, %v4906_v36 }
0x226a   :  { %6453 = vtanh.f32 %v4916_v47  ;;  %v5011_v3 = vrot.slane %v4916_v47, 7 }
0x2274   :  { %v6454_v38 = vpop.eup %6453 }
0x2275   :  { %4919 = vrot.lane.b32.xlu0 %v6454_v38, %s6526_s13 }
0x22e7   :  { %v4920_v48 = vpop.permute.xlu0 %4919 }
0x22e8   :  { %v4922_v46 = vmul.f32 %v6452_v26, %v4920_v48 }
0x22ea   :  { %v4924_v52 = vrot.slane %v4922_v46, 2 }
0x22ec   :  { %4925 = vrot.lane.b32.xlu1 %v4924_v52, %s6530_s20 }
0x235e   :  { %v4926_v54 = vpop.permute.xlu1 %4925 }
0x235f   :  { %6041 = vmatmul.mubr.msk.f32.vlgmr.msra.gmra.mrb[60].mxu1 %vm399_vm11, %v4926_v54 }
0x2360   :  { %6080 = vmatprep.mubr.msk.f32.mxu1 %vm6522_vm12, %v6521_v5  ;;  %6248 = vmatpush3.bf16.msra.mxu1 %v6247_v18 }
0x2361   :  { %6249 = vmatprep.subr.bf16.mxu1 %v6529_v28 }
0x2364   :  { %6251 = vmatpush3.bf16.msra.mxu1 %v6250_v21 }
0x2365   :  { %6252 = vmatprep.subr.bf16.mxu1 %v6529_v28 }
0x2368   :  { %6254 = vmatpush3.bf16.msra.mxu1 %v6253_v51 }
0x2369   :  { %6255 = vmatprep.subr.bf16.mxu1 %v6529_v28 }
0x236c   :  { %6257 = vmatpush3.bf16.msra.mxu1 %v6256_v29 }
0x236d   :  { %6258 = vmatprep.subr.bf16.mxu1 %v6529_v28 }
0x2370   :  { %6260 = vmatpush3.bf16.msra.mxu1 %v6259_v34 }
0x2371   :  { %6261 = vmatprep.subr.bf16.mxu1 %v6529_v28 }
0x2374   :  { %6263 = vmatpush3.bf16.msra.mxu1 %v6262_v60 }
0x2375   :  { %6078 = vmatprep.subr.mxu1 %v6521_v5 }
0x2378   :  { %6079 = vmatpush3.msk.msra.mxu1 %vm5129_vm0, %v5123_v40 }
0x2432   :  { %v4995_v55 = vpop.f32.mrb[60].mxu1 }
0x2433   :  { %v5000_v20 = vrot.slane %v4995_v55, 5  ;;  %v6042_v9 = vpop.f32.mrb[61].mxu1 }
0x2435   :  { %v5002_v53 = vadd.f32 %v5000_v20, %v7378_v56 }
0x2437   :  { %6455 = vtanh.f32 %v5002_v53  ;;  %v5414_v22 = vmul.f32 -1.442695, %v5002_v53 }
0x2439   :  { %6457 = vpow2.f32 %v5414_v22 }
0x2441   :  { %v6456_v62 = vpop.eup %6455 }
0x2442   :  { %5015 = vrot.lane.b32.xlu0 %v6456_v62, %s6526_s13 }
0x2443   :  { %v6458_v63 = vpop.eup %6457 }
0x2444   :  { %v5006_v61 = vadd.f32 1.0, %v6458_v63 }
0x2446   :  { %6459 = vrcp.f32 %v5006_v61 }
0x2450   :  { %v6460_v57 = vpop.eup %6459 }
0x2451   :  { %v5013_v56 = vmul.f32 %v6460_v57, %v5011_v3 }
0x24b4   :  { %v5016_v1 = vpop.permute.xlu0 %5015 }
0x24b5   :  { %v5018_v2 = vmul.f32 %v6460_v57, %v5016_v1 }
0x24b7   :  { %5020 = vrot.lane.b32.xlu1 %v5018_v2, %s6530_s20 }
0x2529   :  { %v5021_v4 = vpop.permute.xlu1 %5020 }
0x252a   :  { %v5023_v8 = vadd.f32 %v5021_v4, %v5013_v56 }
0x252c   :  { %6461 = vtanh.f32 %v5023_v8 }
0x2536   :  { %v6462_v39 = vpop.eup %6461 }
0x2537   :  { %5026 = vrot.lane.b32.xlu0 %v6462_v39, %s6526_s13 }
0x25a9   :  { %v5027_v24 = vpop.permute.xlu0 %5026 }
0x25aa   :  { %v5029_v7 = vmul.f32 %v6460_v57, %v5027_v24 }
0x25ac   :  { %v5036_v27 = vrot.slane %v5029_v7, 3 }
0x25ae   :  { %5037 = vrot.lane.b32.xlu1 %v5036_v27, %s6530_s20 }
0x2620   :  { %v5038_v37 = vpop.permute.xlu1 %5037 }
0x2621   :  { %6052 = vmatmul.mubr.msk.f32.vlgmr.msra.gmra.mrb[50].mxu0 %vm399_vm11, %v5038_v37 }
0x26f4   :  { %v5107_v41 = vpop.f32.mrb[50].mxu0 }
0x26f5   :  { %v5108_v42 = vadd.f32 %v5107_v41, %v5034_v0  ;;  %v6053_v43 = vpop.f32.mrb[51].mxu0 }
0x26f7   :  { %6081 = vmatmul.mubr.msk.f32.vlgmr.msra.gmra.mrb[62].mxu1 %vm5125_vm3, %v5108_v42 }
0x27ca   :  { %v5199_v26 = vpop.f32.mrb[62].mxu1 }
0x27cb   :  { %v5200_v44 = vadd.f32 %v5199_v26, %v5124_v59  ;;  %v6082_v28 = vpop.f32.mrb[63].mxu1 }
0x27cd   :  { %v5204_v15 = vsel %vm5203_vm4, %v5200_v44, -inf }
0x27ce   :  { %5205 = vmax.xlane.f32.xlu0 %v5204_v15 }
0x285b   :  { %v5206_v5 = vpop.xlane.xlu0 %5205 }
0x285c   :  { %v5207_v45 = vsub.f32 %v5200_v44, %v5206_v5 }
0x285e   :  { %v5208_v36 = vmul.f32 1.442695, %v5207_v45 }
0x2860   :  { %6463 = vpow2.f32 %v5208_v36 }
0x286a   :  { %v6464_v6 = vpop.eup %6463 }
0x286b   :  { %v5210_v47 = vsel %vm5203_vm4, %v6464_v6, 0.0 }
0x286c   :  { %5211 = vadd.xlane.f32.xlu1 %v5210_v47 }
0x28f9   :  { %v5212_v38 = vpop.xlane.xlu1 %5211 }
0x28fa   :  { %6465 = vlog2.f32 %v5212_v38 }
0x2904   :  { %v6466_v48 = vpop.eup %6465 }
0x2905   :  { %v5214_v46 = vmul.f32 0.6931472, %v6466_v48 }
0x2907   :  { %v5215_v52 = vsub.f32 %v5207_v45, %v5214_v46 }
0x2909   :  { %5216 = vst.msk [vmem:[#allocation2] sm:$0x1] %vm5203_vm4, %v5215_v52 }
0x290a   :  { %6478 = shalt.err (!%p6475_p4)
}
0x290b   :  { %s6479_s18 = scalar_lea.hbm %s6685_s4, 16 }
0x290c   :  { %p6480_p5 = scmp.ne.s32.totalorder %s6685_s4, %s6479_s18  ;;  %p6483_p6 = scmp.lt.u32.totalorder %s6479_s18, %s6685_s4 }
0x290e   :  { %p6485_p7 = pnand %p6483_p6, %p6480_p5 }
0x2910   :  { %6488 = shalt.err (!%p6485_p7)
}
0x2911   :  { %5226 = dma.vmem_to_hbm [thread:$0]  %s5224_s12, 16, %s6685_s4, [#allocation3]  }
0x2912   :  { %6489 = dma.done.wait [#allocation3], 16  }
0x2913   :  { %6490 = vsyncadd [#allocation3], 4294967280 }
0x2914   :  { %5230 = vsyncpa [#allocation3], 1 }

</bundles_post_ra>
